<compile_context>
chip_gen: v7x
topology: tpu7x:2x2x1
jax: 0.10.0
libtpu: 0.0.40
codegen_flags: <defaults>
</compile_context>

<pallas_src>
import jax
import jax.numpy as jnp
from jax import lax
from jax.experimental import pallas as pl
from jax.experimental.pallas import tpu as pltpu

MEL_N_CHANNELS = 40
MODEL_EM_SIZE = 256
MODEL_HIDDEN_SIZE = 256
MODEL_NUM_LAYERS = 3


# ----------------------------------------------------------------------------
# Fused kernel: layer-0 projection prologue + 3-layer LSTM recurrence + head
# ----------------------------------------------------------------------------
def speaker_encoder_kernel(x_ref, wih0_ref, whh0_ref, b0_ref,
                           w1_ref, b1_ref, w2_ref, b2_ref,
                           wlin_ref, blin_ref, out_ref, pg0_ref):
    B = out_ref.shape[0]
    TB = x_ref.shape[0]
    T = TB // B
    H = whh0_ref.shape[0]

    # ---- prologue: hoisted layer-0 input projection for the whole sequence ----
    # (T*B, D_in) @ (D_in, 4H): full MXU row utilization, off the serial path.
    x_bf = x_ref[...].astype(jnp.bfloat16)
    pg0 = jnp.dot(x_bf, wih0_ref[...], preferred_element_type=jnp.float32)
    pg0_ref[...] = pg0 + b0_ref[...]            # layer-0 bias folded in once

    # Hoist bias broadcasts out of the loop (JAX does not CSE broadcast_in_dim).
    b1 = jnp.broadcast_to(b1_ref[...], (B, 4 * H))
    b2 = jnp.broadcast_to(b2_ref[...], (B, 4 * H))

    def cell(gates, c_prev):
        # gate order packed [i, f, o, g]: one contiguous sigmoid + one tanh
        sg = jax.nn.sigmoid(gates[:, : 3 * H])
        i_g = sg[:, 0 * H:1 * H]
        f_g = sg[:, 1 * H:2 * H]
        o_g = sg[:, 2 * H:3 * H]
        g_g = jnp.tanh(gates[:, 3 * H:4 * H])
        c_new = f_g * c_prev + i_g * g_g
        h_new = o_g * jnp.tanh(c_new)
        return h_new, c_new

    def step(t, carry):
        h0, c0, h1, c1, h2, c2 = carry
        row = pl.multiple_of(t * B, B)

        # layer 0: precomputed input gates + single recurrent matmul
        g0 = pg0_ref[pl.ds(row, B), :] + jnp.dot(
            h0.astype(jnp.bfloat16), whh0_ref[...],
            preferred_element_type=jnp.float32)
        h0, c0 = cell(g0, c0)

        # layer 1: one fused matmul on concat([input, h_prev]) @ [W_ih; W_hh]
        xin1 = jnp.concatenate([h0, h1], axis=1).astype(jnp.bfloat16)
        g1 = jnp.dot(xin1, w1_ref[...], preferred_element_type=jnp.float32) + b1
        h1, c1 = cell(g1, c1)

        # layer 2
        xin2 = jnp.concatenate([h1, h2], axis=1).astype(jnp.bfloat16)
        g2 = jnp.dot(xin2, w2_ref[...], preferred_element_type=jnp.float32) + b2
        h2, c2 = cell(g2, c2)

        return h0, c0, h1, c1, h2, c2

    z = jnp.zeros((B, H), jnp.float32)
    _, _, _, _, h2, _ = lax.fori_loop(0, T, step, (z, z, z, z, z, z))

    # ---- fused head: Linear -> ReLU -> L2 normalize (eps outside sqrt, as in torch) ----
    y = jnp.dot(h2.astype(jnp.bfloat16), wlin_ref[...],
                preferred_element_type=jnp.float32) + blin_ref[...]
    y = jnp.maximum(y, 0.0)
    norm = jnp.sqrt(jnp.sum(y * y, axis=1, keepdims=True))
    out_ref[...] = y / (norm + 1e-5)


def speaker_encoder_pallas(x_flat, kp, *, B, T):
    D_in = x_flat.shape[1]
    H = MODEL_HIDDEN_SIZE
    E = MODEL_EM_SIZE
    return pl.pallas_call(
        speaker_encoder_kernel,
        out_shape=jax.ShapeDtypeStruct((B, E), jnp.float32),
        grid_spec=pltpu.PrefetchScalarGridSpec(
            num_scalar_prefetch=0,
            grid=(1,),
            in_specs=[
                pl.BlockSpec((T * B, D_in), lambda i: (0, 0)),      # x (time-major flat)
                pl.BlockSpec((D_in, 4 * H), lambda i: (0, 0)),      # W_ih layer 0
                pl.BlockSpec((H, 4 * H), lambda i: (0, 0)),         # W_hh layer 0
                pl.BlockSpec((1, 4 * H), lambda i: (0, 0)),         # b layer 0
                pl.BlockSpec((2 * H, 4 * H), lambda i: (0, 0)),     # [W_ih; W_hh] layer 1
                pl.BlockSpec((1, 4 * H), lambda i: (0, 0)),         # b layer 1
                pl.BlockSpec((2 * H, 4 * H), lambda i: (0, 0)),     # [W_ih; W_hh] layer 2
                pl.BlockSpec((1, 4 * H), lambda i: (0, 0)),         # b layer 2
                pl.BlockSpec((H, E), lambda i: (0, 0)),             # W_lin
                pl.BlockSpec((1, E), lambda i: (0, 0)),             # b_lin
            ],
            out_specs=pl.BlockSpec((B, E), lambda i: (0, 0)),
            scratch_shapes=[
                pltpu.VMEM((T * B, 4 * H), jnp.float32),            # precomputed layer-0 gates
            ],
        ),
        compiler_params=pltpu.CompilerParams(
            dimension_semantics=("arbitrary",),
            vmem_limit_bytes=32 * 1024 * 1024,  # headroom for long sequences (v5e 16 MiB default)
        ),
    )(x_flat, kp["wih0"], kp["whh0"], kp["b0"],
      kp["w1"], kp["b1"], kp["w2"], kp["b2"],
      kp["wlin"], kp["blin"])


@jax.jit
def speaker_encoder_forward(utterances, kp):
    """utterances: (B, T, MEL_N_CHANNELS), batch_first like the PyTorch module."""
    B, T, D = utterances.shape
    # layout plumbing only: time-major, flattened so row t*B + b corresponds to (t, b)
    x_flat = jnp.transpose(utterances, (1, 0, 2)).reshape(T * B, D)
    return speaker_encoder_pallas(x_flat, kp, B=B, T=T)


# ----------------------------------------------------------------------------
# Parameter construction (PyTorch-like) and packing into the fused-kernel layout
# ----------------------------------------------------------------------------
def init_params(key):
    """PyTorch-like params: transposed W, gate order [i, f, g, o], separate biases."""
    params = {}
    H = MODEL_HIDDEN_SIZE
    k = 1.0 / float(H) ** 0.5
    keys = jax.random.split(key, 4 * MODEL_NUM_LAYERS + 2)
    ki = 0
    for layer in range(MODEL_NUM_LAYERS):
        d_in = MEL_N_CHANNELS if layer == 0 else H
        w_ih = jax.random.uniform(keys[ki], (d_in, 4 * H), jnp.float32, -k, k); ki += 1
        w_hh = jax.random.uniform(keys[ki], (H, 4 * H), jnp.float32, -k, k); ki += 1
        b_ih = jax.random.uniform(keys[ki], (1, 4 * H), jnp.float32, -k, k); ki += 1
        b_hh = jax.random.uniform(keys[ki], (1, 4 * H), jnp.float32, -k, k); ki += 1
        params[f"lstm{layer}"] = (w_ih, w_hh, b_ih, b_hh)
    params["w_lin"] = jax.random.uniform(
        keys[ki], (H, MODEL_EM_SIZE), jnp.float32, -k, k); ki += 1
    params["b_lin"] = jax.random.uniform(
        keys[ki], (1, MODEL_EM_SIZE), jnp.float32, -k, k); ki += 1
    return params


def _reorder_ifgo_to_ifog(w):
    """Repack gate columns from torch's [i, f, g, o] to kernel order [i, f, o, g]."""
    H = w.shape[-1] // 4
    i, f, g, o = w[..., :H], w[..., H:2 * H], w[..., 2 * H:3 * H], w[..., 3 * H:]
    return jnp.concatenate([i, f, o, g], axis=-1)


def prepare_params(params):
    """Pack PyTorch-like params into the fused-kernel layout (bf16 MXU weights)."""
    kp = {}
    w_ih0, w_hh0, b_ih0, b_hh0 = params["lstm0"]
    kp["wih0"] = _reorder_ifgo_to_ifog(w_ih0).astype(jnp.bfloat16)
    kp["whh0"] = _reorder_ifgo_to_ifog(w_hh0).astype(jnp.bfloat16)
    kp["b0"] = _reorder_ifgo_to_ifog(b_ih0 + b_hh0)
    for layer in (1, 2):
        w_ih, w_hh, b_ih, b_hh = params[f"lstm{layer}"]
        w_stacked = jnp.concatenate([w_ih, w_hh], axis=0)          # (2H, 4H)
        kp[f"w{layer}"] = _reorder_ifgo_to_ifog(w_stacked).astype(jnp.bfloat16)
        kp[f"b{layer}"] = _reorder_ifgo_to_ifog(b_ih + b_hh)
    kp["wlin"] = params["w_lin"].astype(jnp.bfloat16)
    kp["blin"] = params["b_lin"]
    return kp


# ----------------------------------------------------------------------------
# Pure-JAX mirror of the kernel math (correctness check)
# ----------------------------------------------------------------------------
def reference_forward(utterances, kp):
    B, T, D = utterances.shape
    H = MODEL_HIDDEN_SIZE
    x = jnp.transpose(utterances, (1, 0, 2))  # (T, B, D)

    def cell(gates, c_prev):
        sg = jax.nn.sigmoid(gates[:, :3 * H])
        i_g, f_g, o_g = sg[:, :H], sg[:, H:2 * H], sg[:, 2 * H:3 * H]
        g_g = jnp.tanh(gates[:, 3 * H:])
        c_new = f_g * c_prev + i_g * g_g
        return o_g * jnp.tanh(c_new), c_new

    h = [jnp.zeros((B, H), jnp.float32) for _ in range(3)]
    c = [jnp.zeros((B, H), jnp.float32) for _ in range(3)]
    for t in range(T):
        xt = x[t].astype(jnp.bfloat16)
        g0 = (jnp.dot(xt, kp["wih0"], preferred_element_type=jnp.float32) + kp["b0"]
              + jnp.dot(h[0].astype(jnp.bfloat16), kp["whh0"],
                        preferred_element_type=jnp.float32))
        h[0], c[0] = cell(g0, c[0])
        xin1 = jnp.concatenate([h[0], h[1]], axis=1).astype(jnp.bfloat16)
        g1 = jnp.dot(xin1, kp["w1"], preferred_element_type=jnp.float32) + kp["b1"]
        h[1], c[1] = cell(g1, c[1])
        xin2 = jnp.concatenate([h[1], h[2]], axis=1).astype(jnp.bfloat16)
        g2 = jnp.dot(xin2, kp["w2"], preferred_element_type=jnp.float32) + kp["b2"]
        h[2], c[2] = cell(g2, c[2])
    y = jnp.dot(h[2].astype(jnp.bfloat16), kp["wlin"],
                preferred_element_type=jnp.float32) + kp["blin"]
    y = jnp.maximum(y, 0.0)
    norm = jnp.sqrt(jnp.sum(y * y, axis=1, keepdims=True))
    return y / (norm + 1e-5)


if __name__ == "__main__":
    key = jax.random.PRNGKey(0)
    k_x, k_p = jax.random.split(key)

    B, T = 8, 8  # small batch of utterances, short mel sequence
    utterances = jax.random.normal(k_x, (B, T, MEL_N_CHANNELS), jnp.float32)
    kparams = prepare_params(init_params(k_p))

    embeds = speaker_encoder_forward(utterances, kparams)
    embeds = jax.block_until_ready(embeds)

    assert embeds.shape == (B, MODEL_EM_SIZE)
    assert embeds.dtype == jnp.float32

    ref = jax.block_until_ready(reference_forward(utterances, kparams))
    max_err = float(jnp.max(jnp.abs(embeds - ref)))
    assert max_err < 5e-3, f"max abs error vs reference: {max_err}"

    print("KERNEL_OK")
</pallas_src>

<mosaic_0001>
module attributes {stable_mosaic.version = 11 : i64} {
  func.func @speaker_encoder_kernel(%arg0: i32, %arg1: memref<64x40xf32, #tpu.memory_space<vmem>>, %arg2: memref<40x1024xbf16, #tpu.memory_space<vmem>>, %arg3: memref<256x1024xbf16, #tpu.memory_space<vmem>>, %arg4: memref<1x1024xf32, #tpu.memory_space<vmem>>, %arg5: memref<512x1024xbf16, #tpu.memory_space<vmem>>, %arg6: memref<1x1024xf32, #tpu.memory_space<vmem>>, %arg7: memref<512x1024xbf16, #tpu.memory_space<vmem>>, %arg8: memref<1x1024xf32, #tpu.memory_space<vmem>>, %arg9: memref<256x256xbf16, #tpu.memory_space<vmem>>, %arg10: memref<1x256xf32, #tpu.memory_space<vmem>>, %arg11: memref<8x256xf32, #tpu.memory_space<vmem>>, %arg12: memref<64x1024xf32, #tpu.memory_space<vmem>>) attributes {dimension_semantics = [#tpu.dimension_semantics<arbitrary>], iteration_bounds = array<i64: 1>, scalar_prefetch = 0 : i64, scratch_operands = 1 : i64, tpu.core_type = #tpu.core_type<tc>, window_params = [{pipeline_mode = #tpu.pipeline_mode<synchronous>, transform_indices = @transform_0, window_bounds = array<i64: 64, 40>}, {pipeline_mode = #tpu.pipeline_mode<synchronous>, transform_indices = @transform_1, window_bounds = array<i64: 40, 1024>}, {pipeline_mode = #tpu.pipeline_mode<synchronous>, transform_indices = @transform_2, window_bounds = array<i64: 256, 1024>}, {pipeline_mode = #tpu.pipeline_mode<synchronous>, transform_indices = @transform_3, window_bounds = array<i64: 1, 1024>}, {pipeline_mode = #tpu.pipeline_mode<synchronous>, transform_indices = @transform_4, window_bounds = array<i64: 512, 1024>}, {pipeline_mode = #tpu.pipeline_mode<synchronous>, transform_indices = @transform_5, window_bounds = array<i64: 1, 1024>}, {pipeline_mode = #tpu.pipeline_mode<synchronous>, transform_indices = @transform_6, window_bounds = array<i64: 512, 1024>}, {pipeline_mode = #tpu.pipeline_mode<synchronous>, transform_indices = @transform_7, window_bounds = array<i64: 1, 1024>}, {pipeline_mode = #tpu.pipeline_mode<synchronous>, transform_indices = @transform_8, window_bounds = array<i64: 256, 256>}, {pipeline_mode = #tpu.pipeline_mode<synchronous>, transform_indices = @transform_9, window_bounds = array<i64: 1, 256>}, {pipeline_mode = #tpu.pipeline_mode<synchronous>, transform_indices = @transform_10, window_bounds = array<i64: 8, 256>}]} {
    %c0 = arith.constant 0 : index
    %c0_0 = arith.constant 0 : index
    %0 = vector.load %arg1[%c0, %c0_0] : memref<64x40xf32, #tpu.memory_space<vmem>>, vector<64x40xf32>
    %1 = arith.truncf %0 : vector<64x40xf32> to vector<64x40xbf16>
    %c0_1 = arith.constant 0 : index
    %c0_2 = arith.constant 0 : index
    %2 = vector.load %arg2[%c0_1, %c0_2] : memref<40x1024xbf16, #tpu.memory_space<vmem>>, vector<40x1024xbf16>
    %cst = arith.constant dense<0.000000e+00> : vector<64x1024xf32>
    %3 = tpu.matmul %1, %2, %cst {dimension_numbers = #tpu.dot_dimension_numbers<[1], [0], [0], [1], [0, 0, 1, 1], [], []>} : vector<64x40xbf16>, vector<40x1024xbf16>, vector<64x1024xf32> -> vector<64x1024xf32>
    %c0_3 = arith.constant 0 : index
    %c0_4 = arith.constant 0 : index
    %4 = vector.load %arg4[%c0_3, %c0_4] : memref<1x1024xf32, #tpu.memory_space<vmem>>, vector<1x1024xf32>
    %5 = vector.broadcast %4 : vector<1x1024xf32> to vector<64x1024xf32>
    %6 = arith.addf %3, %5 : vector<64x1024xf32>
    %c0_5 = arith.constant 0 : index
    %c0_6 = arith.constant 0 : index
    %7 = vector.load %arg12[%c0_5, %c0_6] : memref<64x1024xf32, #tpu.memory_space<vmem>>, vector<64x1024xf32>
    tpu.vector_store %arg12[%c0_5, %c0_6], %6 {strides = array<i32>} : memref<64x1024xf32, #tpu.memory_space<vmem>>, vector<64x1024xf32>,
    %c0_7 = arith.constant 0 : index
    %c0_8 = arith.constant 0 : index
    %8 = vector.load %arg6[%c0_7, %c0_8] : memref<1x1024xf32, #tpu.memory_space<vmem>>, vector<1x1024xf32>
    %9 = vector.shape_cast %8 : vector<1x1024xf32> to vector<1x1024xf32>
    %10 = vector.broadcast %9 : vector<1x1024xf32> to vector<8x1024xf32>
    %c0_9 = arith.constant 0 : index
    %c0_10 = arith.constant 0 : index
    %11 = vector.load %arg8[%c0_9, %c0_10] : memref<1x1024xf32, #tpu.memory_space<vmem>>, vector<1x1024xf32>
    %12 = vector.shape_cast %11 : vector<1x1024xf32> to vector<1x1024xf32>
    %13 = vector.broadcast %12 : vector<1x1024xf32> to vector<8x1024xf32>
    %cst_11 = arith.constant 0.000000e+00 : f32
    %14 = vector.broadcast %cst_11 : f32 to vector<8x256xf32>
    %c0_i32 = arith.constant 0 : i32
    %c8_i32 = arith.constant 8 : i32
    %15 = arith.addi %c0_i32, %c8_i32 : i32
    %c1_i32 = arith.constant 1 : i32
    %16:6 = scf.for %arg13 = %c0_i32 to %15 step %c1_i32 iter_args(%arg14 = %14, %arg15 = %14, %arg16 = %14, %arg17 = %14, %arg18 = %14, %arg19 = %14) -> (vector<8x256xf32>, vector<8x256xf32>, vector<8x256xf32>, vector<8x256xf32>, vector<8x256xf32>, vector<8x256xf32>)  : i32 {
      %c8_i32_23 = arith.constant 8 : i32
      %34 = arith.muli %arg13, %c8_i32_23 : i32
      %35 = tpu.assume_multiple %34, 8 : i32
      %36 = arith.index_cast %35 : i32 to index
      %c0_24 = arith.constant 0 : index
      %37 = vector.load %arg12[%36, %c0_24] : memref<64x1024xf32, #tpu.memory_space<vmem>>, vector<8x1024xf32>
      %38 = arith.truncf %arg14 : vector<8x256xf32> to vector<8x256xbf16>
      %c0_25 = arith.constant 0 : index
      %c0_26 = arith.constant 0 : index
      %39 = vector.load %arg3[%c0_25, %c0_26] : memref<256x1024xbf16, #tpu.memory_space<vmem>>, vector<256x1024xbf16>
      %cst_27 = arith.constant dense<0.000000e+00> : vector<8x1024xf32>
      %40 = tpu.matmul %38, %39, %cst_27 {dimension_numbers = #tpu.dot_dimension_numbers<[1], [0], [0], [1], [0, 0, 1, 1], [], []>} : vector<8x256xbf16>, vector<256x1024xbf16>, vector<8x1024xf32> -> vector<8x1024xf32>
      %41 = arith.addf %37, %40 : vector<8x1024xf32>
      %42 = vector.extract_strided_slice %41 {offsets = [0, 0], sizes = [8, 768], strides = [1, 1]} : vector<8x1024xf32> to vector<8x768xf32>
      %43 = arith.negf %42 : vector<8x768xf32>
      %44 = math.exp %43 : vector<8x768xf32>
      %cst_28 = arith.constant 1.000000e+00 : f32
      %45 = vector.broadcast %cst_28 : f32 to vector<8x768xf32>
      %46 = arith.addf %45, %44 : vector<8x768xf32>
      %47 = arith.divf %45, %46 : vector<8x768xf32>
      %48 = vector.extract_strided_slice %47 {offsets = [0, 0], sizes = [8, 256], strides = [1, 1]} : vector<8x768xf32> to vector<8x256xf32>
      %49 = vector.extract_strided_slice %47 {offsets = [0, 256], sizes = [8, 256], strides = [1, 1]} : vector<8x768xf32> to vector<8x256xf32>
      %50 = vector.extract_strided_slice %47 {offsets = [0, 512], sizes = [8, 256], strides = [1, 1]} : vector<8x768xf32> to vector<8x256xf32>
      %51 = vector.extract_strided_slice %41 {offsets = [0, 768], sizes = [8, 256], strides = [1, 1]} : vector<8x1024xf32> to vector<8x256xf32>
      %52 = math.tanh %51 : vector<8x256xf32>
      %53 = arith.mulf %49, %arg15 : vector<8x256xf32>
      %54 = arith.mulf %48, %52 : vector<8x256xf32>
      %55 = arith.addf %53, %54 : vector<8x256xf32>
      %56 = math.tanh %55 : vector<8x256xf32>
      %57 = arith.mulf %50, %56 : vector<8x256xf32>
      %58 = tpu.concatenate %57, %arg16 in 1 : vector<8x256xf32>, vector<8x256xf32> -> vector<8x512xf32>
      %59 = arith.truncf %58 : vector<8x512xf32> to vector<8x512xbf16>
      %c0_29 = arith.constant 0 : index
      %c0_30 = arith.constant 0 : index
      %60 = vector.load %arg5[%c0_29, %c0_30] : memref<512x1024xbf16, #tpu.memory_space<vmem>>, vector<512x1024xbf16>
      %cst_31 = arith.constant dense<0.000000e+00> : vector<8x1024xf32>
      %61 = tpu.matmul %59, %60, %cst_31 {dimension_numbers = #tpu.dot_dimension_numbers<[1], [0], [0], [1], [0, 0, 1, 1], [], []>} : vector<8x512xbf16>, vector<512x1024xbf16>, vector<8x1024xf32> -> vector<8x1024xf32>
      %62 = arith.addf %61, %10 : vector<8x1024xf32>
      %63 = vector.extract_strided_slice %62 {offsets = [0, 0], sizes = [8, 768], strides = [1, 1]} : vector<8x1024xf32> to vector<8x768xf32>
      %64 = arith.negf %63 : vector<8x768xf32>
      %65 = math.exp %64 : vector<8x768xf32>
      %cst_32 = arith.constant 1.000000e+00 : f32
      %66 = vector.broadcast %cst_32 : f32 to vector<8x768xf32>
      %67 = arith.addf %66, %65 : vector<8x768xf32>
      %68 = arith.divf %66, %67 : vector<8x768xf32>
      %69 = vector.extract_strided_slice %68 {offsets = [0, 0], sizes = [8, 256], strides = [1, 1]} : vector<8x768xf32> to vector<8x256xf32>
      %70 = vector.extract_strided_slice %68 {offsets = [0, 256], sizes = [8, 256], strides = [1, 1]} : vector<8x768xf32> to vector<8x256xf32>
      %71 = vector.extract_strided_slice %68 {offsets = [0, 512], sizes = [8, 256], strides = [1, 1]} : vector<8x768xf32> to vector<8x256xf32>
      %72 = vector.extract_strided_slice %62 {offsets = [0, 768], sizes = [8, 256], strides = [1, 1]} : vector<8x1024xf32> to vector<8x256xf32>
      %73 = math.tanh %72 : vector<8x256xf32>
      %74 = arith.mulf %70, %arg17 : vector<8x256xf32>
      %75 = arith.mulf %69, %73 : vector<8x256xf32>
      %76 = arith.addf %74, %75 : vector<8x256xf32>
      %77 = math.tanh %76 : vector<8x256xf32>
      %78 = arith.mulf %71, %77 : vector<8x256xf32>
      %79 = tpu.concatenate %78, %arg18 in 1 : vector<8x256xf32>, vector<8x256xf32> -> vector<8x512xf32>
      %80 = arith.truncf %79 : vector<8x512xf32> to vector<8x512xbf16>
      %c0_33 = arith.constant 0 : index
      %c0_34 = arith.constant 0 : index
      %81 = vector.load %arg7[%c0_33, %c0_34] : memref<512x1024xbf16, #tpu.memory_space<vmem>>, vector<512x1024xbf16>
      %cst_35 = arith.constant dense<0.000000e+00> : vector<8x1024xf32>
      %82 = tpu.matmul %80, %81, %cst_35 {dimension_numbers = #tpu.dot_dimension_numbers<[1], [0], [0], [1], [0, 0, 1, 1], [], []>} : vector<8x512xbf16>, vector<512x1024xbf16>, vector<8x1024xf32> -> vector<8x1024xf32>
      %83 = arith.addf %82, %13 : vector<8x1024xf32>
      %84 = vector.extract_strided_slice %83 {offsets = [0, 0], sizes = [8, 768], strides = [1, 1]} : vector<8x1024xf32> to vector<8x768xf32>
      %85 = arith.negf %84 : vector<8x768xf32>
      %86 = math.exp %85 : vector<8x768xf32>
      %cst_36 = arith.constant 1.000000e+00 : f32
      %87 = vector.broadcast %cst_36 : f32 to vector<8x768xf32>
      %88 = arith.addf %87, %86 : vector<8x768xf32>
      %89 = arith.divf %87, %88 : vector<8x768xf32>
      %90 = vector.extract_strided_slice %89 {offsets = [0, 0], sizes = [8, 256], strides = [1, 1]} : vector<8x768xf32> to vector<8x256xf32>
      %91 = vector.extract_strided_slice %89 {offsets = [0, 256], sizes = [8, 256], strides = [1, 1]} : vector<8x768xf32> to vector<8x256xf32>
      %92 = vector.extract_strided_slice %89 {offsets = [0, 512], sizes = [8, 256], strides = [1, 1]} : vector<8x768xf32> to vector<8x256xf32>
      %93 = vector.extract_strided_slice %83 {offsets = [0, 768], sizes = [8, 256], strides = [1, 1]} : vector<8x1024xf32> to vector<8x256xf32>
      %94 = math.tanh %93 : vector<8x256xf32>
      %95 = arith.mulf %91, %arg19 : vector<8x256xf32>
      %96 = arith.mulf %90, %94 : vector<8x256xf32>
      %97 = arith.addf %95, %96 : vector<8x256xf32>
      %98 = math.tanh %97 : vector<8x256xf32>
      %99 = arith.mulf %92, %98 : vector<8x256xf32>
      scf.yield %57, %55, %78, %76, %99, %97 : vector<8x256xf32>, vector<8x256xf32>, vector<8x256xf32>, vector<8x256xf32>, vector<8x256xf32>, vector<8x256xf32>
    }
    %c8_i32_12 = arith.constant 8 : i32
    %17 = arith.truncf %16#4 : vector<8x256xf32> to vector<8x256xbf16>
    %c0_13 = arith.constant 0 : index
    %c0_14 = arith.constant 0 : index
    %18 = vector.load %arg9[%c0_13, %c0_14] : memref<256x256xbf16, #tpu.memory_space<vmem>>, vector<256x256xbf16>
    %cst_15 = arith.constant dense<0.000000e+00> : vector<8x256xf32>
    %19 = tpu.matmul %17, %18, %cst_15 {dimension_numbers = #tpu.dot_dimension_numbers<[1], [0], [0], [1], [0, 0, 1, 1], [], []>} : vector<8x256xbf16>, vector<256x256xbf16>, vector<8x256xf32> -> vector<8x256xf32>
    %c0_16 = arith.constant 0 : index
    %c0_17 = arith.constant 0 : index
    %20 = vector.load %arg10[%c0_16, %c0_17] : memref<1x256xf32, #tpu.memory_space<vmem>>, vector<1x256xf32>
    %21 = vector.broadcast %20 : vector<1x256xf32> to vector<8x256xf32>
    %22 = arith.addf %19, %21 : vector<8x256xf32>
    %cst_18 = arith.constant 0.000000e+00 : f32
    %23 = vector.broadcast %cst_18 : f32 to vector<8x256xf32>
    %24 = arith.maximumf %22, %23 : vector<8x256xf32>
    %25 = arith.mulf %24, %24 : vector<8x256xf32>
    %cst_19 = arith.constant dense<0.000000e+00> : vector<8xf32>
    %26 = vector.multi_reduction <add>, %25, %cst_19 [1] : vector<8x256xf32> to vector<8xf32>
    %27 = vector.shape_cast %26 : vector<8xf32> to vector<8x1xf32>
    %28 = math.sqrt %27 : vector<8x1xf32>
    %cst_20 = arith.constant 9.99999974E-6 : f32
    %29 = vector.broadcast %cst_20 : f32 to vector<8x1xf32>
    %30 = arith.addf %28, %29 : vector<8x1xf32>
    %31 = vector.broadcast %30 : vector<8x1xf32> to vector<8x256xf32>
    %32 = arith.divf %24, %31 : vector<8x256xf32>
    %c0_21 = arith.constant 0 : index
    %c0_22 = arith.constant 0 : index
    %33 = vector.load %arg11[%c0_21, %c0_22] : memref<8x256xf32, #tpu.memory_space<vmem>>, vector<8x256xf32>
    tpu.vector_store %arg11[%c0_21, %c0_22], %32 {strides = array<i32>} : memref<8x256xf32, #tpu.memory_space<vmem>>, vector<8x256xf32>,
    return
  }
  func.func @transform_0(%arg0: i32) -> (i32, i32) {
    %c0_i32 = arith.constant 0 : i32
    %c0_i32_0 = arith.constant 0 : i32
    %c0_i32_1 = arith.constant 0 : i32
    return %c0_i32, %c0_i32_0 : i32, i32
  }
  func.func @transform_1(%arg0: i32) -> (i32, i32) {
    %c0_i32 = arith.constant 0 : i32
    %c0_i32_0 = arith.constant 0 : i32
    %c0_i32_1 = arith.constant 0 : i32
    return %c0_i32, %c0_i32_0 : i32, i32
  }
  func.func @transform_2(%arg0: i32) -> (i32, i32) {
    %c0_i32 = arith.constant 0 : i32
    %c0_i32_0 = arith.constant 0 : i32
    %c0_i32_1 = arith.constant 0 : i32
    return %c0_i32, %c0_i32_0 : i32, i32
  }
  func.func @transform_3(%arg0: i32) -> (i32, i32) {
    %c0_i32 = arith.constant 0 : i32
    %c0_i32_0 = arith.constant 0 : i32
    %c0_i32_1 = arith.constant 0 : i32
    return %c0_i32, %c0_i32_0 : i32, i32
  }
  func.func @transform_4(%arg0: i32) -> (i32, i32) {
    %c0_i32 = arith.constant 0 : i32
    %c0_i32_0 = arith.constant 0 : i32
    %c0_i32_1 = arith.constant 0 : i32
    return %c0_i32, %c0_i32_0 : i32, i32
  }
  func.func @transform_5(%arg0: i32) -> (i32, i32) {
    %c0_i32 = arith.constant 0 : i32
    %c0_i32_0 = arith.constant 0 : i32
    %c0_i32_1 = arith.constant 0 : i32
    return %c0_i32, %c0_i32_0 : i32, i32
  }
  func.func @transform_6(%arg0: i32) -> (i32, i32) {
    %c0_i32 = arith.constant 0 : i32
    %c0_i32_0 = arith.constant 0 : i32
    %c0_i32_1 = arith.constant 0 : i32
    return %c0_i32, %c0_i32_0 : i32, i32
  }
  func.func @transform_7(%arg0: i32) -> (i32, i32) {
    %c0_i32 = arith.constant 0 : i32
    %c0_i32_0 = arith.constant 0 : i32
    %c0_i32_1 = arith.constant 0 : i32
    return %c0_i32, %c0_i32_0 : i32, i32
  }
  func.func @transform_8(%arg0: i32) -> (i32, i32) {
    %c0_i32 = arith.constant 0 : i32
    %c0_i32_0 = arith.constant 0 : i32
    %c0_i32_1 = arith.constant 0 : i32
    return %c0_i32, %c0_i32_0 : i32, i32
  }
  func.func @transform_9(%arg0: i32) -> (i32, i32) {
    %c0_i32 = arith.constant 0 : i32
    %c0_i32_0 = arith.constant 0 : i32
    %c0_i32_1 = arith.constant 0 : i32
    return %c0_i32, %c0_i32_0 : i32, i32
  }
  func.func @transform_10(%arg0: i32) -> (i32, i32) {
    %c0_i32 = arith.constant 0 : i32
    %c0_i32_0 = arith.constant 0 : i32
    %c0_i32_1 = arith.constant 0 : i32
    return %c0_i32, %c0_i32_0 : i32, i32
  }
}

</mosaic_0001>

<bundles_post_ra>
// kernel: speaker_encoder_forward.1
= control target key start
LH: loop header
LB: loop body
LE: loop exit
PB: predicated region body
PF: predicated region fallthrough
CT: control target
= control target key end

     0   :  { %15 = vsyncpa [#allocation4], 0  ;;  %s8093_s0 = inlined_call_operand.vmem [shape: f32[64,40], index: 0, kind: input, shape index: {}]   ;;  %s8094_s1 = inlined_call_operand.vmem [shape: bf16[40,1024], index: 1, kind: input, shape index: {}]   ;;  %s8095_s2 = inlined_call_operand.hbm [shape: bf16[256,1024], index: 2, kind: input, shape index: {}]   ;;  %s8096_s3 = inlined_call_operand.hbm [shape: f32[1,1024], index: 3, kind: input, shape index: {}]   ;;  %s8097_s4 = inlined_call_operand.hbm [shape: bf16[512,1024], index: 4, kind: input, shape index: {}]   ;;  %s8098_s5 = inlined_call_operand.hbm [shape: f32[1,1024], index: 5, kind: input, shape index: {}]   ;;  %s8099_s6 = inlined_call_operand.hbm [shape: bf16[512,1024], index: 6, kind: input, shape index: {}]   ;;  %s8100_s7 = inlined_call_operand.hbm [shape: f32[1,1024], index: 7, kind: input, shape index: {}]   ;;  %s8101_s8 = inlined_call_operand.hbm [shape: bf16[256,256], index: 8, kind: input, shape index: {}]   ;;  %s8102_s9 = inlined_call_operand.vmem [shape: f32[1,256], index: 9, kind: input, shape index: {}]   ;;  %s8103_s10 = inlined_call_operand.hbm [shape: f32[8,256], index: 10, kind: output, shape index: {}]  }
   0x1   :  { %16 = vsyncpa [#allocation7], 0 }
   0x2   :  { %17 = vsyncpa [#allocation10], 0 }
   0x3   :  { %18 = vsyncpa [#allocation13], 0 }
   0x4   :  { %19 = vsyncpa [#allocation5], 0  ;;  %s7309_s13 = smov [#allocation6]   ;;  %s7310_s15 = smov [#allocation9]  }
   0x5   :  { %s42_s14 = sshll.u32 %s7309_s13, 4  ;;  %s64_s16 = sshll.u32 %s7310_s15, 4  ;;  %s43_s14 = int_to_ptr.vmem [resolvable:$true] %s42_s14  ;;  %s65_s16 = int_to_ptr.vmem [resolvable:$true] %s64_s16 }
   0x6   :  { %s7019_s19 = scalar_lea.hbm %s8096_s3, 128 }
   0x7   :  { %p7020_p0 = scmp.ne.s32.totalorder %s8096_s3, %s7019_s19  ;;  %p7023_p1 = scmp.lt.u32.totalorder %s7019_s19, %s8096_s3 }
   0x9   :  { %p7025_p2 = pnand %p7023_p1, %p7020_p0 }
   0xb   :  { %7028 = shalt.err (!%p7025_p2)
}
   0xc   :  { %s7029_s24 = scalar_lea.vmem %s43_s14, 128  ;;  %p7034_p4 = scmp.lt.s32.totalorder %s43_s14, %s43_s14 }
   0xd   :  { %p7030_p3 = scmp.ne.s32.totalorder %s43_s14, %s7029_s24  ;;  %p7035_p5 = scmp.lt.s32.totalorder %s7029_s24, %s7029_s24 }
   0xf   :  { %p7036_p6 = por %p7035_p5, %p7034_p4 }
  0x11   :  { %p7037_p7 = pnand %p7036_p6, %p7030_p3 }
  0x13   :  { %7040 = shalt.err (!%p7037_p7)
}
  0x14   :  { %45 = dma.hbm_to_vmem [thread:$0]  %s8096_s3, 128, %s43_s14, [#allocation7]  }
  0x15   :  { %s7041_s29 = scalar_lea.hbm %s8098_s5, 128 }
  0x16   :  { %p7042_p8 = scmp.ne.s32.totalorder %s8098_s5, %s7041_s29  ;;  %p7045_p9 = scmp.lt.u32.totalorder %s7041_s29, %s8098_s5 }
  0x18   :  { %p7047_p10 = pnand %p7045_p9, %p7042_p8 }
  0x1a   :  { %7050 = shalt.err (!%p7047_p10)
}
  0x1b   :  { %s7051_s15 = scalar_lea.vmem %s65_s16, 128  ;;  %p7056_p12 = scmp.lt.s32.totalorder %s65_s16, %s65_s16 }
  0x1c   :  { %p7052_p11 = scmp.ne.s32.totalorder %s65_s16, %s7051_s15  ;;  %p7057_p13 = scmp.lt.s32.totalorder %s7051_s15, %s7051_s15 }
  0x1e   :  { %p7058_p0 = por %p7057_p13, %p7056_p12 }
  0x20   :  { %p7059_p1 = pnand %p7058_p0, %p7052_p11 }
  0x22   :  { %7062 = shalt.err (!%p7059_p1)
}
  0x23   :  { %67 = dma.hbm_to_vmem [thread:$0]  %s8098_s5, 128, %s65_s16, [#allocation10]  }
  0x24   :  { %s7311_s17 = smov [#allocation12]   ;;  %s7312_s19 = smov [#allocation3]  }
  0x25   :  { %s86_s18 = sshll.u32 %s7311_s17, 4  ;;  %s29_s20 = sshll.u32 %s7312_s19, 4  ;;  %s87_s18 = int_to_ptr.vmem [resolvable:$true] %s86_s18  ;;  %s7401_s20 = int_to_ptr.vmem [resolvable:$true] %s29_s20 }
  0x26   :  { %s7063_s23 = scalar_lea.hbm %s8100_s7, 128 }
  0x27   :  { %p7064_p2 = scmp.ne.s32.totalorder %s8100_s7, %s7063_s23  ;;  %p7067_p3 = scmp.lt.u32.totalorder %s7063_s23, %s8100_s7 }
  0x29   :  { %p7069_p4 = pnand %p7067_p3, %p7064_p2 }
  0x2b   :  { %7072 = shalt.err (!%p7069_p4)
}
  0x2c   :  { %s7073_s5 = scalar_lea.vmem %s87_s18, 128  ;;  %p7078_p6 = scmp.lt.s32.totalorder %s87_s18, %s87_s18 }
  0x2d   :  { %p7074_p5 = scmp.ne.s32.totalorder %s87_s18, %s7073_s5  ;;  %p7079_p7 = scmp.lt.s32.totalorder %s7073_s5, %s7073_s5 }
  0x2f   :  { %p7080_p8 = por %p7079_p7, %p7078_p6 }
  0x31   :  { %p7081_p9 = pnand %p7080_p8, %p7074_p5 }
  0x33   :  { %7084 = shalt.err (!%p7081_p9)
}
  0x34   :  { %89 = dma.hbm_to_vmem [thread:$0]  %s8100_s7, 128, %s87_s18, [#allocation13]  }
  0x35   :  { %s7085_s11 = scalar_lea.hbm %s8095_s2, 16384 }
  0x36   :  { %p7086_p10 = scmp.ne.s32.totalorder %s8095_s2, %s7085_s11  ;;  %p7089_p11 = scmp.lt.u32.totalorder %s7085_s11, %s8095_s2 }
  0x38   :  { %p7091_p12 = pnand %p7089_p11, %p7086_p10 }
  0x3a   :  { %7094 = shalt.err (!%p7091_p12)
}
  0x3b   :  { %s7095_s14 = scalar_lea.vmem %s7401_s20, 16384  ;;  %p7100_p0 = scmp.lt.s32.totalorder %s7401_s20, %s7401_s20 }
  0x3c   :  { %p7096_p13 = scmp.ne.s32.totalorder %s7401_s20, %s7095_s14  ;;  %p7101_p1 = scmp.lt.s32.totalorder %s7095_s14, %s7095_s14 }
  0x3e   :  { %p7102_p2 = por %p7101_p1, %p7100_p0 }
  0x40   :  { %p7103_p3 = pnand %p7102_p2, %p7096_p13 }
  0x42   :  { %7106 = shalt.err (!%p7103_p3)
}
  0x43   :  { %s7313_s7 = smov 512   ;;  %s7314_s17 = smov 32  }
  0x44   :  { %35 = dma.hbm_to_vmem [thread:$0]  %s8095_s2, 16384, %s7401_s20, [#allocation4], %s7313_s7, %s7313_s7, %s7314_s17  }
  0x45   :  { %s7315_s21 = smov [#allocation8]   ;;  %s7316_s23 = smov [#allocation11]  }
  0x46   :  { %s51_s22 = sshll.u32 %s7315_s21, 4  ;;  %s73_s24 = sshll.u32 %s7316_s23, 4  ;;  %s52_s22 = int_to_ptr.vmem [resolvable:$true] %s51_s22  ;;  %s7435_s24 = int_to_ptr.vmem [resolvable:$true] %s73_s24 }
  0x47   :  { %s7107_s27 = scalar_lea.hbm %s8097_s4, 32768 }
  0x48   :  { %p7108_p4 = scmp.ne.s32.totalorder %s8097_s4, %s7107_s27  ;;  %p7111_p5 = scmp.lt.u32.totalorder %s7107_s27, %s8097_s4 }
  0x4a   :  { %p7113_p6 = pnand %p7111_p5, %p7108_p4 }
  0x4c   :  { %7116 = shalt.err (!%p7113_p6)
}
  0x4d   :  { %s7117_s2 = scalar_lea.vmem %s52_s22, 32768  ;;  %p7122_p8 = scmp.lt.s32.totalorder %s52_s22, %s52_s22 }
  0x4e   :  { %p7118_p7 = scmp.ne.s32.totalorder %s52_s22, %s7117_s2  ;;  %p7123_p9 = scmp.lt.s32.totalorder %s7117_s2, %s7117_s2 }
  0x50   :  { %p7124_p10 = por %p7123_p9, %p7122_p8 }
  0x52   :  { %p7125_p11 = pnand %p7124_p10, %p7118_p7 }
  0x54   :  { %7128 = shalt.err (!%p7125_p11)
}
  0x55   :  { %57 = dma.hbm_to_vmem [thread:$0]  %s8097_s4, 32768, %s52_s22, [#allocation7], %s7313_s7, %s7313_s7, %s7314_s17  }
  0x56   :  { %s7129_s13 = scalar_lea.hbm %s8099_s6, 32768 }
  0x57   :  { %p7130_p12 = scmp.ne.s32.totalorder %s8099_s6, %s7129_s13  ;;  %p7133_p13 = scmp.lt.u32.totalorder %s7129_s13, %s8099_s6 }
  0x59   :  { %p7135_p0 = pnand %p7133_p13, %p7130_p12 }
  0x5b   :  { %7138 = shalt.err (!%p7135_p0)
}
  0x5c   :  { %s7139_s19 = scalar_lea.vmem %s7435_s24, 32768  ;;  %p7144_p2 = scmp.lt.s32.totalorder %s7435_s24, %s7435_s24 }
  0x5d   :  { %p7140_p1 = scmp.ne.s32.totalorder %s7435_s24, %s7139_s19  ;;  %p7145_p3 = scmp.lt.s32.totalorder %s7139_s19, %s7139_s19 }
  0x5f   :  { %p7146_p4 = por %p7145_p3, %p7144_p2 }
  0x61   :  { %p7147_p5 = pnand %p7146_p4, %p7140_p1 }
  0x63   :  { %7150 = shalt.err (!%p7147_p5)
}
  0x64   :  { %79 = dma.hbm_to_vmem [thread:$0]  %s8099_s6, 32768, %s7435_s24, [#allocation10], %s7313_s7, %s7313_s7, %s7314_s17  }
  0x65   :  { %s7317_s22 = smov [#allocation14]   ;;  %s7151_s27 = scalar_lea.hbm %s8101_s8, 4096 }
  0x66   :  { %s95_s23 = sshll.u32 %s7317_s22, 4  ;;  %p7152_p6 = scmp.ne.s32.totalorder %s8101_s8, %s7151_s27  ;;  %s96_s23 = int_to_ptr.vmem [resolvable:$true] %s95_s23 }
  0x67   :  { %p7155_p7 = scmp.lt.u32.totalorder %s7151_s27, %s8101_s8 }
  0x69   :  { %p7157_p8 = pnand %p7155_p7, %p7152_p6 }
  0x6b   :  { %7160 = shalt.err (!%p7157_p8)
}
  0x6c   :  { %s7161_s2 = scalar_lea.vmem %s96_s23, 4096  ;;  %p7166_p10 = scmp.lt.s32.totalorder %s96_s23, %s96_s23 }
  0x6d   :  { %p7162_p9 = scmp.ne.s32.totalorder %s96_s23, %s7161_s2  ;;  %p7167_p11 = scmp.lt.s32.totalorder %s7161_s2, %s7161_s2 }
  0x6f   :  { %p7168_p12 = por %p7167_p11, %p7166_p10 }
  0x71   :  { %p7169_p13 = pnand %p7168_p12, %p7162_p9 }
  0x73   :  { %7172 = shalt.err (!%p7169_p13)
}
  0x74   :  { %s7318_s6 = smov 128   ;;  %s7319_s7 = smov 8  }
  0x75   :  { %101 = dma.hbm_to_vmem [thread:$0]  %s8101_s8, 4096, %s96_s23, [#allocation13], %s7318_s6, %s7318_s6, %s7319_s7  }
  0x76   :  { %7247 = dma.done.wait [#allocation4], 16384  }
  0x77   :  { %7248 = vsyncadd [#allocation4], 4294950912 }
  0x78   :  { %7249 = dma.done.wait [#allocation7], 32896  }
  0x79   :  { %7250 = vsyncadd [#allocation7], 4294934400 }
  0x7a   :  { %7251 = dma.done.wait [#allocation10], 32896  }
  0x7b   :  { %7252 = vsyncadd [#allocation10], 4294934400 }
  0x7c   :  { %7253 = dma.done.wait [#allocation13], 4224  }
  0x7d   :  { %7254 = vsyncadd [#allocation13], 4294963072  ;;  %v7320_v0 = vmov 0   ;;  %v138_v1 = vld [vmem:[%s8094_s1] sm:$0xff]  ;;  %v139_v3 = vld [vmem:[%s8094_s1 + $0x8] sm:$0xff]  ;;  %vm313_vm0 = vcmask 1043456   ;;  %v160_v61 = vlaneseq }
  0x7e   :  { %370 = vmatprep.mubr.bf16.mxu0 %v7320_v0  ;;  %443 = vmatprep.mubr.bf16.mxu1 %v7320_v0  ;;  %v142_v2 = vld [vmem:[%s8094_s1 + $0x20] sm:$0xff]  ;;  %v143_v5 = vld [vmem:[%s8094_s1 + $0x28] sm:$0xff]  ;;  %v140_v23 = vld [vmem:[%s8094_s1 + $0x10] sm:$0xff]  ;;  %vm300_vm1 = vcmask 326656  }
  0x7f   :  { %v5961_v4 = vcombine.high %v138_v1, %v142_v2  ;;  %v5960_v6 = vcombine.low %v138_v1, %v142_v2  ;;  %v146_v7 = vld [vmem:[%s8094_s1 + $0x40] sm:$0xff]  ;;  %v5963_v9 = vcombine.high %v139_v3, %v143_v5  ;;  %v5962_v10 = vcombine.low %v139_v3, %v143_v5  ;;  %v147_v12 = vld [vmem:[%s8094_s1 + $0x48] sm:$0xff]  ;;  %v144_v24 = vld [vmem:[%s8094_s1 + $0x30] sm:$0xff] }
  0x80   :  { %v150_v8 = vld [vmem:[%s8094_s1 + $0x60] sm:$0xff]  ;;  %v151_v13 = vld [vmem:[%s8094_s1 + $0x68] sm:$0xff]  ;;  %v141_v25 = vld [vmem:[%s8094_s1 + $0x18] sm:$0xff]  ;;  %v5965_v30 = vcombine.high %v140_v23, %v144_v24  ;;  %v5964_v36 = vcombine.low %v140_v23, %v144_v24  ;;  %v161_v62 = vshrl.u32 %v160_v61, 7 }
  0x81   :  { %v5969_v11 = vcombine.high %v146_v7, %v150_v8  ;;  %v154_v14 = vld [vmem:[%s8094_s1 + $0x80] sm:$0xff]  ;;  %338 = vmatprep.subr.bf16.mxu0 %v5961_v4  ;;  %v5971_v15 = vcombine.high %v147_v12, %v151_v13  ;;  %v155_v16 = vld [vmem:[%s8094_s1 + $0x88] sm:$0xff]  ;;  %411 = vmatprep.subr.bf16.mxu1 %v5963_v9  ;;  %v5968_v17 = vcombine.low %v146_v7, %v150_v8  ;;  %v145_v26 = vld [vmem:[%s8094_s1 + $0x38] sm:$0xff] }
  0x82   :  { %339 = vmatpush1.bf16.msra.mxu0 %v5960_v6  ;;  %412 = vmatpush1.bf16.msra.mxu1 %v5962_v10  ;;  %v5970_v18 = vcombine.low %v147_v12, %v151_v13  ;;  %v5977_v19 = vcombine.high %v154_v14, %v154_v14  ;;  %v5976_v20 = vcombine.low %v154_v14, %v154_v14  ;;  %v126_v27 = vld [vmem:[%s8093_s0] sm:$0xff]  ;;  %v127_v28 = vld [vmem:[%s8093_s0 + $0x8] sm:$0xff]  ;;  %v148_v34 = vld [vmem:[%s8094_s1 + $0x50] sm:$0xff]  ;;  %v7608_v63 = vsub.s32 0, %v161_v62 }
  0x83   :  { %340 = vmatprep.subr.bf16.mxu0 %v5969_v11  ;;  %413 = vmatprep.subr.bf16.mxu1 %v5971_v15  ;;  %v5979_v21 = vcombine.high %v155_v16, %v155_v16  ;;  %v5978_v22 = vcombine.low %v155_v16, %v155_v16  ;;  %v5967_v32 = vcombine.high %v141_v25, %v145_v26  ;;  %v152_v35 = vld [vmem:[%s8094_s1 + $0x70] sm:$0xff]  ;;  %v149_v37 = vld [vmem:[%s8094_s1 + $0x58] sm:$0xff]  ;;  %v130_v55 = vld [vmem:[%s8093_s0 + $0x20] sm:$0xff]  ;;  %v7610_v1 = vsub.s32 2, %v161_v62 }
  0x84   :  { %v315_v29 = vsel %vm313_vm0, %v5976_v20, 0  ;;  %v134_v33 = vpack.c.bf16 %v127_v28, %v126_v27  ;;  %v153_v38 = vld [vmem:[%s8094_s1 + $0x78] sm:$0xff]  ;;  %v5966_v39 = vcombine.low %v141_v25, %v145_v26  ;;  %v5973_v40 = vcombine.high %v148_v34, %v152_v35  ;;  %v156_v41 = vld [vmem:[%s8094_s1 + $0x90] sm:$0xff]  ;;  %v131_v56 = vld [vmem:[%s8093_s0 + $0x28] sm:$0xff] }
  0x85   :  { %v321_v31 = vsel %vm313_vm0, %v5978_v22, 0  ;;  %v5975_v42 = vcombine.high %v149_v37, %v153_v38  ;;  %v157_v43 = vld [vmem:[%s8094_s1 + $0x98] sm:$0xff]  ;;  %v128_v44 = vld [vmem:[%s8093_s0 + $0x10] sm:$0xff]  ;;  %v5972_v46 = vcombine.low %v148_v34, %v152_v35  ;;  %v5974_v47 = vcombine.low %v149_v37, %v153_v38  ;;  %v7612_v2 = vld [vmem:[#allocation9] sm:$0xff] }
  0x86   :  { %341 = vmatpush1.bf16.msra.mxu0 %v5968_v17  ;;  %414 = vmatpush1.bf16.msra.mxu1 %v5970_v18  ;;  %v129_v45 = vld [vmem:[%s8093_s0 + $0x18] sm:$0xff]  ;;  %v5981_v48 = vcombine.high %v156_v41, %v156_v41  ;;  %v5983_v49 = vcombine.high %v157_v43, %v157_v43  ;;  %v5980_v50 = vcombine.low %v156_v41, %v156_v41  ;;  %v132_v58 = vld [vmem:[%s8093_s0 + $0x30] sm:$0xff]  ;;  %v7616_v4 = vsub.s32 1, %v161_v62  ;;  %v7660_v25 = vld [vmem:[#allocation6] sm:$0xff] }
  0x87   :  { %5984 = vmatprep.subr.msk.bf16.mxu0 %vm313_vm0, %v5977_v19  ;;  %5989 = vmatprep.subr.msk.bf16.mxu1 %vm313_vm0, %v5979_v21  ;;  %v135_v51 = vpack.c.bf16 %v129_v45, %v128_v44  ;;  %v5982_v52 = vcombine.low %v157_v43, %v157_v43  ;;  %v136_v57 = vpack.c.bf16 %v131_v56, %v130_v55  ;;  %v133_v59 = vld [vmem:[%s8093_s0 + $0x38] sm:$0xff]  ;;  %v7614_v3 = vld [vmem:[#allocation12] sm:$0xff]  ;;  %v7618_v5 = vsub.s32 3, %v161_v62  ;;  %s7782_s0 = smov 0  }
  0x88   :  { %v327_v53 = vsel %vm313_vm0, %v5980_v50, 0  ;;  %v137_v60 = vpack.c.bf16 %v133_v59, %v132_v58  ;;  %v741_v6 = vrot.slane %v7614_v3, %v7608_v63  ;;  %v707_v7 = vrot.slane %v7612_v2, %v7610_v1 }
  0x89   :  { %v333_v54 = vsel %vm313_vm0, %v5982_v52, 0  ;;  %v749_v8 = vrot.slane %v7614_v3, %v7610_v1  ;;  %v703_v9 = vrot.slane %v7612_v2, %v7616_v4  ;;  %v745_v10 = vrot.slane %v7614_v3, %v7616_v4 }
  0x8a   :  { %343 = vmatpush1.bf16.msra.mxu0 %v315_v29  ;;  %416 = vmatpush1.bf16.msra.mxu1 %v321_v31  ;;  %v711_v11 = vrot.slane %v7612_v2, %v7618_v5  ;;  %v753_v12 = vrot.slane %v7614_v3, %v7618_v5  ;;  %v7636_v13 = vsub.s32 4, %v161_v62  ;;  %v7638_v14 = vsub.s32 6, %v161_v62 }
  0x8b   :  { %484 = vmatprep.subr.bf16.mxu0 %v5965_v30  ;;  %557 = vmatprep.subr.bf16.mxu1 %v5967_v32  ;;  %v7640_v15 = vsub.s32 5, %v161_v62  ;;  %v7646_v18 = vsub.s32 7, %v161_v62  ;;  %v7664_v26 = vrot.slane %v7660_v25, %v7608_v63  ;;  %v7668_v27 = vrot.slane %v7660_v25, %v7610_v1 }
  0x8c   :  { %v715_v16 = vrot.slane %v7612_v2, %v7636_v13  ;;  %v757_v17 = vrot.slane %v7614_v3, %v7636_v13  ;;  %v723_v19 = vrot.slane %v7612_v2, %v7638_v14  ;;  %v765_v20 = vrot.slane %v7614_v3, %v7638_v14 }
  0x8d   :  { %5985 = vmatmul.mubr.msk.bf16.vlgmr.msra.gmra.mrb[0].mxu0 %vm300_vm1, %v134_v33  ;;  %5990 = vmatmul.mubr.msk.bf16.vlgmr.msra.gmra.mrb[0].mxu1 %vm300_vm1, %v134_v33  ;;  %v719_v21 = vrot.slane %v7612_v2, %v7640_v15  ;;  %v761_v22 = vrot.slane %v7614_v3, %v7640_v15  ;;  %v727_v23 = vrot.slane %v7612_v2, %v7646_v18 }
  0x8e   :  { %485 = vmatpush1.bf16.msra.mxu0 %v5964_v36  ;;  %558 = vmatpush1.bf16.msra.mxu1 %v5966_v39  ;;  %v7672_v28 = vrot.slane %v7660_v25, %v7616_v4  ;;  %v7676_v29 = vrot.slane %v7660_v25, %v7618_v5 }
  0x8f   :  { %380 = vmatprep.mubr.bf16.mxu0 %v7320_v0  ;;  %453 = vmatprep.mubr.bf16.mxu1 %v7320_v0 }
  0x90   :  { %486 = vmatprep.subr.bf16.mxu0 %v5973_v40  ;;  %559 = vmatprep.subr.bf16.mxu1 %v5975_v42 }
  0x92   :  { %487 = vmatpush1.bf16.msra.mxu0 %v5972_v46  ;;  %560 = vmatpush1.bf16.msra.mxu1 %v5974_v47 }
  0x93   :  { %5994 = vmatprep.subr.msk.bf16.mxu0 %vm313_vm0, %v5981_v48  ;;  %5999 = vmatprep.subr.msk.bf16.mxu1 %vm313_vm0, %v5983_v49 }
  0x95   :  { %5986 = vmatmul.mubr.msk.bf16.gmra.mrb[4].mxu0 %vm300_vm1, %v135_v51  ;;  %5991 = vmatmul.mubr.msk.bf16.gmra.mrb[4].mxu1 %vm300_vm1, %v135_v51 }
  0x96   :  { %390 = vmatprep.mubr.bf16.mxu0 %v7320_v0  ;;  %463 = vmatprep.mubr.bf16.mxu1 %v7320_v0 }
  0x97   :  { %489 = vmatpush1.bf16.msra.mxu0 %v327_v53  ;;  %562 = vmatpush1.bf16.msra.mxu1 %v333_v54 }
  0x9d   :  { %5987 = vmatmul.mubr.msk.bf16.gmra.mrb[8].mxu0 %vm300_vm1, %v136_v57  ;;  %5992 = vmatmul.mubr.msk.bf16.gmra.mrb[8].mxu1 %vm300_vm1, %v136_v57 }
  0x9e   :  { %400 = vmatprep.mubr.bf16.mxu0 %v7320_v0  ;;  %473 = vmatprep.mubr.bf16.mxu1 %v7320_v0 }
  0xa5   :  { %5988 = vmatmul.mubr.msk.bf16.gmra.mrb[12].mxu0 %vm300_vm1, %v137_v60  ;;  %5993 = vmatmul.mubr.msk.bf16.gmra.mrb[12].mxu1 %vm300_vm1, %v137_v60 }
  0xa6   :  { %516 = vmatprep.mubr.bf16.mxu0 %v7320_v0  ;;  %589 = vmatprep.mubr.bf16.mxu1 %v7320_v0 }
  0xad   :  { %5995 = vmatmul.mubr.msk.bf16.vlgmr.msra.gmra.mrb[16].mxu0 %vm300_vm1, %v134_v33  ;;  %6000 = vmatmul.mubr.msk.bf16.vlgmr.msra.gmra.mrb[16].mxu1 %vm300_vm1, %v134_v33 }
  0xae   :  { %526 = vmatprep.mubr.bf16.mxu0 %v7320_v0  ;;  %599 = vmatprep.mubr.bf16.mxu1 %v7320_v0 }
  0xb5   :  { %5996 = vmatmul.mubr.msk.bf16.gmra.mrb[20].mxu0 %vm300_vm1, %v135_v51  ;;  %6001 = vmatmul.mubr.msk.bf16.gmra.mrb[20].mxu1 %vm300_vm1, %v135_v51 }
  0xb6   :  { %536 = vmatprep.mubr.bf16.mxu0 %v7320_v0  ;;  %609 = vmatprep.mubr.bf16.mxu1 %v7320_v0 }
  0xbd   :  { %5997 = vmatmul.mubr.msk.bf16.gmra.mrb[24].mxu0 %vm300_vm1, %v136_v57  ;;  %6002 = vmatmul.mubr.msk.bf16.gmra.mrb[24].mxu1 %vm300_vm1, %v136_v57 }
  0xbe   :  { %546 = vmatprep.mubr.bf16.mxu0 %v7320_v0  ;;  %619 = vmatprep.mubr.bf16.mxu1 %v7320_v0  ;;  %v699_v0 = vrot.slane %v7612_v2, %v7608_v63 }
  0xc5   :  { %5998 = vmatmul.mubr.msk.bf16.gmra.mrb[28].mxu0 %vm300_vm1, %v137_v60  ;;  %6003 = vmatmul.mubr.msk.bf16.gmra.mrb[28].mxu1 %vm300_vm1, %v137_v60 }
 0x160   :  { %v372_v30 = vpop.f32.mrb[0].mxu0  ;;  %v445_v32 = vpop.f32.mrb[0].mxu1 }
 0x161   :  { %v373_v31 = vadd.f32 %v372_v30, %v7664_v26  ;;  %v374_v33 = vpop.f32.mrb[1].mxu0  ;;  %v446_v34 = vadd.f32 %v445_v32, %v7668_v27  ;;  %v447_v36 = vpop.f32.mrb[1].mxu1 }
 0x162   :  { %v375_v35 = vadd.f32 %v374_v33, %v7672_v28  ;;  %v376_v37 = vpop.f32.mrb[2].mxu0  ;;  %v448_v38 = vadd.f32 %v447_v36, %v7676_v29  ;;  %v449_v40 = vpop.f32.mrb[2].mxu1 }
 0x163   :  { %630 = vst [vmem:[#allocation2] sm:$0xff] %v373_v31  ;;  %v377_v39 = vadd.f32 %v376_v37, %v7664_v26  ;;  %v378_v41 = vpop.f32.mrb[3].mxu0  ;;  %632 = vst [vmem:[#allocation2 + $0x10] sm:$0xff] %v446_v34  ;;  %v450_v42 = vadd.f32 %v449_v40, %v7668_v27  ;;  %v451_v44 = vpop.f32.mrb[3].mxu1 }
 0x164   :  { %631 = vst [vmem:[#allocation2 + $0x8] sm:$0xff] %v375_v35  ;;  %v379_v43 = vadd.f32 %v378_v41, %v7672_v28  ;;  %633 = vst [vmem:[#allocation2 + $0x18] sm:$0xff] %v448_v38  ;;  %v452_v45 = vadd.f32 %v451_v44, %v7676_v29 }
 0x165   :  { %638 = vst [vmem:[#allocation2 + $0x40] sm:$0xff] %v377_v39  ;;  %640 = vst [vmem:[#allocation2 + $0x50] sm:$0xff] %v450_v42 }
 0x166   :  { %639 = vst [vmem:[#allocation2 + $0x48] sm:$0xff] %v379_v43  ;;  %641 = vst [vmem:[#allocation2 + $0x58] sm:$0xff] %v452_v45 }
 0x168   :  { %v382_v46 = vpop.f32.mrb[4].mxu0  ;;  %v455_v48 = vpop.f32.mrb[4].mxu1 }
 0x169   :  { %v383_v47 = vadd.f32 %v382_v46, %v7664_v26  ;;  %v384_v49 = vpop.f32.mrb[5].mxu0  ;;  %v456_v50 = vadd.f32 %v455_v48, %v7668_v27  ;;  %v457_v52 = vpop.f32.mrb[5].mxu1 }
 0x16a   :  { %v385_v51 = vadd.f32 %v384_v49, %v7672_v28  ;;  %v386_v53 = vpop.f32.mrb[6].mxu0  ;;  %v458_v54 = vadd.f32 %v457_v52, %v7676_v29  ;;  %v459_v56 = vpop.f32.mrb[6].mxu1 }
 0x16b   :  { %646 = vst [vmem:[#allocation2 + $0x80] sm:$0xff] %v383_v47  ;;  %v387_v55 = vadd.f32 %v386_v53, %v7664_v26  ;;  %v388_v57 = vpop.f32.mrb[7].mxu0  ;;  %648 = vst [vmem:[#allocation2 + $0x90] sm:$0xff] %v456_v50  ;;  %v460_v58 = vadd.f32 %v459_v56, %v7668_v27  ;;  %v461_v60 = vpop.f32.mrb[7].mxu1 }
 0x16c   :  { %647 = vst [vmem:[#allocation2 + $0x88] sm:$0xff] %v385_v51  ;;  %v389_v59 = vadd.f32 %v388_v57, %v7672_v28  ;;  %649 = vst [vmem:[#allocation2 + $0x98] sm:$0xff] %v458_v54  ;;  %v462_v61 = vadd.f32 %v461_v60, %v7676_v29 }
 0x16d   :  { %654 = vst [vmem:[#allocation2 + $0xc0] sm:$0xff] %v387_v55  ;;  %656 = vst [vmem:[#allocation2 + $0xd0] sm:$0xff] %v460_v58 }
 0x16e   :  { %655 = vst [vmem:[#allocation2 + $0xc8] sm:$0xff] %v389_v59  ;;  %657 = vst [vmem:[#allocation2 + $0xd8] sm:$0xff] %v462_v61  ;;  %v7712_v61 = vrot.slane %v7660_v25, %v7636_v13 }
 0x170   :  { %v392_v62 = vpop.f32.mrb[8].mxu0  ;;  %v465_v31 = vpop.f32.mrb[8].mxu1 }
 0x171   :  { %v393_v30 = vadd.f32 %v392_v62, %v7664_v26  ;;  %v394_v32 = vpop.f32.mrb[9].mxu0  ;;  %v466_v33 = vadd.f32 %v465_v31, %v7668_v27  ;;  %v467_v35 = vpop.f32.mrb[9].mxu1 }
 0x172   :  { %v395_v34 = vadd.f32 %v394_v32, %v7672_v28  ;;  %v396_v36 = vpop.f32.mrb[10].mxu0  ;;  %v468_v37 = vadd.f32 %v467_v35, %v7676_v29  ;;  %v469_v39 = vpop.f32.mrb[10].mxu1 }
 0x173   :  { %662 = vst [vmem:[#allocation2 + $0x100] sm:$0xff] %v393_v30  ;;  %v397_v38 = vadd.f32 %v396_v36, %v7664_v26  ;;  %v398_v40 = vpop.f32.mrb[11].mxu0  ;;  %664 = vst [vmem:[#allocation2 + $0x110] sm:$0xff] %v466_v33  ;;  %v470_v41 = vadd.f32 %v469_v39, %v7668_v27  ;;  %v471_v43 = vpop.f32.mrb[11].mxu1 }
 0x174   :  { %663 = vst [vmem:[#allocation2 + $0x108] sm:$0xff] %v395_v34  ;;  %v399_v42 = vadd.f32 %v398_v40, %v7672_v28  ;;  %665 = vst [vmem:[#allocation2 + $0x118] sm:$0xff] %v468_v37  ;;  %v472_v44 = vadd.f32 %v471_v43, %v7676_v29 }
 0x175   :  { %670 = vst [vmem:[#allocation2 + $0x140] sm:$0xff] %v397_v38  ;;  %672 = vst [vmem:[#allocation2 + $0x150] sm:$0xff] %v470_v41 }
 0x176   :  { %671 = vst [vmem:[#allocation2 + $0x148] sm:$0xff] %v399_v42  ;;  %673 = vst [vmem:[#allocation2 + $0x158] sm:$0xff] %v472_v44 }
 0x178   :  { %v402_v45 = vpop.f32.mrb[12].mxu0  ;;  %v475_v47 = vpop.f32.mrb[12].mxu1 }
 0x179   :  { %v403_v46 = vadd.f32 %v402_v45, %v7664_v26  ;;  %v404_v48 = vpop.f32.mrb[13].mxu0  ;;  %v476_v49 = vadd.f32 %v475_v47, %v7668_v27  ;;  %v477_v51 = vpop.f32.mrb[13].mxu1 }
 0x17a   :  { %v405_v50 = vadd.f32 %v404_v48, %v7672_v28  ;;  %v406_v52 = vpop.f32.mrb[14].mxu0  ;;  %v478_v53 = vadd.f32 %v477_v51, %v7676_v29  ;;  %v479_v55 = vpop.f32.mrb[14].mxu1 }
 0x17b   :  { %678 = vst [vmem:[#allocation2 + $0x180] sm:$0xff] %v403_v46  ;;  %v407_v54 = vadd.f32 %v406_v52, %v7664_v26  ;;  %v408_v56 = vpop.f32.mrb[15].mxu0  ;;  %680 = vst [vmem:[#allocation2 + $0x190] sm:$0xff] %v476_v49  ;;  %v480_v57 = vadd.f32 %v479_v55, %v7668_v27  ;;  %v481_v59 = vpop.f32.mrb[15].mxu1  ;;  %v7716_v26 = vrot.slane %v7660_v25, %v7638_v14 }
 0x17c   :  { %679 = vst [vmem:[#allocation2 + $0x188] sm:$0xff] %v405_v50  ;;  %v409_v58 = vadd.f32 %v408_v56, %v7672_v28  ;;  %681 = vst [vmem:[#allocation2 + $0x198] sm:$0xff] %v478_v53  ;;  %v482_v60 = vadd.f32 %v481_v59, %v7676_v29  ;;  %v7720_v27 = vrot.slane %v7660_v25, %v7640_v15 }
 0x17d   :  { %686 = vst [vmem:[#allocation2 + $0x1c0] sm:$0xff] %v407_v54  ;;  %688 = vst [vmem:[#allocation2 + $0x1d0] sm:$0xff] %v480_v57  ;;  %v7724_v28 = vrot.slane %v7660_v25, %v7646_v18 }
 0x17e   :  { %687 = vst [vmem:[#allocation2 + $0x1c8] sm:$0xff] %v409_v58  ;;  %689 = vst [vmem:[#allocation2 + $0x1d8] sm:$0xff] %v482_v60 }
 0x180   :  { %v518_v29 = vpop.f32.mrb[16].mxu0  ;;  %v591_v30 = vpop.f32.mrb[16].mxu1 }
 0x181   :  { %v519_v62 = vadd.f32 %v518_v29, %v7712_v61  ;;  %v520_v31 = vpop.f32.mrb[17].mxu0  ;;  %v592_v32 = vadd.f32 %v591_v30, %v7716_v26  ;;  %v593_v34 = vpop.f32.mrb[17].mxu1 }
 0x182   :  { %v521_v33 = vadd.f32 %v520_v31, %v7720_v27  ;;  %v522_v35 = vpop.f32.mrb[18].mxu0  ;;  %v594_v36 = vadd.f32 %v593_v34, %v7724_v28  ;;  %v595_v38 = vpop.f32.mrb[18].mxu1 }
 0x183   :  { %634 = vst [vmem:[#allocation2 + $0x20] sm:$0xff] %v519_v62  ;;  %v523_v37 = vadd.f32 %v522_v35, %v7712_v61  ;;  %v524_v39 = vpop.f32.mrb[19].mxu0  ;;  %636 = vst [vmem:[#allocation2 + $0x30] sm:$0xff] %v592_v32  ;;  %v596_v25 = vadd.f32 %v595_v38, %v7716_v26  ;;  %v597_v41 = vpop.f32.mrb[19].mxu1 }
 0x184   :  { %635 = vst [vmem:[#allocation2 + $0x28] sm:$0xff] %v521_v33  ;;  %v525_v40 = vadd.f32 %v524_v39, %v7720_v27  ;;  %637 = vst [vmem:[#allocation2 + $0x38] sm:$0xff] %v594_v36  ;;  %v598_v42 = vadd.f32 %v597_v41, %v7724_v28 }
 0x185   :  { %642 = vst [vmem:[#allocation2 + $0x60] sm:$0xff] %v523_v37  ;;  %644 = vst [vmem:[#allocation2 + $0x70] sm:$0xff] %v596_v25 }
 0x186   :  { %643 = vst [vmem:[#allocation2 + $0x68] sm:$0xff] %v525_v40  ;;  %645 = vst [vmem:[#allocation2 + $0x78] sm:$0xff] %v598_v42 }
 0x188   :  { %v528_v43 = vpop.f32.mrb[20].mxu0  ;;  %v601_v45 = vpop.f32.mrb[20].mxu1 }
 0x189   :  { %v529_v44 = vadd.f32 %v528_v43, %v7712_v61  ;;  %v530_v46 = vpop.f32.mrb[21].mxu0  ;;  %v602_v47 = vadd.f32 %v601_v45, %v7716_v26  ;;  %v603_v49 = vpop.f32.mrb[21].mxu1 }
 0x18a   :  { %v531_v48 = vadd.f32 %v530_v46, %v7720_v27  ;;  %v532_v50 = vpop.f32.mrb[22].mxu0  ;;  %v604_v51 = vadd.f32 %v603_v49, %v7724_v28  ;;  %v605_v53 = vpop.f32.mrb[22].mxu1 }
 0x18b   :  { %650 = vst [vmem:[#allocation2 + $0xa0] sm:$0xff] %v529_v44  ;;  %v533_v52 = vadd.f32 %v532_v50, %v7712_v61  ;;  %v534_v54 = vpop.f32.mrb[23].mxu0  ;;  %652 = vst [vmem:[#allocation2 + $0xb0] sm:$0xff] %v602_v47  ;;  %v606_v55 = vadd.f32 %v605_v53, %v7716_v26  ;;  %v607_v57 = vpop.f32.mrb[23].mxu1 }
 0x18c   :  { %651 = vst [vmem:[#allocation2 + $0xa8] sm:$0xff] %v531_v48  ;;  %v535_v56 = vadd.f32 %v534_v54, %v7720_v27  ;;  %653 = vst [vmem:[#allocation2 + $0xb8] sm:$0xff] %v604_v51  ;;  %v608_v58 = vadd.f32 %v607_v57, %v7724_v28  ;;  %v7758_v57 = vmov 0.0  }
 0x18d   :  { %658 = vst [vmem:[#allocation2 + $0xe0] sm:$0xff] %v533_v52  ;;  %660 = vst [vmem:[#allocation2 + $0xf0] sm:$0xff] %v606_v55 }
 0x18e   :  { %659 = vst [vmem:[#allocation2 + $0xe8] sm:$0xff] %v535_v56  ;;  %661 = vst [vmem:[#allocation2 + $0xf8] sm:$0xff] %v608_v58  ;;  %v7760_v58 = vmov 0.0  }
 0x190   :  { %v538_v59 = vpop.f32.mrb[24].mxu0  ;;  %v611_v29 = vpop.f32.mrb[24].mxu1 }
 0x191   :  { %v539_v60 = vadd.f32 %v538_v59, %v7712_v61  ;;  %v540_v62 = vpop.f32.mrb[25].mxu0  ;;  %v612_v30 = vadd.f32 %v611_v29, %v7716_v26  ;;  %v613_v32 = vpop.f32.mrb[25].mxu1  ;;  %v7764_v59 = vmov 0.0   ;;  %v7772_v29 = vmov 0.0  }
 0x192   :  { %v541_v31 = vadd.f32 %v540_v62, %v7720_v27  ;;  %v542_v33 = vpop.f32.mrb[26].mxu0  ;;  %v614_v34 = vadd.f32 %v613_v32, %v7724_v28  ;;  %v615_v36 = vpop.f32.mrb[26].mxu1  ;;  %v7776_v62 = vmov 0.0  }
 0x193   :  { %666 = vst [vmem:[#allocation2 + $0x120] sm:$0xff] %v539_v60  ;;  %v543_v35 = vadd.f32 %v542_v33, %v7712_v61  ;;  %v544_v37 = vpop.f32.mrb[27].mxu0  ;;  %668 = vst [vmem:[#allocation2 + $0x130] sm:$0xff] %v612_v30  ;;  %v616_v38 = vadd.f32 %v615_v36, %v7716_v26  ;;  %v617_v25 = vpop.f32.mrb[27].mxu1  ;;  %v7766_v60 = vmov 0.0   ;;  %v7778_v30 = vmov 0.0  }
 0x194   :  { %667 = vst [vmem:[#allocation2 + $0x128] sm:$0xff] %v541_v31  ;;  %v545_v39 = vadd.f32 %v544_v37, %v7720_v27  ;;  %669 = vst [vmem:[#allocation2 + $0x138] sm:$0xff] %v614_v34  ;;  %v618_v40 = vadd.f32 %v617_v25, %v7724_v28  ;;  %v7780_v31 = vmov 0.0  }
 0x195   :  { %674 = vst [vmem:[#allocation2 + $0x160] sm:$0xff] %v543_v35  ;;  %676 = vst [vmem:[#allocation2 + $0x170] sm:$0xff] %v616_v38 }
 0x196   :  { %675 = vst [vmem:[#allocation2 + $0x168] sm:$0xff] %v545_v39  ;;  %677 = vst [vmem:[#allocation2 + $0x178] sm:$0xff] %v618_v40 }
 0x198   :  { %v548_v41 = vpop.f32.mrb[28].mxu0  ;;  %v621_v43 = vpop.f32.mrb[28].mxu1 }
 0x199   :  { %v549_v42 = vadd.f32 %v548_v41, %v7712_v61  ;;  %v550_v44 = vpop.f32.mrb[29].mxu0  ;;  %v622_v45 = vadd.f32 %v621_v43, %v7716_v26  ;;  %v623_v47 = vpop.f32.mrb[29].mxu1 }
 0x19a   :  { %v551_v46 = vadd.f32 %v550_v44, %v7720_v27  ;;  %v552_v48 = vpop.f32.mrb[30].mxu0  ;;  %v624_v49 = vadd.f32 %v623_v47, %v7724_v28  ;;  %v625_v51 = vpop.f32.mrb[30].mxu1 }
 0x19b   :  { %682 = vst [vmem:[#allocation2 + $0x1a0] sm:$0xff] %v549_v42  ;;  %v553_v50 = vadd.f32 %v552_v48, %v7712_v61  ;;  %v554_v52 = vpop.f32.mrb[31].mxu0  ;;  %684 = vst [vmem:[#allocation2 + $0x1b0] sm:$0xff] %v622_v45  ;;  %v626_v53 = vadd.f32 %v625_v51, %v7716_v26  ;;  %v627_v55 = vpop.f32.mrb[31].mxu1  ;;  %v7762_v61 = vmov 0.0   ;;  %v7768_v26 = vmov 0.0  }
 0x19c   :  { %683 = vst [vmem:[#allocation2 + $0x1a8] sm:$0xff] %v551_v46  ;;  %v555_v54 = vadd.f32 %v554_v52, %v7720_v27  ;;  %685 = vst [vmem:[#allocation2 + $0x1b8] sm:$0xff] %v624_v49  ;;  %v628_v56 = vadd.f32 %v627_v55, %v7724_v28  ;;  %v7770_v27 = vmov 0.0   ;;  %v7774_v28 = vmov 0.0  }
 0x19d   :  { %690 = vst [vmem:[#allocation2 + $0x1e0] sm:$0xff] %v553_v50  ;;  %692 = vst [vmem:[#allocation2 + $0x1f0] sm:$0xff] %v626_v53 }
 0x19e   :  { %691 = vst [vmem:[#allocation2 + $0x1e8] sm:$0xff] %v555_v54  ;;  %693 = vst [vmem:[#allocation2 + $0x1f8] sm:$0xff] %v628_v56 }
 0x19f LB: > { %v812_v32 = vld [vmem:[#allocation3] sm:$0xff]  ;;  %v813_v34 = vld [vmem:[#allocation3 + $0x8] sm:$0xff]  ;;  %v7821_v49 = vpack.c.bf16 %v7299_v30, %v7299_v30  ;;  %s6004_s30 = sshll.u32 %s7307_s0, 3  ;;  %s783_s0 = sadd.s32 1, %s7307_s0   ;;  %s7307_s0 = sphi %s7782_s0, %s783_s0   ;;  %v7303_v31 = vphi %v7780_v31, %v7860_v31   ;;  %v7299_v30 = vphi %v7778_v30, %v7862_v30   ;;  %v7295_v62 = vphi %v7776_v62, %v7853_v62   ;;  %v7291_v28 = vphi %v7774_v28, %v7857_v28   ;;  %v7287_v29 = vphi %v7772_v29, %v8110_v29   ;;  %v7283_v27 = vphi %v7770_v27, %v8109_v27   ;;  %v7279_v26 = vphi %v7768_v26, %v7955_v26   ;;  %v7275_v60 = vphi %v7766_v60, %v7959_v60   ;;  %v7271_v59 = vphi %v7764_v59, %v8108_v59   ;;  %v7267_v61 = vphi %v7762_v61, %v8107_v61   ;;  %v7263_v58 = vphi %v7760_v58, %v5626_v58   ;;  %v7259_v57 = vphi %v7758_v57, %v5627_v57  }
 0x1a0   : > { %v816_v33 = vld [vmem:[#allocation3 + $0x20] sm:$0xff]  ;;  %v817_v36 = vld [vmem:[#allocation3 + $0x28] sm:$0xff]  ;;  %s797_s11 = sshra.s32 %s6004_s30, 3  ;;  %p8033_p0 = scmp.ge.s32.totalorder %s783_s0, 8  }
 0x1a1   : > { %v6008_v35 = vcombine.high %v812_v32, %v816_v33  ;;  %v6007_v37 = vcombine.low %v812_v32, %v816_v33  ;;  %v820_v38 = vld [vmem:[#allocation3 + $0x40] sm:$0xff]  ;;  %v6010_v25 = vcombine.high %v813_v34, %v817_v36  ;;  %v6009_v40 = vcombine.low %v813_v34, %v817_v36  ;;  %v821_v42 = vld [vmem:[#allocation3 + $0x48] sm:$0xff]  ;;  %1612 = vmatprep.mubr.bf16.mxu0 %v7821_v49  ;;  %s6697_s12 = sshll.u32 %s797_s11, 6 }
 0x1a2   : > { %v824_v39 = vld [vmem:[#allocation3 + $0x60] sm:$0xff]  ;;  %v825_v43 = vld [vmem:[#allocation3 + $0x68] sm:$0xff]  ;;  %1653 = vmatprep.mubr.bf16.mxu1 %v7821_v49  ;;  %s801_s8 = scalar_lea.vmem [#allocation2], %s6697_s12 }
 0x1a3   : > { %v6016_v41 = vcombine.high %v820_v38, %v824_v39  ;;  %v828_v44 = vld [vmem:[#allocation3 + $0x80] sm:$0xff]  ;;  %1580 = vmatprep.subr.bf16.mxu0 %v6008_v35  ;;  %v6018_v45 = vcombine.high %v821_v42, %v825_v43  ;;  %v829_v47 = vld [vmem:[#allocation3 + $0x88] sm:$0xff]  ;;  %1621 = vmatprep.subr.bf16.mxu1 %v6010_v25  ;;  %v6015_v50 = vcombine.low %v820_v38, %v824_v39 }
 0x1a4   : > { %v832_v46 = vld [vmem:[#allocation3 + $0xa0] sm:$0xff]  ;;  %v833_v48 = vld [vmem:[#allocation3 + $0xa8] sm:$0xff]  ;;  %1581 = vmatpush1.bf16.msra.mxu0 %v6007_v37  ;;  %1622 = vmatpush1.bf16.msra.mxu1 %v6009_v40  ;;  %v6017_v51 = vcombine.low %v821_v42, %v825_v43 }
 0x1a5   : > { %1582 = vmatprep.subr.bf16.mxu0 %v6016_v41  ;;  %v6024_v52 = vcombine.high %v828_v44, %v832_v46  ;;  %1623 = vmatprep.subr.bf16.mxu1 %v6018_v45  ;;  %v6026_v53 = vcombine.high %v829_v47, %v833_v48  ;;  %v836_v54 = vld [vmem:[#allocation3 + $0xc0] sm:$0xff]  ;;  %v837_v56 = vld [vmem:[#allocation3 + $0xc8] sm:$0xff]  ;;  %v6023_v30 = vcombine.low %v828_v44, %v832_v46 }
 0x1a6   : > { %v840_v55 = vld [vmem:[#allocation3 + $0xe0] sm:$0xff]  ;;  %v841_v32 = vld [vmem:[#allocation3 + $0xe8] sm:$0xff]  ;;  %v6025_v33 = vcombine.low %v829_v47, %v833_v48 }
 0x1a7   : > { %v6032_v34 = vcombine.high %v836_v54, %v840_v55  ;;  %v6034_v35 = vcombine.high %v837_v56, %v841_v32  ;;  %v844_v36 = vld [vmem:[#allocation3 + $0x100] sm:$0xff]  ;;  %v845_v38 = vld [vmem:[#allocation3 + $0x108] sm:$0xff]  ;;  %v6031_v25 = vcombine.low %v836_v54, %v840_v55  ;;  %v6033_v40 = vcombine.low %v837_v56, %v841_v32 }
 0x1a8   : > { %1583 = vmatpush1.bf16.msra.mxu0 %v6015_v50  ;;  %1624 = vmatpush1.bf16.msra.mxu1 %v6017_v51  ;;  %v848_v37 = vld [vmem:[#allocation3 + $0x120] sm:$0xff]  ;;  %v849_v39 = vld [vmem:[#allocation3 + $0x128] sm:$0xff] }
 0x1a9   : > { %1584 = vmatprep.subr.bf16.mxu0 %v6024_v52  ;;  %1625 = vmatprep.subr.bf16.mxu1 %v6026_v53  ;;  %v6040_v41 = vcombine.high %v844_v36, %v848_v37  ;;  %v6042_v42 = vcombine.high %v845_v38, %v849_v39  ;;  %v852_v43 = vld [vmem:[#allocation3 + $0x140] sm:$0xff]  ;;  %v853_v45 = vld [vmem:[#allocation3 + $0x148] sm:$0xff]  ;;  %v6039_v47 = vcombine.low %v844_v36, %v848_v37 }
 0x1aa   : > { %v856_v44 = vld [vmem:[#allocation3 + $0x160] sm:$0xff]  ;;  %v857_v46 = vld [vmem:[#allocation3 + $0x168] sm:$0xff]  ;;  %v6041_v48 = vcombine.low %v845_v38, %v849_v39 }
 0x1ab   : > { %v6048_v50 = vcombine.high %v852_v43, %v856_v44  ;;  %v6050_v51 = vcombine.high %v853_v45, %v857_v46  ;;  %v860_v52 = vld [vmem:[#allocation3 + $0x180] sm:$0xff]  ;;  %v861_v54 = vld [vmem:[#allocation3 + $0x188] sm:$0xff]  ;;  %v6047_v56 = vcombine.low %v852_v43, %v856_v44  ;;  %v6049_v32 = vcombine.low %v853_v45, %v857_v46 }
 0x1ac   : > { %1585 = vmatpush1.bf16.msra.mxu0 %v6023_v30  ;;  %1626 = vmatpush1.bf16.msra.mxu1 %v6025_v33  ;;  %v864_v53 = vld [vmem:[#allocation3 + $0x1a0] sm:$0xff]  ;;  %v865_v55 = vld [vmem:[#allocation3 + $0x1a8] sm:$0xff] }
 0x1ad   : > { %1586 = vmatprep.subr.bf16.mxu0 %v6032_v34  ;;  %1627 = vmatprep.subr.bf16.mxu1 %v6034_v35  ;;  %v6056_v30 = vcombine.high %v860_v52, %v864_v53  ;;  %v6058_v33 = vcombine.high %v861_v54, %v865_v55  ;;  %v868_v34 = vld [vmem:[#allocation3 + $0x1c0] sm:$0xff]  ;;  %v869_v36 = vld [vmem:[#allocation3 + $0x1c8] sm:$0xff]  ;;  %v6055_v38 = vcombine.low %v860_v52, %v864_v53 }
 0x1ae   : > { %v872_v35 = vld [vmem:[#allocation3 + $0x1e0] sm:$0xff]  ;;  %v873_v37 = vld [vmem:[#allocation3 + $0x1e8] sm:$0xff]  ;;  %v6057_v39 = vcombine.low %v861_v54, %v865_v55 }
 0x1af   : > { %v877_v43 = vld [vmem:[#allocation3 + $0x208] sm:$0xff]  ;;  %v6063_v45 = vcombine.low %v868_v34, %v872_v35  ;;  %v6065_v46 = vcombine.low %v869_v36, %v873_v37  ;;  %v6987_v5 = vld [vmem:[#allocation14 + $0x60] ss:$8 sps:$4 sm:$0xff] (%p8033_p0)   ;;  %v7003_v15 = vld [vmem:[#allocation14 + $0xc4] ss:$8 sps:$4 sm:$0xff] (%p8033_p0)  }
 0x1b0   : > { %1587 = vmatpush1.bf16.msra.mxu0 %v6031_v25  ;;  %1628 = vmatpush1.bf16.msra.mxu1 %v6033_v40  ;;  %v6064_v25 = vcombine.high %v868_v34, %v872_v35  ;;  %v6066_v40 = vcombine.high %v869_v36, %v873_v37  ;;  %v881_v44 = vld [vmem:[#allocation3 + $0x228] sm:$0xff] }
 0x1b1   : > { %1588 = vmatprep.subr.bf16.mxu0 %v6040_v41  ;;  %1629 = vmatprep.subr.bf16.mxu1 %v6042_v42  ;;  %v876_v41 = vld [vmem:[#allocation3 + $0x200] sm:$0xff]  ;;  %v885_v52 = vld [vmem:[#allocation3 + $0x248] sm:$0xff]  ;;  %v6073_v55 = vcombine.low %v877_v43, %v881_v44 }
 0x1b2   : > { %v880_v42 = vld [vmem:[#allocation3 + $0x220] sm:$0xff]  ;;  %v889_v53 = vld [vmem:[#allocation3 + $0x268] sm:$0xff] }
 0x1b3   : > { %v6071_v54 = vcombine.low %v876_v41, %v880_v42  ;;  %v893_v34 = vld [vmem:[#allocation3 + $0x288] sm:$0xff]  ;;  %v6081_v37 = vcombine.low %v885_v52, %v889_v53 }
 0x1b4   : > { %1589 = vmatpush1.bf16.msra.mxu0 %v6039_v47  ;;  %1630 = vmatpush1.bf16.msra.mxu1 %v6041_v48  ;;  %v6072_v47 = vcombine.high %v876_v41, %v880_v42  ;;  %v6074_v48 = vcombine.high %v877_v43, %v881_v44  ;;  %v897_v35 = vld [vmem:[#allocation3 + $0x2a8] sm:$0xff] }
 0x1b5   : > { %1590 = vmatprep.subr.bf16.mxu0 %v6048_v50  ;;  %1631 = vmatprep.subr.bf16.mxu1 %v6050_v51  ;;  %v884_v50 = vld [vmem:[#allocation3 + $0x240] sm:$0xff]  ;;  %v901_v41 = vld [vmem:[#allocation3 + $0x2c8] sm:$0xff]  ;;  %v6089_v44 = vcombine.low %v893_v34, %v897_v35 }
 0x1b6   : > { %v888_v51 = vld [vmem:[#allocation3 + $0x260] sm:$0xff]  ;;  %v905_v42 = vld [vmem:[#allocation3 + $0x2e8] sm:$0xff] }
 0x1b7   : > { %v6079_v36 = vcombine.low %v884_v50, %v888_v51  ;;  %v6982_v1 = vld [vmem:[#allocation14 + $0x54] ss:$8 sps:$4 sm:$0xff] (%p8033_p0)   ;;  %v6984_v2 = vld [vmem:[#allocation14 + $0x50] ss:$8 sps:$4 sm:$0xff] (%p8033_p0)  }
 0x1b8   : > { %1591 = vmatpush1.bf16.msra.mxu0 %v6047_v56  ;;  %1632 = vmatpush1.bf16.msra.mxu1 %v6049_v32  ;;  %v6080_v56 = vcombine.high %v884_v50, %v888_v51  ;;  %v6082_v32 = vcombine.high %v885_v52, %v889_v53  ;;  %v909_v50 = vld [vmem:[#allocation3 + $0x308] sm:$0xff]  ;;  %v6097_v53 = vcombine.low %v901_v41, %v905_v42 }
 0x1b9   : > { %1592 = vmatprep.subr.bf16.mxu0 %v6056_v30  ;;  %1633 = vmatprep.subr.bf16.mxu1 %v6058_v33  ;;  %v892_v30 = vld [vmem:[#allocation3 + $0x280] sm:$0xff]  ;;  %v913_v51 = vld [vmem:[#allocation3 + $0x328] sm:$0xff] }
 0x1ba   : > { %v896_v33 = vld [vmem:[#allocation3 + $0x2a0] sm:$0xff]  ;;  %v7000_v13 = vld [vmem:[#allocation14 + $0xb4] ss:$8 sps:$4 sm:$0xff] (%p8033_p0)   ;;  %v7002_v14 = vld [vmem:[#allocation14 + $0xb0] ss:$8 sps:$4 sm:$0xff] (%p8033_p0)  }
 0x1bb   : > { %v6087_v43 = vcombine.low %v892_v30, %v896_v33 }
 0x1bc   : > { %1593 = vmatpush1.bf16.msra.mxu0 %v6055_v38  ;;  %1634 = vmatpush1.bf16.msra.mxu1 %v6057_v39  ;;  %v6088_v38 = vcombine.high %v892_v30, %v896_v33  ;;  %v6090_v39 = vcombine.high %v893_v34, %v897_v35  ;;  %v917_v30 = vld [vmem:[#allocation3 + $0x348] sm:$0xff]  ;;  %v6105_v35 = vcombine.low %v909_v50, %v913_v51 }
 0x1bd   : > { %1594 = vmatprep.subr.bf16.mxu0 %v6064_v25  ;;  %1635 = vmatprep.subr.bf16.mxu1 %v6066_v40  ;;  %v900_v25 = vld [vmem:[#allocation3 + $0x2c0] sm:$0xff]  ;;  %v921_v33 = vld [vmem:[#allocation3 + $0x368] sm:$0xff] }
 0x1be   : > { %v904_v40 = vld [vmem:[#allocation3 + $0x2e0] sm:$0xff] }
 0x1bf   : > { %v6095_v52 = vcombine.low %v900_v25, %v904_v40 }
 0x1c0   : > { %1595 = vmatpush1.bf16.msra.mxu0 %v6063_v45  ;;  %1636 = vmatpush1.bf16.msra.mxu1 %v6065_v46  ;;  %v6096_v45 = vcombine.high %v900_v25, %v904_v40  ;;  %v6098_v46 = vcombine.high %v901_v41, %v905_v42  ;;  %v925_v25 = vld [vmem:[#allocation3 + $0x388] sm:$0xff]  ;;  %v6113_v42 = vcombine.low %v917_v30, %v921_v33 }
 0x1c1   : > { %1596 = vmatprep.subr.bf16.mxu0 %v6072_v47  ;;  %1637 = vmatprep.subr.bf16.mxu1 %v6074_v48  ;;  %v908_v47 = vld [vmem:[#allocation3 + $0x300] sm:$0xff]  ;;  %v929_v40 = vld [vmem:[#allocation3 + $0x3a8] sm:$0xff] }
 0x1c2   : > { %v912_v48 = vld [vmem:[#allocation3 + $0x320] sm:$0xff] }
 0x1c3   : > { %v6103_v34 = vcombine.low %v908_v47, %v912_v48 }
 0x1c4   : > { %1597 = vmatpush1.bf16.msra.mxu0 %v6071_v54  ;;  %1638 = vmatpush1.bf16.msra.mxu1 %v6073_v55  ;;  %v6104_v54 = vcombine.high %v908_v47, %v912_v48  ;;  %v6106_v55 = vcombine.high %v909_v50, %v913_v51  ;;  %v933_v47 = vld [vmem:[#allocation3 + $0x3c8] sm:$0xff]  ;;  %v6121_v51 = vcombine.low %v925_v25, %v929_v40 }
 0x1c5   : > { %1598 = vmatprep.subr.bf16.mxu0 %v6080_v56  ;;  %1639 = vmatprep.subr.bf16.mxu1 %v6082_v32  ;;  %v916_v56 = vld [vmem:[#allocation3 + $0x340] sm:$0xff]  ;;  %v937_v48 = vld [vmem:[#allocation3 + $0x3e8] sm:$0xff] }
 0x1c6   : > { %v920_v32 = vld [vmem:[#allocation3 + $0x360] sm:$0xff] }
 0x1c7   : > { %v6111_v41 = vcombine.low %v916_v56, %v920_v32 }
 0x1c8   : > { %1599 = vmatpush1.bf16.msra.mxu0 %v6079_v36  ;;  %1640 = vmatpush1.bf16.msra.mxu1 %v6081_v37  ;;  %v6112_v36 = vcombine.high %v916_v56, %v920_v32  ;;  %v6114_v37 = vcombine.high %v917_v30, %v921_v33  ;;  %v815_v56 = vld [vmem:[#allocation3 + $0x18] sm:$0xff]  ;;  %v6129_v33 = vcombine.low %v933_v47, %v937_v48 }
 0x1c9   : > { %1600 = vmatprep.subr.bf16.mxu0 %v6088_v38  ;;  %1641 = vmatprep.subr.bf16.mxu1 %v6090_v39  ;;  %v924_v38 = vld [vmem:[#allocation3 + $0x380] sm:$0xff]  ;;  %v819_v32 = vld [vmem:[#allocation3 + $0x38] sm:$0xff] }
 0x1ca   : > { %v928_v39 = vld [vmem:[#allocation3 + $0x3a0] sm:$0xff] }
 0x1cb   : > { %v6119_v50 = vcombine.low %v924_v38, %v928_v39 }
 0x1cc   : > { %1601 = vmatpush1.bf16.msra.mxu0 %v6087_v43  ;;  %1642 = vmatpush1.bf16.msra.mxu1 %v6089_v44  ;;  %v6120_v43 = vcombine.high %v924_v38, %v928_v39  ;;  %v6122_v44 = vcombine.high %v925_v25, %v929_v40  ;;  %v7827_v38 = vpack.c.bf16 %v7303_v31, %v7303_v31  ;;  %v823_v39 = vld [vmem:[#allocation3 + $0x58] sm:$0xff] }
 0x1cd   : > { %1602 = vmatprep.subr.bf16.mxu0 %v6096_v45  ;;  %1643 = vmatprep.subr.bf16.mxu1 %v6098_v46  ;;  %v932_v45 = vld [vmem:[#allocation3 + $0x3c0] sm:$0xff]  ;;  %v827_v25 = vld [vmem:[#allocation3 + $0x78] sm:$0xff] }
 0x1ce   : > { %v936_v46 = vld [vmem:[#allocation3 + $0x3e0] sm:$0xff] }
 0x1cf   : > { %v6127_v30 = vcombine.low %v932_v45, %v936_v46 }
 0x1d0   : > { %1603 = vmatpush1.bf16.msra.mxu0 %v6095_v52  ;;  %1644 = vmatpush1.bf16.msra.mxu1 %v6097_v53  ;;  %v6128_v52 = vcombine.high %v932_v45, %v936_v46  ;;  %v6130_v53 = vcombine.high %v933_v47, %v937_v48  ;;  %v834_v45 = vld [vmem:[#allocation3 + $0xb0] sm:$0xff]  ;;  %v831_v46 = vld [vmem:[#allocation3 + $0x98] sm:$0xff]  ;;  %v6021_v48 = vcombine.low %v823_v39, %v827_v25 }
 0x1d1   : > { %1604 = vmatprep.subr.bf16.mxu0 %v6104_v54  ;;  %1645 = vmatprep.subr.bf16.mxu1 %v6106_v55  ;;  %v814_v54 = vld [vmem:[#allocation3 + $0x10] sm:$0xff]  ;;  %v835_v47 = vld [vmem:[#allocation3 + $0xb8] sm:$0xff] }
 0x1d2   : > { %v818_v55 = vld [vmem:[#allocation3 + $0x30] sm:$0xff] }
 0x1d3   : > { %v6011_v40 = vcombine.low %v814_v54, %v818_v55 }
 0x1d4   : > { %1605 = vmatpush1.bf16.msra.mxu0 %v6103_v34  ;;  %1646 = vmatpush1.bf16.msra.mxu1 %v6105_v35  ;;  %v6012_v34 = vcombine.high %v814_v54, %v818_v55  ;;  %v6014_v35 = vcombine.high %v815_v56, %v819_v32  ;;  %v839_v54 = vld [vmem:[#allocation3 + $0xd8] sm:$0xff] }
 0x1d5   : > { %1606 = vmatprep.subr.bf16.mxu0 %v6112_v36  ;;  %1647 = vmatprep.subr.bf16.mxu1 %v6114_v37  ;;  %v822_v36 = vld [vmem:[#allocation3 + $0x50] sm:$0xff]  ;;  %v843_v55 = vld [vmem:[#allocation3 + $0xf8] sm:$0xff] }
 0x1d6   : > { %v826_v37 = vld [vmem:[#allocation3 + $0x70] sm:$0xff] }
 0x1d7   : > { %v6019_v31 = vcombine.low %v822_v36, %v826_v37 }
 0x1d8   : > { %1607 = vmatpush1.bf16.msra.mxu0 %v6111_v41  ;;  %1648 = vmatpush1.bf16.msra.mxu1 %v6113_v42  ;;  %v6013_v41 = vcombine.low %v815_v56, %v819_v32  ;;  %v6020_v42 = vcombine.high %v822_v36, %v826_v37  ;;  %v6029_v32 = vcombine.low %v831_v46, %v835_v47  ;;  %v847_v36 = vld [vmem:[#allocation3 + $0x118] sm:$0xff] }
 0x1d9   : > { %1608 = vmatprep.subr.bf16.mxu0 %v6120_v43  ;;  %1649 = vmatprep.subr.bf16.mxu1 %v6122_v44  ;;  %v6022_v43 = vcombine.high %v823_v39, %v827_v25  ;;  %v830_v44 = vld [vmem:[#allocation3 + $0x90] sm:$0xff]  ;;  %v851_v37 = vld [vmem:[#allocation3 + $0x138] sm:$0xff]  ;;  %v6037_v25 = vcombine.low %v839_v54, %v843_v55 }
 0x1da   : > { %v6027_v56 = vcombine.low %v830_v44, %v834_v45 }
 0x1dc   : > { %1609 = vmatpush1.bf16.msra.mxu0 %v6119_v50  ;;  %1650 = vmatpush1.bf16.msra.mxu1 %v6121_v51  ;;  %v6028_v50 = vcombine.high %v830_v44, %v834_v45  ;;  %v6030_v51 = vcombine.high %v831_v46, %v835_v47  ;;  %v859_v44 = vld [vmem:[#allocation3 + $0x178] sm:$0xff]  ;;  %v6045_v46 = vcombine.low %v847_v36, %v851_v37 }
 0x1dd   : > { %1610 = vmatprep.subr.bf16.mxu0 %v6128_v52  ;;  %1651 = vmatprep.subr.bf16.mxu1 %v6130_v53  ;;  %v838_v52 = vld [vmem:[#allocation3 + $0xd0] sm:$0xff] }
 0x1de   : > { %v842_v53 = vld [vmem:[#allocation3 + $0xf0] sm:$0xff] }
 0x1df   : > { %v6035_v39 = vcombine.low %v838_v52, %v842_v53 }
 0x1e0   : > { %1611 = vmatpush1.bf16.msra.mxu0 %v6127_v30  ;;  %1652 = vmatpush1.bf16.msra.mxu1 %v6129_v33  ;;  %v6036_v30 = vcombine.high %v838_v52, %v842_v53  ;;  %v6038_v33 = vcombine.high %v839_v54, %v843_v55  ;;  %v867_v52 = vld [vmem:[#allocation3 + $0x1b8] sm:$0xff] }
 0x1e1   : > { %1662 = vmatprep.subr.bf16.mxu0 %v6012_v34  ;;  %1703 = vmatprep.subr.bf16.mxu1 %v6014_v35  ;;  %v846_v34 = vld [vmem:[#allocation3 + $0x110] sm:$0xff] }
 0x1e2   : > { %v850_v35 = vld [vmem:[#allocation3 + $0x130] sm:$0xff] }
 0x1e3   : > { %1613 = vmatmul.mubr.bf16.vlgmr.msra.gmra.mrb[0].mxu0 %v7827_v38  ;;  %1654 = vmatmul.mubr.bf16.vlgmr.msra.gmra.mrb[0].mxu1 %v7827_v38  ;;  %v6043_v45 = vcombine.low %v846_v34, %v850_v35 }
 0x1e4   : > { %1663 = vmatpush1.bf16.msra.mxu0 %v6011_v40  ;;  %1704 = vmatpush1.bf16.msra.mxu1 %v6013_v41  ;;  %v6044_v40 = vcombine.high %v846_v34, %v850_v35  ;;  %v854_v41 = vld [vmem:[#allocation3 + $0x150] sm:$0xff]  ;;  %v875_v34 = vld [vmem:[#allocation3 + $0x1f8] sm:$0xff] }
 0x1e5   : > { %1664 = vmatprep.subr.bf16.mxu0 %v6020_v42  ;;  %1705 = vmatprep.subr.bf16.mxu1 %v6022_v43  ;;  %v858_v42 = vld [vmem:[#allocation3 + $0x170] sm:$0xff]  ;;  %v855_v43 = vld [vmem:[#allocation3 + $0x158] sm:$0xff] }
 0x1e6   : > { %1694 = vmatprep.mubr.bf16.mxu0 %v7821_v49  ;;  %1735 = vmatprep.mubr.bf16.mxu1 %v7821_v49  ;;  %v6046_v49 = vcombine.high %v847_v36, %v851_v37  ;;  %v6052_v47 = vcombine.high %v854_v41, %v858_v42  ;;  %v6051_v53 = vcombine.low %v854_v41, %v858_v42  ;;  %v883_v41 = vld [vmem:[#allocation3 + $0x238] sm:$0xff] }
 0x1e7   : > { %v6053_v54 = vcombine.low %v855_v43, %v859_v44 }
 0x1e8   : > { %1665 = vmatpush1.bf16.msra.mxu0 %v6019_v31  ;;  %1706 = vmatpush1.bf16.msra.mxu1 %v6021_v48  ;;  %v6054_v31 = vcombine.high %v855_v43, %v859_v44  ;;  %v862_v48 = vld [vmem:[#allocation3 + $0x190] sm:$0xff] }
 0x1e9   : > { %1666 = vmatprep.subr.bf16.mxu0 %v6028_v50  ;;  %1707 = vmatprep.subr.bf16.mxu1 %v6030_v51  ;;  %v866_v50 = vld [vmem:[#allocation3 + $0x1b0] sm:$0xff]  ;;  %v863_v51 = vld [vmem:[#allocation3 + $0x198] sm:$0xff] }
 0x1ea   : > { %v6060_v55 = vcombine.high %v862_v48, %v866_v50  ;;  %v6059_v35 = vcombine.low %v862_v48, %v866_v50  ;;  %v6061_v36 = vcombine.low %v863_v51, %v867_v52  ;;  %v891_v48 = vld [vmem:[#allocation3 + $0x278] sm:$0xff] }
 0x1ec   : > { %1667 = vmatpush1.bf16.msra.mxu0 %v6027_v56  ;;  %1708 = vmatpush1.bf16.msra.mxu1 %v6029_v32  ;;  %v6062_v56 = vcombine.high %v863_v51, %v867_v52  ;;  %v870_v32 = vld [vmem:[#allocation3 + $0x1d0] sm:$0xff] }
 0x1ed   : > { %1668 = vmatprep.subr.bf16.mxu0 %v6036_v30  ;;  %1709 = vmatprep.subr.bf16.mxu1 %v6038_v33  ;;  %v874_v30 = vld [vmem:[#allocation3 + $0x1f0] sm:$0xff]  ;;  %v871_v33 = vld [vmem:[#allocation3 + $0x1d8] sm:$0xff] }
 0x1ee   : > { %v6068_v37 = vcombine.high %v870_v32, %v874_v30  ;;  %v6067_v42 = vcombine.low %v870_v32, %v874_v30  ;;  %v6069_v43 = vcombine.low %v871_v33, %v875_v34  ;;  %v899_v32 = vld [vmem:[#allocation3 + $0x2b8] sm:$0xff] }
 0x1f0   : > { %1669 = vmatpush1.bf16.msra.mxu0 %v6035_v39  ;;  %1710 = vmatpush1.bf16.msra.mxu1 %v6037_v25  ;;  %v6070_v39 = vcombine.high %v871_v33, %v875_v34  ;;  %v878_v25 = vld [vmem:[#allocation3 + $0x210] sm:$0xff] }
 0x1f1   : > { %1670 = vmatprep.subr.bf16.mxu0 %v6044_v40  ;;  %1711 = vmatprep.subr.bf16.mxu1 %v6046_v49  ;;  %v882_v40 = vld [vmem:[#allocation3 + $0x230] sm:$0xff]  ;;  %v879_v49 = vld [vmem:[#allocation3 + $0x218] sm:$0xff] }
 0x1f2   : > { %v6076_v44 = vcombine.high %v878_v25, %v882_v40  ;;  %v6075_v50 = vcombine.low %v878_v25, %v882_v40  ;;  %v6077_v51 = vcombine.low %v879_v49, %v883_v41  ;;  %v907_v25 = vld [vmem:[#allocation3 + $0x2f8] sm:$0xff] }
 0x1f4   : > { %1671 = vmatpush1.bf16.msra.mxu0 %v6043_v45  ;;  %1712 = vmatpush1.bf16.msra.mxu1 %v6045_v46  ;;  %v6078_v45 = vcombine.high %v879_v49, %v883_v41  ;;  %v886_v46 = vld [vmem:[#allocation3 + $0x250] sm:$0xff] }
 0x1f5   : > { %1672 = vmatprep.subr.bf16.mxu0 %v6052_v47  ;;  %1713 = vmatprep.subr.bf16.mxu1 %v6054_v31  ;;  %v890_v47 = vld [vmem:[#allocation3 + $0x270] sm:$0xff]  ;;  %v887_v31 = vld [vmem:[#allocation3 + $0x258] sm:$0xff] }
 0x1f6   : > { %v6084_v52 = vcombine.high %v886_v46, %v890_v47  ;;  %v6083_v30 = vcombine.low %v886_v46, %v890_v47  ;;  %v6085_v33 = vcombine.low %v887_v31, %v891_v48  ;;  %v915_v46 = vld [vmem:[#allocation3 + $0x338] sm:$0xff] }
 0x1f8   : > { %1673 = vmatpush1.bf16.msra.mxu0 %v6051_v53  ;;  %1714 = vmatpush1.bf16.msra.mxu1 %v6053_v54  ;;  %v6086_v53 = vcombine.high %v887_v31, %v891_v48  ;;  %v894_v54 = vld [vmem:[#allocation3 + $0x290] sm:$0xff] }
 0x1f9   : > { %1674 = vmatprep.subr.bf16.mxu0 %v6060_v55  ;;  %1715 = vmatprep.subr.bf16.mxu1 %v6062_v56  ;;  %v898_v55 = vld [vmem:[#allocation3 + $0x2b0] sm:$0xff]  ;;  %v895_v56 = vld [vmem:[#allocation3 + $0x298] sm:$0xff] }
 0x1fa   : > { %v6092_v34 = vcombine.high %v894_v54, %v898_v55  ;;  %v6091_v40 = vcombine.low %v894_v54, %v898_v55  ;;  %v6093_v49 = vcombine.low %v895_v56, %v899_v32  ;;  %v923_v54 = vld [vmem:[#allocation3 + $0x378] sm:$0xff] }
 0x1fc   : > { %1675 = vmatpush1.bf16.msra.mxu0 %v6059_v35  ;;  %1716 = vmatpush1.bf16.msra.mxu1 %v6061_v36  ;;  %v6094_v35 = vcombine.high %v895_v56, %v899_v32  ;;  %v902_v36 = vld [vmem:[#allocation3 + $0x2d0] sm:$0xff] }
 0x1fd   : > { %1676 = vmatprep.subr.bf16.mxu0 %v6068_v37  ;;  %1717 = vmatprep.subr.bf16.mxu1 %v6070_v39  ;;  %v906_v37 = vld [vmem:[#allocation3 + $0x2f0] sm:$0xff]  ;;  %v903_v39 = vld [vmem:[#allocation3 + $0x2d8] sm:$0xff] }
 0x1fe   : > { %v6100_v41 = vcombine.high %v902_v36, %v906_v37  ;;  %v6099_v47 = vcombine.low %v902_v36, %v906_v37  ;;  %v6101_v31 = vcombine.low %v903_v39, %v907_v25  ;;  %v931_v36 = vld [vmem:[#allocation3 + $0x3b8] sm:$0xff] }
 0x200   : > { %1677 = vmatpush1.bf16.msra.mxu0 %v6067_v42  ;;  %1718 = vmatpush1.bf16.msra.mxu1 %v6069_v43  ;;  %v6102_v42 = vcombine.high %v903_v39, %v907_v25  ;;  %v910_v43 = vld [vmem:[#allocation3 + $0x310] sm:$0xff] }
 0x201   : > { %1678 = vmatprep.subr.bf16.mxu0 %v6076_v44  ;;  %1719 = vmatprep.subr.bf16.mxu1 %v6078_v45  ;;  %v914_v44 = vld [vmem:[#allocation3 + $0x330] sm:$0xff]  ;;  %v911_v45 = vld [vmem:[#allocation3 + $0x318] sm:$0xff] }
 0x202   : > { %v6108_v48 = vcombine.high %v910_v43, %v914_v44  ;;  %v6107_v55 = vcombine.low %v910_v43, %v914_v44  ;;  %v6109_v56 = vcombine.low %v911_v45, %v915_v46  ;;  %v939_v43 = vld [vmem:[#allocation3 + $0x3f8] sm:$0xff] }
 0x204   : > { %1679 = vmatpush1.bf16.msra.mxu0 %v6075_v50  ;;  %1720 = vmatpush1.bf16.msra.mxu1 %v6077_v51  ;;  %v6110_v50 = vcombine.high %v911_v45, %v915_v46  ;;  %v918_v51 = vld [vmem:[#allocation3 + $0x350] sm:$0xff] }
 0x205   : > { %1680 = vmatprep.subr.bf16.mxu0 %v6084_v52  ;;  %1721 = vmatprep.subr.bf16.mxu1 %v6086_v53  ;;  %v922_v52 = vld [vmem:[#allocation3 + $0x370] sm:$0xff]  ;;  %v919_v53 = vld [vmem:[#allocation3 + $0x358] sm:$0xff] }
 0x206   : > { %v6116_v32 = vcombine.high %v918_v51, %v922_v52  ;;  %v6115_v37 = vcombine.low %v918_v51, %v922_v52  ;;  %v6117_v39 = vcombine.low %v919_v53, %v923_v54  ;;  %v1808_v51 = vld [vmem:[#allocation8 + $0x20] sm:$0xff]  ;;  %v1805_v52 = vld [vmem:[#allocation8 + $0x8] sm:$0xff] }
 0x208   : > { %1681 = vmatpush1.bf16.msra.mxu0 %v6083_v30  ;;  %1722 = vmatpush1.bf16.msra.mxu1 %v6085_v33  ;;  %v6118_v30 = vcombine.high %v919_v53, %v923_v54  ;;  %v926_v33 = vld [vmem:[#allocation3 + $0x390] sm:$0xff] }
 0x209   : > { %1682 = vmatprep.subr.bf16.mxu0 %v6092_v34  ;;  %1723 = vmatprep.subr.bf16.mxu1 %v6094_v35  ;;  %v930_v34 = vld [vmem:[#allocation3 + $0x3b0] sm:$0xff]  ;;  %v927_v35 = vld [vmem:[#allocation3 + $0x398] sm:$0xff] }
 0x20a   : > { %v6124_v25 = vcombine.high %v926_v33, %v930_v34  ;;  %v6123_v44 = vcombine.low %v926_v33, %v930_v34  ;;  %v6125_v45 = vcombine.low %v927_v35, %v931_v36 }
 0x20c   : > { %1683 = vmatpush1.bf16.msra.mxu0 %v6091_v40  ;;  %1724 = vmatpush1.bf16.msra.mxu1 %v6093_v49  ;;  %v6126_v40 = vcombine.high %v927_v35, %v931_v36  ;;  %v934_v49 = vld [vmem:[#allocation3 + $0x3d0] sm:$0xff] }
 0x20d   : > { %1684 = vmatprep.subr.bf16.mxu0 %v6100_v41  ;;  %1725 = vmatprep.subr.bf16.mxu1 %v6102_v42  ;;  %v938_v41 = vld [vmem:[#allocation3 + $0x3f0] sm:$0xff]  ;;  %v935_v42 = vld [vmem:[#allocation3 + $0x3d8] sm:$0xff] }
 0x20e   : > { %v6132_v46 = vcombine.high %v934_v49, %v938_v41  ;;  %v1813_v35 = vld [vmem:[#allocation8 + $0x48] sm:$0xff] }
 0x20f   : > { %v1817_v36 = vld [vmem:[#allocation8 + $0x68] sm:$0xff] }
 0x210   : > { %1685 = vmatpush1.bf16.msra.mxu0 %v6099_v47  ;;  %1726 = vmatpush1.bf16.msra.mxu1 %v6101_v31  ;;  %v6134_v47 = vcombine.high %v935_v42, %v939_v43  ;;  %v6131_v31 = vcombine.low %v934_v49, %v938_v41  ;;  %v1825_v49 = vld [vmem:[#allocation8 + $0xa8] sm:$0xff]  ;;  %v6151_v41 = vcombine.low %v1813_v35, %v1817_v36 }
 0x211   : > { %1686 = vmatprep.subr.bf16.mxu0 %v6108_v48  ;;  %1727 = vmatprep.subr.bf16.mxu1 %v6110_v50  ;;  %v6133_v48 = vcombine.low %v935_v42, %v939_v43  ;;  %v1804_v50 = vld [vmem:[#allocation8] sm:$0xff] }
 0x212   : > { %v6141_v53 = vcombine.low %v1804_v50, %v1808_v51  ;;  %v6142_v54 = vcombine.high %v1804_v50, %v1808_v51 }
 0x214   : > { %1687 = vmatpush1.bf16.msra.mxu0 %v6107_v55  ;;  %1728 = vmatpush1.bf16.msra.mxu1 %v6109_v56  ;;  %v1809_v55 = vld [vmem:[#allocation8 + $0x28] sm:$0xff]  ;;  %v1812_v56 = vld [vmem:[#allocation8 + $0x40] sm:$0xff] }
 0x215   : > { %1688 = vmatprep.subr.bf16.mxu0 %v6116_v32  ;;  %1729 = vmatprep.subr.bf16.mxu1 %v6118_v30  ;;  %v1816_v32 = vld [vmem:[#allocation8 + $0x60] sm:$0xff]  ;;  %v6143_v30 = vcombine.low %v1805_v52, %v1809_v55  ;;  %v6144_v33 = vcombine.high %v1805_v52, %v1809_v55  ;;  %v1841_v55 = vld [vmem:[#allocation8 + $0x128] sm:$0xff] }
 0x216   : > { %v6150_v34 = vcombine.high %v1812_v56, %v1816_v32  ;;  %v1836_v52 = vld [vmem:[#allocation8 + $0x100] sm:$0xff] }
 0x218   : > { %1689 = vmatpush1.bf16.msra.mxu0 %v6115_v37  ;;  %1730 = vmatpush1.bf16.msra.mxu1 %v6117_v39  ;;  %v1820_v37 = vld [vmem:[#allocation8 + $0x80] sm:$0xff]  ;;  %v6152_v39 = vcombine.high %v1813_v35, %v1817_v36  ;;  %v1845_v36 = vld [vmem:[#allocation8 + $0x148] sm:$0xff] }
 0x219   : > { %1690 = vmatprep.subr.bf16.mxu0 %v6124_v25  ;;  %1731 = vmatprep.subr.bf16.mxu1 %v6126_v40  ;;  %v1824_v25 = vld [vmem:[#allocation8 + $0xa0] sm:$0xff]  ;;  %v1821_v40 = vld [vmem:[#allocation8 + $0x88] sm:$0xff] }
 0x21a   : > { %v6158_v42 = vcombine.high %v1820_v37, %v1824_v25  ;;  %v6160_v43 = vcombine.high %v1821_v40, %v1825_v49  ;;  %v1848_v35 = vld [vmem:[#allocation8 + $0x160] sm:$0xff] }
 0x21c   : > { %1691 = vmatpush1.bf16.msra.mxu0 %v6123_v44  ;;  %1732 = vmatpush1.bf16.msra.mxu1 %v6125_v45  ;;  %v1828_v44 = vld [vmem:[#allocation8 + $0xc0] sm:$0xff] }
 0x21d   : > { %1692 = vmatprep.subr.bf16.mxu0 %v6132_v46  ;;  %1733 = vmatprep.subr.bf16.mxu1 %v6134_v47  ;;  %v1832_v45 = vld [vmem:[#allocation8 + $0xe0] sm:$0xff]  ;;  %v1829_v46 = vld [vmem:[#allocation8 + $0xc8] sm:$0xff] }
 0x21e   : > { %v1833_v47 = vld [vmem:[#allocation8 + $0xe8] sm:$0xff]  ;;  %v6166_v50 = vcombine.high %v1828_v44, %v1832_v45 }
 0x21f   : > { %v6168_v51 = vcombine.high %v1829_v46, %v1833_v47 }
 0x220   : > { %1693 = vmatpush1.bf16.msra.mxu0 %v6131_v31  ;;  %1734 = vmatpush1.bf16.msra.mxu1 %v6133_v48  ;;  %v6157_v31 = vcombine.low %v1820_v37, %v1824_v25  ;;  %v6159_v48 = vcombine.low %v1821_v40, %v1825_v49  ;;  %v1849_v37 = vld [vmem:[#allocation8 + $0x168] sm:$0xff] }
 0x221   : > { %3340 = vmatprep.subr.bf16.mxu0 %v6142_v54  ;;  %3422 = vmatprep.subr.bf16.mxu1 %v6144_v33  ;;  %v1837_v54 = vld [vmem:[#allocation8 + $0x108] sm:$0xff]  ;;  %v6184_v49 = vcombine.high %v1845_v36, %v1849_v37 }
 0x222   : > { %v6176_v33 = vcombine.high %v1837_v54, %v1841_v55  ;;  %v6175_v25 = vcombine.low %v1837_v54, %v1841_v55 }
 0x223   : > { %1695 = vmatmul.mubr.bf16.vlgmr.msra.gmra.mrb[4].mxu0 %v7827_v38  ;;  %1736 = vmatmul.mubr.bf16.vlgmr.msra.gmra.mrb[4].mxu1 %v7827_v38  ;;  %v6149_v38 = vcombine.low %v1812_v56, %v1816_v32  ;;  %v6165_v56 = vcombine.low %v1828_v44, %v1832_v45  ;;  %v6167_v32 = vcombine.low %v1829_v46, %v1833_v47 }
 0x224   : > { %3341 = vmatpush1.bf16.msra.mxu0 %v6141_v53  ;;  %3423 = vmatpush1.bf16.msra.mxu1 %v6143_v30  ;;  %v1840_v53 = vld [vmem:[#allocation8 + $0x120] sm:$0xff]  ;;  %v6183_v45 = vcombine.low %v1845_v36, %v1849_v37  ;;  %v1873_v37 = vld [vmem:[#allocation8 + $0x228] sm:$0xff] }
 0x225   : > { %3342 = vmatprep.subr.bf16.mxu0 %v6150_v34  ;;  %3424 = vmatprep.subr.bf16.mxu1 %v6152_v39  ;;  %v6174_v30 = vcombine.high %v1836_v52, %v1840_v53  ;;  %v1844_v34 = vld [vmem:[#allocation8 + $0x140] sm:$0xff]  ;;  %v6173_v39 = vcombine.low %v1836_v52, %v1840_v53 }
 0x226   : > { %v6182_v40 = vcombine.high %v1844_v34, %v1848_v35  ;;  %v6181_v44 = vcombine.low %v1844_v34, %v1848_v35  ;;  %v1869_v35 = vld [vmem:[#allocation8 + $0x208] sm:$0xff] }
 0x228   : > { %3343 = vmatpush1.bf16.msra.mxu0 %v6149_v38  ;;  %3425 = vmatpush1.bf16.msra.mxu1 %v6151_v41  ;;  %v1852_v38 = vld [vmem:[#allocation8 + $0x180] sm:$0xff] }
 0x229   : > { %3344 = vmatprep.subr.bf16.mxu0 %v6158_v42  ;;  %3426 = vmatprep.subr.bf16.mxu1 %v6160_v43  ;;  %v1856_v41 = vld [vmem:[#allocation8 + $0x1a0] sm:$0xff]  ;;  %v1853_v42 = vld [vmem:[#allocation8 + $0x188] sm:$0xff] }
 0x22a   : > { %v1857_v43 = vld [vmem:[#allocation8 + $0x1a8] sm:$0xff]  ;;  %v6190_v46 = vcombine.high %v1852_v38, %v1856_v41  ;;  %v6189_v52 = vcombine.low %v1852_v38, %v1856_v41 }
 0x22b   : > { %v6192_v47 = vcombine.high %v1853_v42, %v1857_v43  ;;  %v6191_v53 = vcombine.low %v1853_v42, %v1857_v43  ;;  %v1877_v38 = vld [vmem:[#allocation8 + $0x248] sm:$0xff] }
 0x22c   : > { %3345 = vmatpush1.bf16.msra.mxu0 %v6157_v31  ;;  %3427 = vmatpush1.bf16.msra.mxu1 %v6159_v48  ;;  %v1860_v31 = vld [vmem:[#allocation8 + $0x1c0] sm:$0xff]  ;;  %v1881_v42 = vld [vmem:[#allocation8 + $0x268] sm:$0xff] }
 0x22d   : > { %3346 = vmatprep.subr.bf16.mxu0 %v6166_v50  ;;  %3428 = vmatprep.subr.bf16.mxu1 %v6168_v51  ;;  %v1864_v48 = vld [vmem:[#allocation8 + $0x1e0] sm:$0xff]  ;;  %v1861_v50 = vld [vmem:[#allocation8 + $0x1c8] sm:$0xff] }
 0x22e   : > { %v1865_v51 = vld [vmem:[#allocation8 + $0x1e8] sm:$0xff]  ;;  %v6198_v54 = vcombine.high %v1860_v31, %v1864_v48 }
 0x22f   : > { %v6200_v55 = vcombine.high %v1861_v50, %v1865_v51 }
 0x230   : > { %3347 = vmatpush1.bf16.msra.mxu0 %v6165_v56  ;;  %3429 = vmatpush1.bf16.msra.mxu1 %v6167_v32  ;;  %v6197_v56 = vcombine.low %v1860_v31, %v1864_v48  ;;  %v6199_v32 = vcombine.low %v1861_v50, %v1865_v51  ;;  %v1885_v31 = vld [vmem:[#allocation8 + $0x288] sm:$0xff] }
 0x231   : > { %3348 = vmatprep.subr.bf16.mxu0 %v6174_v30  ;;  %3430 = vmatprep.subr.bf16.mxu1 %v6176_v33  ;;  %v1868_v30 = vld [vmem:[#allocation8 + $0x200] sm:$0xff]  ;;  %v1889_v50 = vld [vmem:[#allocation8 + $0x2a8] sm:$0xff] }
 0x232   : > { %v1872_v33 = vld [vmem:[#allocation8 + $0x220] sm:$0xff] }
 0x233   : > { %v6206_v34 = vcombine.high %v1868_v30, %v1872_v33  ;;  %v6205_v36 = vcombine.low %v1868_v30, %v1872_v33  ;;  %v1897_v30 = vld [vmem:[#allocation8 + $0x2e8] sm:$0xff] }
 0x234   : > { %3349 = vmatpush1.bf16.msra.mxu0 %v6173_v39  ;;  %3431 = vmatpush1.bf16.msra.mxu1 %v6175_v25  ;;  %v6207_v39 = vcombine.low %v1869_v35, %v1873_v37  ;;  %v6208_v25 = vcombine.high %v1869_v35, %v1873_v37  ;;  %v1904_v37 = vld [vmem:[#allocation8 + $0x320] sm:$0xff] }
 0x235   : > { %3350 = vmatprep.subr.bf16.mxu0 %v6182_v40  ;;  %3432 = vmatprep.subr.bf16.mxu1 %v6184_v49  ;;  %v1876_v40 = vld [vmem:[#allocation8 + $0x240] sm:$0xff] }
 0x236   : > { %v1880_v49 = vld [vmem:[#allocation8 + $0x260] sm:$0xff] }
 0x237   : > { %v6214_v41 = vcombine.high %v1876_v40, %v1880_v49  ;;  %v6213_v43 = vcombine.low %v1876_v40, %v1880_v49  ;;  %v1905_v40 = vld [vmem:[#allocation8 + $0x328] sm:$0xff] }
 0x238   : > { %3351 = vmatpush1.bf16.msra.mxu0 %v6181_v44  ;;  %3433 = vmatpush1.bf16.msra.mxu1 %v6183_v45  ;;  %v6215_v44 = vcombine.low %v1877_v38, %v1881_v42  ;;  %v6216_v45 = vcombine.high %v1877_v38, %v1881_v42  ;;  %v1908_v42 = vld [vmem:[#allocation8 + $0x340] sm:$0xff] }
 0x239   : > { %3352 = vmatprep.subr.bf16.mxu0 %v6190_v46  ;;  %3434 = vmatprep.subr.bf16.mxu1 %v6192_v47  ;;  %v1884_v46 = vld [vmem:[#allocation8 + $0x280] sm:$0xff] }
 0x23a   : > { %v1888_v47 = vld [vmem:[#allocation8 + $0x2a0] sm:$0xff] }
 0x23b   : > { %v6222_v48 = vcombine.high %v1884_v46, %v1888_v47  ;;  %v6221_v51 = vcombine.low %v1884_v46, %v1888_v47  ;;  %v1913_v47 = vld [vmem:[#allocation8 + $0x368] sm:$0xff] }
 0x23c   : > { %3353 = vmatpush1.bf16.msra.mxu0 %v6189_v52  ;;  %3435 = vmatpush1.bf16.msra.mxu1 %v6191_v53  ;;  %v6223_v52 = vcombine.low %v1885_v31, %v1889_v50  ;;  %v6224_v53 = vcombine.high %v1885_v31, %v1889_v50  ;;  %v1916_v31 = vld [vmem:[#allocation8 + $0x380] sm:$0xff] }
 0x23d   : > { %3354 = vmatprep.subr.bf16.mxu0 %v6198_v54  ;;  %3436 = vmatprep.subr.bf16.mxu1 %v6200_v55  ;;  %v1892_v54 = vld [vmem:[#allocation8 + $0x2c0] sm:$0xff] }
 0x23e   : > { %v1896_v55 = vld [vmem:[#allocation8 + $0x2e0] sm:$0xff] }
 0x23f   : > { %v6229_v33 = vcombine.low %v1892_v54, %v1896_v55 }
 0x240   : > { %3355 = vmatpush1.bf16.msra.mxu0 %v6197_v56  ;;  %3437 = vmatpush1.bf16.msra.mxu1 %v6199_v32  ;;  %v1893_v56 = vld [vmem:[#allocation8 + $0x2c8] sm:$0xff]  ;;  %v6230_v32 = vcombine.high %v1892_v54, %v1896_v55  ;;  %v1924_v55 = vld [vmem:[#allocation8 + $0x3c0] sm:$0xff] }
 0x241   : > { %3356 = vmatprep.subr.bf16.mxu0 %v6206_v34  ;;  %3438 = vmatprep.subr.bf16.mxu1 %v6208_v25  ;;  %v6231_v34 = vcombine.low %v1893_v56, %v1897_v30  ;;  %v6232_v35 = vcombine.high %v1893_v56, %v1897_v30  ;;  %v1921_v54 = vld [vmem:[#allocation8 + $0x3a8] sm:$0xff] }
 0x244   : > { %3357 = vmatpush1.bf16.msra.mxu0 %v6205_v36  ;;  %3439 = vmatpush1.bf16.msra.mxu1 %v6207_v39  ;;  %v1900_v36 = vld [vmem:[#allocation8 + $0x300] sm:$0xff]  ;;  %v1901_v39 = vld [vmem:[#allocation8 + $0x308] sm:$0xff] }
 0x245   : > { %3358 = vmatprep.subr.bf16.mxu0 %v6214_v41  ;;  %3440 = vmatprep.subr.bf16.mxu1 %v6216_v45  ;;  %v6238_v25 = vcombine.high %v1900_v36, %v1904_v37  ;;  %v6237_v49 = vcombine.low %v1900_v36, %v1904_v37  ;;  %v6239_v38 = vcombine.low %v1901_v39, %v1905_v40 }
 0x246   : > { %v6240_v41 = vcombine.high %v1901_v39, %v1905_v40  ;;  %v7835_v40 = vld [vmem:[#allocation8 + $0x400] sm:$0xff] }
 0x248   : > { %3359 = vmatpush1.bf16.msra.mxu0 %v6213_v43  ;;  %3441 = vmatpush1.bf16.msra.mxu1 %v6215_v44  ;;  %v1912_v43 = vld [vmem:[#allocation8 + $0x360] sm:$0xff]  ;;  %v1909_v44 = vld [vmem:[#allocation8 + $0x348] sm:$0xff] }
 0x249   : > { %3360 = vmatprep.subr.bf16.mxu0 %v6222_v48  ;;  %3442 = vmatprep.subr.bf16.mxu1 %v6224_v53  ;;  %v6245_v45 = vcombine.low %v1908_v42, %v1912_v43  ;;  %v6246_v46 = vcombine.high %v1908_v42, %v1912_v43  ;;  %v1920_v48 = vld [vmem:[#allocation8 + $0x3a0] sm:$0xff]  ;;  %v6247_v50 = vcombine.low %v1909_v44, %v1913_v47  ;;  %v1917_v53 = vld [vmem:[#allocation8 + $0x388] sm:$0xff] }
 0x24a   : > { %v6256_v56 = vcombine.high %v1917_v53, %v1921_v54  ;;  %v6253_v30 = vcombine.low %v1916_v31, %v1920_v48  ;;  %v6255_v36 = vcombine.low %v1917_v53, %v1921_v54  ;;  %v7843_v42 = vld [vmem:[#allocation8 + $0x428] sm:$0xff]  ;;  %v802_v54 = vld [vmem:[%s801_s8] sm:$0xff] }
 0x24c   : > { %3361 = vmatpush1.bf16.msra.mxu0 %v6221_v51  ;;  %3443 = vmatpush1.bf16.msra.mxu1 %v6223_v52  ;;  %v6248_v51 = vcombine.high %v1909_v44, %v1913_v47  ;;  %v6254_v52 = vcombine.high %v1916_v31, %v1920_v48 }
 0x24d   : > { %3362 = vmatprep.subr.bf16.mxu0 %v6230_v32  ;;  %3444 = vmatprep.subr.bf16.mxu1 %v6232_v35  ;;  %v1928_v32 = vld [vmem:[#allocation8 + $0x3e0] sm:$0xff] }
 0x24e   : > { %v6262_v35 = vcombine.high %v1924_v55, %v1928_v32  ;;  %v6261_v39 = vcombine.low %v1924_v55, %v1928_v32  ;;  %v804_v55 = vld [vmem:[%s801_s8 + $0x10] sm:$0xff] }
 0x250   : > { %3363 = vmatpush1.bf16.msra.mxu0 %v6229_v33  ;;  %3445 = vmatpush1.bf16.msra.mxu1 %v6231_v34  ;;  %v1925_v33 = vld [vmem:[#allocation8 + $0x3c8] sm:$0xff] }
 0x251   : > { %3364 = vmatprep.subr.bf16.mxu0 %v6238_v25  ;;  %3446 = vmatprep.subr.bf16.mxu1 %v6240_v41  ;;  %v1929_v34 = vld [vmem:[#allocation8 + $0x3e8] sm:$0xff] }
 0x252   : > { %v6264_v37 = vcombine.high %v1925_v33, %v1929_v34  ;;  %v6263_v25 = vcombine.low %v1925_v33, %v1929_v34 }
 0x254   : > { %3365 = vmatpush1.bf16.msra.mxu0 %v6237_v49  ;;  %3447 = vmatpush1.bf16.msra.mxu1 %v6239_v38  ;;  %v7837_v49 = vld [vmem:[#allocation8 + $0x420] sm:$0xff]  ;;  %v7839_v38 = vld [vmem:[#allocation8 + $0x408] sm:$0xff] }
 0x255   : > { %3366 = vmatprep.subr.bf16.mxu0 %v6246_v46  ;;  %3448 = vmatprep.subr.bf16.mxu1 %v6248_v51  ;;  %v6270_v41 = vcombine.high %v7835_v40, %v7837_v49  ;;  %v6269_v43 = vcombine.low %v7835_v40, %v7837_v49  ;;  %v6271_v44 = vcombine.low %v7839_v38, %v7843_v42 }
 0x258   : > { %3367 = vmatpush1.bf16.msra.mxu0 %v6245_v45  ;;  %3449 = vmatpush1.bf16.msra.mxu1 %v6247_v50  ;;  %v6272_v45 = vcombine.high %v7839_v38, %v7843_v42 }
 0x259   : > { %3368 = vmatprep.subr.bf16.mxu0 %v6254_v52  ;;  %3450 = vmatprep.subr.bf16.mxu1 %v6256_v56  ;;  %v803_v56 = vld [vmem:[%s801_s8 + $0x8] sm:$0xff] }
 0x25c   : > { %3369 = vmatpush1.bf16.msra.mxu0 %v6253_v30  ;;  %3451 = vmatpush1.bf16.msra.mxu1 %v6255_v36  ;;  %v805_v30 = vld [vmem:[%s801_s8 + $0x18] sm:$0xff] }
 0x25d   : > { %3370 = vmatprep.subr.bf16.mxu0 %v6262_v35  ;;  %3452 = vmatprep.subr.bf16.mxu1 %v6264_v37 }
 0x260   : > { %3371 = vmatpush1.bf16.msra.mxu0 %v6261_v39  ;;  %3453 = vmatpush1.bf16.msra.mxu1 %v6263_v25 }
 0x261   : > { %3381 = vmatprep.subr.bf16.mxu0 %v6270_v41  ;;  %3463 = vmatprep.subr.bf16.mxu1 %v6272_v45 }
 0x2b6   : > { %v1614_v46 = vpop.f32.mrb[0].mxu0  ;;  %v1655_v47 = vpop.f32.mrb[0].mxu1 }
 0x2b7   : > { %v1616_v31 = vpop.f32.mrb[1].mxu0  ;;  %v1657_v48 = vpop.f32.mrb[1].mxu1  ;;  %v1744_v32 = vadd.f32 %v1614_v46, %v802_v54  ;;  %v1746_v33 = vadd.f32 %v1655_v47, %v804_v55  ;;  %v806_v46 = vld [vmem:[%s801_s8 + $0x20] sm:$0xff]  ;;  %v808_v47 = vld [vmem:[%s801_s8 + $0x30] sm:$0xff]  ;;  %v809_v55 = vld [vmem:[%s801_s8 + $0x38] sm:$0xff] }
 0x2b8   : > { %v1618_v50 = vpop.f32.mrb[2].mxu0  ;;  %v1659_v51 = vpop.f32.mrb[2].mxu1  ;;  %v1745_v34 = vadd.f32 %v1616_v31, %v803_v56  ;;  %v1747_v35 = vadd.f32 %v1657_v48, %v805_v30  ;;  %v807_v31 = vld [vmem:[%s801_s8 + $0x28] sm:$0xff] }
 0x2b9   : > { %v1619_v52 = vpop.f32.mrb[3].mxu0  ;;  %v1660_v53 = vpop.f32.mrb[3].mxu1  ;;  %v6135_v36 = vmul.f32 -1.442695, %v1744_v32  ;;  %v6137_v37 = vmul.f32 -1.442695, %v1746_v33 }
 0x2ba   : > { %v6136_v39 = vmul.f32 -1.442695, %v1745_v34  ;;  %v6138_v25 = vmul.f32 -1.442695, %v1747_v35 }
 0x2bb   : > { %6871 = vpow2.f32 %v6135_v36 }
 0x2bc   : > { %6873 = vpow2.f32 %v6137_v37 }
 0x2bd   : > { %6875 = vpow2.f32 %v6136_v39 }
 0x2be   : > { %6877 = vpow2.f32 %v6138_v25 }
 0x2c5   : > { %v6872_v41 = vpop.eup %6871 }
 0x2c6   : > { %v6874_v45 = vpop.eup %6873  ;;  %v1770_v52 = vadd.f32 1.0, %v6872_v41 }
 0x2c7   : > { %v6876_v50 = vpop.eup %6875  ;;  %v1772_v53 = vadd.f32 1.0, %v6874_v45 }
 0x2c8   : > { %v6878_v51 = vpop.eup %6877  ;;  %v1771_v24 = vadd.f32 1.0, %v6876_v50  ;;  %6879 = vrcp.f32 %v1770_v52 }
 0x2c9   : > { %v1773_v54 = vadd.f32 1.0, %v6878_v51  ;;  %6881 = vrcp.f32 %v1772_v53 }
 0x2ca   : > { %6883 = vrcp.f32 %v1771_v24 }
 0x2cb   : > { %6885 = vrcp.f32 %v1773_v54 }
 0x2d2   : > { %v6880_v51 = vpop.eup %6879 }
 0x2d3   : > { %v6882_v52 = vpop.eup %6881 }
 0x2d4   : > { %v6884_v53 = vpop.eup %6883 }
 0x2f6   : > { %v1696_v48 = vpop.f32.mrb[4].mxu0  ;;  %v1737_v32 = vpop.f32.mrb[4].mxu1 }
 0x2f7   : > { %v1748_v56 = vadd.f32 %v1696_v48, %v806_v46  ;;  %v1698_v30 = vpop.f32.mrb[5].mxu0  ;;  %v1750_v33 = vadd.f32 %v1737_v32, %v808_v47  ;;  %v1739_v35 = vpop.f32.mrb[5].mxu1 }
 0x2f8   : > { %v1749_v34 = vadd.f32 %v1698_v30, %v807_v31  ;;  %v1700_v36 = vpop.f32.mrb[6].mxu0  ;;  %v1751_v39 = vadd.f32 %v1739_v35, %v809_v55  ;;  %v1741_v25 = vpop.f32.mrb[6].mxu1  ;;  %v1790_v31 = vmul.f32 %v7295_v62, %v6882_v52 }
 0x2f9   : > { %v6139_v37 = vmul.f32 -1.442695, %v1748_v56  ;;  %v1701_v41 = vpop.f32.mrb[7].mxu0  ;;  %6887 = vtanh.f32 %v1750_v33  ;;  %v1742_v50 = vpop.f32.mrb[7].mxu1  ;;  %v1944_v25 = vld [vmem:[#allocation8 + $0x460] sm:$0xff] }
 0x2fa   : > { %v6140_v45 = vmul.f32 -1.442695, %v1749_v34  ;;  %v6886_v46 = vpop.eup %6885  ;;  %v1941_v41 = vld [vmem:[#allocation8 + $0x448] sm:$0xff] }
 0x2fb   : > { %6889 = vpow2.f32 %v6139_v37  ;;  %v1791_v30 = vmul.f32 %v7291_v28, %v6886_v46  ;;  %v1948_v46 = vld [vmem:[#allocation8 + $0x480] sm:$0xff] }
 0x2fc   : > { %6891 = vpow2.f32 %v6140_v45  ;;  %v1945_v45 = vld [vmem:[#allocation8 + $0x468] sm:$0xff] }
 0x2fd   : > { %6893 = vtanh.f32 %v1751_v39  ;;  %v1940_v39 = vld [vmem:[#allocation8 + $0x440] sm:$0xff] }
 0x2fe   : > { %v6278_v52 = vcombine.high %v1940_v39, %v1944_v25 }
 0x303   : > { %v6888_v24 = vpop.eup %6887 }
 0x304   : > { %v1792_v48 = vmul.f32 %v6888_v24, %v6880_v51  ;;  %v1952_v24 = vld [vmem:[#allocation8 + $0x4a0] sm:$0xff] }
 0x305   : > { %v6890_v47 = vpop.eup %6889  ;;  %v6285_v40 = vcombine.low %v1948_v46, %v1952_v24 }
 0x306   : > { %v6892_v54 = vpop.eup %6891  ;;  %v1774_v56 = vadd.f32 1.0, %v6890_v47  ;;  %v7853_v62 = vadd.f32 %v1792_v48, %v1790_v31   ;;  %v1949_v47 = vld [vmem:[#allocation8 + $0x488] sm:$0xff] }
 0x307   : > { %v6894_v55 = vpop.eup %6893  ;;  %v1775_v32 = vadd.f32 1.0, %v6892_v54  ;;  %v1953_v48 = vld [vmem:[#allocation8 + $0x4a8] sm:$0xff]  ;;  %v7876_v54 = vpack.c.bf16 %v7283_v27, %v7283_v27  ;;  %v1956_v27 = vld [vmem:[#allocation8 + $0x4c0] sm:$0xff] }
 0x308   : > { %6895 = vrcp.f32 %v1774_v56  ;;  %v1793_v33 = vmul.f32 %v6894_v55, %v6884_v53  ;;  %v6280_v53 = vcombine.high %v1941_v41, %v1945_v45  ;;  %v6277_v56 = vcombine.low %v1940_v39, %v1944_v25  ;;  %v1969_v39 = vld [vmem:[#allocation8 + $0x528] sm:$0xff] }
 0x309   : > { %6897 = vtanh.f32 %v7853_v62  ;;  %v6279_v55 = vcombine.low %v1941_v41, %v1945_v45  ;;  %v6287_v49 = vcombine.low %v1949_v47, %v1953_v48 }
 0x30a   : > { %6899 = vrcp.f32 %v1775_v32  ;;  %v7857_v28 = vadd.f32 %v1793_v33, %v1791_v30   ;;  %v6286_v32 = vcombine.high %v1948_v46, %v1952_v24  ;;  %v6288_v33 = vcombine.high %v1949_v47, %v1953_v48  ;;  %v1973_v46 = vld [vmem:[#allocation8 + $0x548] sm:$0xff] }
 0x30b   : > { %v1977_v24 = vld [vmem:[#allocation8 + $0x568] sm:$0xff] }
 0x30c   : > { %6901 = vtanh.f32 %v7857_v28 }
 0x312   : > { %v6896_v34 = vpop.eup %6895 }
 0x313   : > { %v6898_v35 = vpop.eup %6897 }
 0x314   : > { %v6900_v36 = vpop.eup %6899  ;;  %v7860_v31 = vmul.f32 %v6898_v35, %v6896_v34   ;;  %v1960_v34 = vld [vmem:[#allocation8 + $0x4e0] sm:$0xff]  ;;  %v1957_v35 = vld [vmem:[#allocation8 + $0x4c8] sm:$0xff] }
 0x315   : > { %v6294_v38 = vcombine.high %v1956_v27, %v1960_v34  ;;  %v6293_v25 = vcombine.low %v1956_v27, %v1960_v34  ;;  %v1981_v27 = vld [vmem:[#allocation8 + $0x588] sm:$0xff] }
 0x316   : > { %v6902_v37 = vpop.eup %6901  ;;  %v7870_v51 = vpack.c.bf16 %v7860_v31, %v7860_v31  ;;  %v1985_v34 = vld [vmem:[#allocation8 + $0x5a8] sm:$0xff] }
 0x317   : > { %v7862_v30 = vmul.f32 %v6902_v37, %v6900_v36   ;;  %v1961_v36 = vld [vmem:[#allocation8 + $0x4e8] sm:$0xff] }
 0x318   : > { %v6296_v42 = vcombine.high %v1957_v35, %v1961_v36  ;;  %v1965_v37 = vld [vmem:[#allocation8 + $0x508] sm:$0xff]  ;;  %v6295_v41 = vcombine.low %v1957_v35, %v1961_v36  ;;  %v6311_v36 = vcombine.low %v1973_v46, %v1977_v24 }
 0x319   : > { %v7866_v50 = vpack.c.bf16 %v7862_v30, %v7862_v30  ;;  %v6303_v48 = vcombine.low %v1965_v37, %v1969_v39  ;;  %v6978_v31 = vld [vmem:[#allocation14 + $0x30] ss:$8 sps:$4 sm:$0xff] (%p8033_p0)  }
 0x31b   : > { %3372 = vmatprep.mubr.bf16.mxu0 %v7866_v50  ;;  %3454 = vmatprep.mubr.bf16.mxu1 %v7866_v50 }
 0x31c   : > { %3373 = vmatmul.mubr.bf16.vlgmr.msra.gmra.mrb[8].mxu0 %v7870_v51  ;;  %3455 = vmatmul.mubr.bf16.vlgmr.msra.gmra.mrb[8].mxu1 %v7870_v51 }
 0x31d   : > { %3382 = vmatpush1.bf16.msra.mxu0 %v6269_v43  ;;  %3464 = vmatpush1.bf16.msra.mxu1 %v6271_v44  ;;  %v1964_v43 = vld [vmem:[#allocation8 + $0x500] sm:$0xff] }
 0x31e   : > { %3383 = vmatprep.subr.bf16.mxu0 %v6278_v52  ;;  %3465 = vmatprep.subr.bf16.mxu1 %v6280_v53  ;;  %v1968_v44 = vld [vmem:[#allocation8 + $0x520] sm:$0xff]  ;;  %v6304_v52 = vcombine.high %v1965_v37, %v1969_v39  ;;  %v6319_v39 = vcombine.low %v1981_v27, %v1985_v34 }
 0x31f   : > { %3413 = vmatprep.mubr.bf16.mxu0 %v7876_v54  ;;  %3495 = vmatprep.mubr.bf16.mxu1 %v7876_v54  ;;  %v6302_v45 = vcombine.high %v1964_v43, %v1968_v44  ;;  %v1972_v53 = vld [vmem:[#allocation8 + $0x540] sm:$0xff]  ;;  %v6301_v47 = vcombine.low %v1964_v43, %v1968_v44  ;;  %v1989_v43 = vld [vmem:[#allocation8 + $0x5c8] sm:$0xff] }
 0x320   : > { %v1993_v44 = vld [vmem:[#allocation8 + $0x5e8] sm:$0xff] }
 0x321   : > { %3384 = vmatpush1.bf16.msra.mxu0 %v6277_v56  ;;  %3466 = vmatpush1.bf16.msra.mxu1 %v6279_v55  ;;  %v1976_v56 = vld [vmem:[#allocation8 + $0x560] sm:$0xff] }
 0x322   : > { %3385 = vmatprep.subr.bf16.mxu0 %v6286_v32  ;;  %3467 = vmatprep.subr.bf16.mxu1 %v6288_v33  ;;  %v6310_v55 = vcombine.high %v1972_v53, %v1976_v56  ;;  %v6312_v32 = vcombine.high %v1973_v46, %v1977_v24  ;;  %v1980_v33 = vld [vmem:[#allocation8 + $0x580] sm:$0xff]  ;;  %v6309_v35 = vcombine.low %v1972_v53, %v1976_v56  ;;  %v1997_v53 = vld [vmem:[#allocation8 + $0x608] sm:$0xff] }
 0x323   : > { %v2001_v56 = vld [vmem:[#allocation8 + $0x628] sm:$0xff]  ;;  %v6327_v24 = vcombine.low %v1989_v43, %v1993_v44 }
 0x325   : > { %3386 = vmatpush1.bf16.msra.mxu0 %v6285_v40  ;;  %3468 = vmatpush1.bf16.msra.mxu1 %v6287_v49  ;;  %v1984_v40 = vld [vmem:[#allocation8 + $0x5a0] sm:$0xff] }
 0x326   : > { %3387 = vmatprep.subr.bf16.mxu0 %v6294_v38  ;;  %3469 = vmatprep.subr.bf16.mxu1 %v6296_v42  ;;  %v6318_v49 = vcombine.high %v1980_v33, %v1984_v40  ;;  %v6320_v38 = vcombine.high %v1981_v27, %v1985_v34  ;;  %v1988_v42 = vld [vmem:[#allocation8 + $0x5c0] sm:$0xff]  ;;  %v6317_v37 = vcombine.low %v1980_v33, %v1984_v40  ;;  %v2005_v33 = vld [vmem:[#allocation8 + $0x648] sm:$0xff] }
 0x327   : > { %v2009_v40 = vld [vmem:[#allocation8 + $0x668] sm:$0xff]  ;;  %v6335_v34 = vcombine.low %v1997_v53, %v2001_v56 }
 0x329   : > { %3388 = vmatpush1.bf16.msra.mxu0 %v6293_v25  ;;  %3470 = vmatpush1.bf16.msra.mxu1 %v6295_v41  ;;  %v1992_v25 = vld [vmem:[#allocation8 + $0x5e0] sm:$0xff] }
 0x32a   : > { %3389 = vmatprep.subr.bf16.mxu0 %v6302_v45  ;;  %3471 = vmatprep.subr.bf16.mxu1 %v6304_v52  ;;  %v6326_v41 = vcombine.high %v1988_v42, %v1992_v25  ;;  %v6328_v45 = vcombine.high %v1989_v43, %v1993_v44  ;;  %v1996_v52 = vld [vmem:[#allocation8 + $0x600] sm:$0xff]  ;;  %v6325_v46 = vcombine.low %v1988_v42, %v1992_v25  ;;  %v2013_v42 = vld [vmem:[#allocation8 + $0x688] sm:$0xff] }
 0x32b   : > { %v2017_v25 = vld [vmem:[#allocation8 + $0x6a8] sm:$0xff]  ;;  %v6343_v44 = vcombine.low %v2005_v33, %v2009_v40 }
 0x32d   : > { %3390 = vmatpush1.bf16.msra.mxu0 %v6301_v47  ;;  %3472 = vmatpush1.bf16.msra.mxu1 %v6303_v48  ;;  %v2000_v47 = vld [vmem:[#allocation8 + $0x620] sm:$0xff] }
 0x32e   : > { %3391 = vmatprep.subr.bf16.mxu0 %v6310_v55  ;;  %3473 = vmatprep.subr.bf16.mxu1 %v6312_v32  ;;  %v6334_v48 = vcombine.high %v1996_v52, %v2000_v47  ;;  %v6336_v55 = vcombine.high %v1997_v53, %v2001_v56  ;;  %v2004_v32 = vld [vmem:[#allocation8 + $0x640] sm:$0xff]  ;;  %v6333_v27 = vcombine.low %v1996_v52, %v2000_v47  ;;  %v2021_v52 = vld [vmem:[#allocation8 + $0x6c8] sm:$0xff] }
 0x32f   : > { %v2025_v47 = vld [vmem:[#allocation8 + $0x6e8] sm:$0xff]  ;;  %v6351_v56 = vcombine.low %v2013_v42, %v2017_v25 }
 0x331   : > { %3392 = vmatpush1.bf16.msra.mxu0 %v6309_v35  ;;  %3474 = vmatpush1.bf16.msra.mxu1 %v6311_v36  ;;  %v2008_v35 = vld [vmem:[#allocation8 + $0x660] sm:$0xff] }
 0x332   : > { %3393 = vmatprep.subr.bf16.mxu0 %v6318_v49  ;;  %3475 = vmatprep.subr.bf16.mxu1 %v6320_v38  ;;  %v6342_v36 = vcombine.high %v2004_v32, %v2008_v35  ;;  %v6344_v49 = vcombine.high %v2005_v33, %v2009_v40  ;;  %v2012_v38 = vld [vmem:[#allocation8 + $0x680] sm:$0xff]  ;;  %v6341_v43 = vcombine.low %v2004_v32, %v2008_v35  ;;  %v2029_v32 = vld [vmem:[#allocation8 + $0x708] sm:$0xff] }
 0x333   : > { %v2033_v35 = vld [vmem:[#allocation8 + $0x728] sm:$0xff]  ;;  %v6359_v40 = vcombine.low %v2021_v52, %v2025_v47 }
 0x335   : > { %3394 = vmatpush1.bf16.msra.mxu0 %v6317_v37  ;;  %3476 = vmatpush1.bf16.msra.mxu1 %v6319_v39  ;;  %v2016_v37 = vld [vmem:[#allocation8 + $0x6a0] sm:$0xff] }
 0x336   : > { %3395 = vmatprep.subr.bf16.mxu0 %v6326_v41  ;;  %3477 = vmatprep.subr.bf16.mxu1 %v6328_v45  ;;  %v6350_v39 = vcombine.high %v2012_v38, %v2016_v37  ;;  %v6352_v41 = vcombine.high %v2013_v42, %v2017_v25  ;;  %v2020_v45 = vld [vmem:[#allocation8 + $0x6c0] sm:$0xff]  ;;  %v6349_v53 = vcombine.low %v2012_v38, %v2016_v37  ;;  %v2037_v38 = vld [vmem:[#allocation8 + $0x748] sm:$0xff] }
 0x337   : > { %v2041_v37 = vld [vmem:[#allocation8 + $0x768] sm:$0xff]  ;;  %v6367_v25 = vcombine.low %v2029_v32, %v2033_v35 }
 0x339   : > { %3396 = vmatpush1.bf16.msra.mxu0 %v6325_v46  ;;  %3478 = vmatpush1.bf16.msra.mxu1 %v6327_v24  ;;  %v2024_v46 = vld [vmem:[#allocation8 + $0x6e0] sm:$0xff] }
 0x33a   : > { %3397 = vmatprep.subr.bf16.mxu0 %v6334_v48  ;;  %3479 = vmatprep.subr.bf16.mxu1 %v6336_v55  ;;  %v6358_v24 = vcombine.high %v2020_v45, %v2024_v46  ;;  %v6360_v48 = vcombine.high %v2021_v52, %v2025_v47  ;;  %v2028_v55 = vld [vmem:[#allocation8 + $0x700] sm:$0xff]  ;;  %v6357_v33 = vcombine.low %v2020_v45, %v2024_v46  ;;  %v2045_v45 = vld [vmem:[#allocation8 + $0x788] sm:$0xff] }
 0x33b   : > { %v2049_v46 = vld [vmem:[#allocation8 + $0x7a8] sm:$0xff]  ;;  %v6375_v47 = vcombine.low %v2037_v38, %v2041_v37 }
 0x33d   : > { %3398 = vmatpush1.bf16.msra.mxu0 %v6333_v27  ;;  %3480 = vmatpush1.bf16.msra.mxu1 %v6335_v34  ;;  %v2032_v27 = vld [vmem:[#allocation8 + $0x720] sm:$0xff] }
 0x33e   : > { %3399 = vmatprep.subr.bf16.mxu0 %v6342_v36  ;;  %3481 = vmatprep.subr.bf16.mxu1 %v6344_v49  ;;  %v6366_v34 = vcombine.high %v2028_v55, %v2032_v27  ;;  %v6368_v36 = vcombine.high %v2029_v32, %v2033_v35  ;;  %v2036_v49 = vld [vmem:[#allocation8 + $0x740] sm:$0xff]  ;;  %v6365_v42 = vcombine.low %v2028_v55, %v2032_v27  ;;  %v2053_v55 = vld [vmem:[#allocation8 + $0x7c8] sm:$0xff] }
 0x33f   : > { %v2057_v27 = vld [vmem:[#allocation8 + $0x7e8] sm:$0xff]  ;;  %v6383_v35 = vcombine.low %v2045_v45, %v2049_v46 }
 0x341   : > { %3400 = vmatpush1.bf16.msra.mxu0 %v6341_v43  ;;  %3482 = vmatpush1.bf16.msra.mxu1 %v6343_v44  ;;  %v2040_v43 = vld [vmem:[#allocation8 + $0x760] sm:$0xff] }
 0x342   : > { %3401 = vmatprep.subr.bf16.mxu0 %v6350_v39  ;;  %3483 = vmatprep.subr.bf16.mxu1 %v6352_v41  ;;  %v6374_v44 = vcombine.high %v2036_v49, %v2040_v43  ;;  %v6376_v39 = vcombine.high %v2037_v38, %v2041_v37  ;;  %v2044_v41 = vld [vmem:[#allocation8 + $0x780] sm:$0xff]  ;;  %v6373_v52 = vcombine.low %v2036_v49, %v2040_v43  ;;  %v1807_v49 = vld [vmem:[#allocation8 + $0x18] sm:$0xff] }
 0x343   : > { %v1811_v43 = vld [vmem:[#allocation8 + $0x38] sm:$0xff]  ;;  %v6391_v37 = vcombine.low %v2053_v55, %v2057_v27 }
 0x345   : > { %3402 = vmatpush1.bf16.msra.mxu0 %v6349_v53  ;;  %3484 = vmatpush1.bf16.msra.mxu1 %v6351_v56  ;;  %v2048_v53 = vld [vmem:[#allocation8 + $0x7a0] sm:$0xff] }
 0x346   : > { %3403 = vmatprep.subr.bf16.mxu0 %v6358_v24  ;;  %3485 = vmatprep.subr.bf16.mxu1 %v6360_v48  ;;  %v6382_v56 = vcombine.high %v2044_v41, %v2048_v53  ;;  %v6384_v24 = vcombine.high %v2045_v45, %v2049_v46  ;;  %v2052_v48 = vld [vmem:[#allocation8 + $0x7c0] sm:$0xff]  ;;  %v6381_v32 = vcombine.low %v2044_v41, %v2048_v53  ;;  %v1818_v53 = vld [vmem:[#allocation8 + $0x70] sm:$0xff]  ;;  %v1815_v45 = vld [vmem:[#allocation8 + $0x58] sm:$0xff] }
 0x347   : > { %v7890_v41 = vpack.c.bf16 %v7287_v29, %v7287_v29  ;;  %v1819_v46 = vld [vmem:[#allocation8 + $0x78] sm:$0xff] }
 0x348   : > { %v1827_v29 = vld [vmem:[#allocation8 + $0xb8] sm:$0xff] }
 0x349   : > { %3404 = vmatpush1.bf16.msra.mxu0 %v6357_v33  ;;  %3486 = vmatpush1.bf16.msra.mxu1 %v6359_v40  ;;  %v2056_v33 = vld [vmem:[#allocation8 + $0x7e0] sm:$0xff] }
 0x34a   : > { %3405 = vmatprep.subr.bf16.mxu0 %v6366_v34  ;;  %3487 = vmatprep.subr.bf16.mxu1 %v6368_v36  ;;  %v6390_v40 = vcombine.high %v2052_v48, %v2056_v33  ;;  %v6392_v34 = vcombine.high %v2053_v55, %v2057_v27  ;;  %v1806_v36 = vld [vmem:[#allocation8 + $0x10] sm:$0xff]  ;;  %v6389_v38 = vcombine.low %v2052_v48, %v2056_v33  ;;  %v1823_v55 = vld [vmem:[#allocation8 + $0x98] sm:$0xff] }
 0x34b   : > { %v1822_v48 = vld [vmem:[#allocation8 + $0x90] sm:$0xff] }
 0x34c   : > { %v1826_v33 = vld [vmem:[#allocation8 + $0xb0] sm:$0xff] }
 0x34d   : > { %3406 = vmatpush1.bf16.msra.mxu0 %v6365_v42  ;;  %3488 = vmatpush1.bf16.msra.mxu1 %v6367_v25  ;;  %v1810_v42 = vld [vmem:[#allocation8 + $0x30] sm:$0xff] }
 0x34e   : > { %3407 = vmatprep.subr.bf16.mxu0 %v6374_v44  ;;  %3489 = vmatprep.subr.bf16.mxu1 %v6376_v39  ;;  %v6146_v25 = vcombine.high %v1806_v36, %v1810_v42  ;;  %v6148_v44 = vcombine.high %v1807_v49, %v1811_v43  ;;  %v1814_v39 = vld [vmem:[#allocation8 + $0x50] sm:$0xff] }
 0x34f   : > { %v6153_v27 = vcombine.low %v1814_v39, %v1818_v53 }
 0x351   : > { %3408 = vmatpush1.bf16.msra.mxu0 %v6373_v52  ;;  %3490 = vmatpush1.bf16.msra.mxu1 %v6375_v47  ;;  %v6145_v52 = vcombine.low %v1806_v36, %v1810_v42  ;;  %v6147_v47 = vcombine.low %v1807_v49, %v1811_v43  ;;  %v1834_v36 = vld [vmem:[#allocation8 + $0xf0] sm:$0xff]  ;;  %v1831_v42 = vld [vmem:[#allocation8 + $0xd8] sm:$0xff]  ;;  %v6161_v43 = vcombine.low %v1822_v48, %v1826_v33 }
 0x352   : > { %3409 = vmatprep.subr.bf16.mxu0 %v6382_v56  ;;  %3491 = vmatprep.subr.bf16.mxu1 %v6384_v24  ;;  %v6154_v56 = vcombine.high %v1814_v39, %v1818_v53  ;;  %v6156_v24 = vcombine.high %v1815_v45, %v1819_v46  ;;  %v1835_v49 = vld [vmem:[#allocation8 + $0xf8] sm:$0xff]  ;;  %v1842_v39 = vld [vmem:[#allocation8 + $0x130] sm:$0xff] }
 0x353   : > { %v1843_v53 = vld [vmem:[#allocation8 + $0x138] sm:$0xff] }
 0x355   : > { %3410 = vmatpush1.bf16.msra.mxu0 %v6381_v32  ;;  %3492 = vmatpush1.bf16.msra.mxu1 %v6383_v35  ;;  %v6155_v32 = vcombine.low %v1815_v45, %v1819_v46  ;;  %v6162_v35 = vcombine.high %v1822_v48, %v1826_v33  ;;  %v6171_v46 = vcombine.low %v1831_v42, %v1835_v49  ;;  %v1847_v48 = vld [vmem:[#allocation8 + $0x158] sm:$0xff] }
 0x356   : > { %3411 = vmatprep.subr.bf16.mxu0 %v6390_v40  ;;  %3493 = vmatprep.subr.bf16.mxu1 %v6392_v34  ;;  %v6164_v40 = vcombine.high %v1823_v55, %v1827_v29  ;;  %v1830_v34 = vld [vmem:[#allocation8 + $0xd0] sm:$0xff]  ;;  %v1851_v33 = vld [vmem:[#allocation8 + $0x178] sm:$0xff] }
 0x357   : > { %v6169_v45 = vcombine.low %v1830_v34, %v1834_v36 }
 0x359   : > { %3412 = vmatpush1.bf16.msra.mxu0 %v6389_v38  ;;  %3494 = vmatpush1.bf16.msra.mxu1 %v6391_v37  ;;  %v6163_v38 = vcombine.low %v1823_v55, %v1827_v29  ;;  %v6170_v37 = vcombine.high %v1830_v34, %v1834_v36  ;;  %v1855_v34 = vld [vmem:[#allocation8 + $0x198] sm:$0xff] }
 0x35a   : > { %3504 = vmatprep.subr.bf16.mxu0 %v6146_v25  ;;  %3586 = vmatprep.subr.bf16.mxu1 %v6148_v44  ;;  %v6172_v25 = vcombine.high %v1831_v42, %v1835_v49  ;;  %v1838_v44 = vld [vmem:[#allocation8 + $0x110] sm:$0xff]  ;;  %v1859_v36 = vld [vmem:[#allocation8 + $0x1b8] sm:$0xff]  ;;  %v6187_v49 = vcombine.low %v1847_v48, %v1851_v33 }
 0x35b   : > { %v6177_v55 = vcombine.low %v1838_v44, %v1842_v39 }
 0x35c   : > { %3414 = vmatmul.mubr.bf16.vlgmr.msra.gmra.mrb[8].mxu0 %v7890_v41  ;;  %3496 = vmatmul.mubr.bf16.vlgmr.msra.gmra.mrb[8].mxu1 %v7890_v41 }
 0x35d   : > { %3505 = vmatpush1.bf16.msra.mxu0 %v6145_v52  ;;  %3536 = vmatprep.mubr.bf16.mxu0 %v7866_v50  ;;  %v6178_v52 = vcombine.high %v1838_v44, %v1842_v39  ;;  %v1863_v44 = vld [vmem:[#allocation8 + $0x1d8] sm:$0xff] }
 0x35e   : > { %3587 = vmatpush1.bf16.msra.mxu1 %v6147_v47  ;;  %3618 = vmatprep.mubr.bf16.mxu1 %v7866_v50  ;;  %v1839_v50 = vld [vmem:[#allocation8 + $0x118] sm:$0xff] }
 0x35f   : > { %3506 = vmatprep.subr.bf16.mxu0 %v6154_v56  ;;  %3588 = vmatprep.subr.bf16.mxu1 %v6156_v24  ;;  %v6180_v47 = vcombine.high %v1839_v50, %v1843_v53  ;;  %v1846_v56 = vld [vmem:[#allocation8 + $0x150] sm:$0xff]  ;;  %v6179_v29 = vcombine.low %v1839_v50, %v1843_v53  ;;  %v1867_v39 = vld [vmem:[#allocation8 + $0x1f8] sm:$0xff]  ;;  %v6195_v53 = vcombine.low %v1855_v34, %v1859_v36 }
 0x360   : > { %v1850_v24 = vld [vmem:[#allocation8 + $0x170] sm:$0xff] }
 0x361   : > { %3507 = vmatpush1.bf16.msra.mxu0 %v6153_v27  ;;  %v6186_v27 = vcombine.high %v1846_v56, %v1850_v24  ;;  %v6185_v42 = vcombine.low %v1846_v56, %v1850_v24  ;;  %v1871_v56 = vld [vmem:[#allocation8 + $0x218] sm:$0xff] }
 0x362   : > { %3589 = vmatpush1.bf16.msra.mxu1 %v6155_v32  ;;  %3508 = vmatprep.subr.bf16.mxu0 %v6162_v35  ;;  %v6188_v32 = vcombine.high %v1847_v48, %v1851_v33  ;;  %v1854_v35 = vld [vmem:[#allocation8 + $0x190] sm:$0xff]  ;;  %v1875_v24 = vld [vmem:[#allocation8 + $0x238] sm:$0xff]  ;;  %v6203_v33 = vcombine.low %v1863_v44, %v1867_v39 }
 0x363   : > { %3590 = vmatprep.subr.bf16.mxu1 %v6164_v40  ;;  %v1858_v40 = vld [vmem:[#allocation8 + $0x1b0] sm:$0xff] }
 0x364   : > { %v6193_v50 = vcombine.low %v1854_v35, %v1858_v40 }
 0x365   : > { %3509 = vmatpush1.bf16.msra.mxu0 %v6161_v43  ;;  %v6194_v43 = vcombine.high %v1854_v35, %v1858_v40  ;;  %v1879_v35 = vld [vmem:[#allocation8 + $0x258] sm:$0xff] }
 0x366   : > { %3591 = vmatpush1.bf16.msra.mxu1 %v6163_v38  ;;  %3510 = vmatprep.subr.bf16.mxu0 %v6170_v37  ;;  %v6196_v38 = vcombine.high %v1855_v34, %v1859_v36  ;;  %v1862_v37 = vld [vmem:[#allocation8 + $0x1d0] sm:$0xff]  ;;  %v1883_v40 = vld [vmem:[#allocation8 + $0x278] sm:$0xff]  ;;  %v6211_v36 = vcombine.low %v1871_v56, %v1875_v24 }
 0x367   : > { %3592 = vmatprep.subr.bf16.mxu1 %v6172_v25  ;;  %v1866_v25 = vld [vmem:[#allocation8 + $0x1f0] sm:$0xff] }
 0x368   : > { %v6201_v48 = vcombine.low %v1862_v37, %v1866_v25 }
 0x369   : > { %3511 = vmatpush1.bf16.msra.mxu0 %v6169_v45  ;;  %v6202_v45 = vcombine.high %v1862_v37, %v1866_v25  ;;  %v1887_v37 = vld [vmem:[#allocation8 + $0x298] sm:$0xff] }
 0x36a   : > { %3593 = vmatpush1.bf16.msra.mxu1 %v6171_v46  ;;  %3512 = vmatprep.subr.bf16.mxu0 %v6178_v52  ;;  %v6204_v46 = vcombine.high %v1863_v44, %v1867_v39  ;;  %v1870_v52 = vld [vmem:[#allocation8 + $0x210] sm:$0xff]  ;;  %v1891_v25 = vld [vmem:[#allocation8 + $0x2b8] sm:$0xff]  ;;  %v6219_v39 = vcombine.low %v1879_v35, %v1883_v40 }
 0x36b   : > { %3594 = vmatprep.subr.bf16.mxu1 %v6180_v47  ;;  %v1874_v47 = vld [vmem:[#allocation8 + $0x230] sm:$0xff] }
 0x36c   : > { %v6209_v34 = vcombine.low %v1870_v52, %v1874_v47 }
 0x36d   : > { %3513 = vmatpush1.bf16.msra.mxu0 %v6177_v55  ;;  %v6210_v55 = vcombine.high %v1870_v52, %v1874_v47  ;;  %v1895_v52 = vld [vmem:[#allocation8 + $0x2d8] sm:$0xff] }
 0x36e   : > { %3595 = vmatpush1.bf16.msra.mxu1 %v6179_v29  ;;  %3514 = vmatprep.subr.bf16.mxu0 %v6186_v27  ;;  %v6212_v29 = vcombine.high %v1871_v56, %v1875_v24  ;;  %v1878_v27 = vld [vmem:[#allocation8 + $0x250] sm:$0xff]  ;;  %v1899_v47 = vld [vmem:[#allocation8 + $0x2f8] sm:$0xff]  ;;  %v6227_v24 = vcombine.low %v1887_v37, %v1891_v25 }
 0x36f   : > { %3596 = vmatprep.subr.bf16.mxu1 %v6188_v32  ;;  %v1882_v32 = vld [vmem:[#allocation8 + $0x270] sm:$0xff] }
 0x370   : > { %v6217_v44 = vcombine.low %v1878_v27, %v1882_v32 }
 0x371   : > { %3515 = vmatpush1.bf16.msra.mxu0 %v6185_v42  ;;  %v6218_v42 = vcombine.high %v1878_v27, %v1882_v32  ;;  %v1903_v27 = vld [vmem:[#allocation8 + $0x318] sm:$0xff] }
 0x372   : > { %3597 = vmatpush1.bf16.msra.mxu1 %v6187_v49  ;;  %3516 = vmatprep.subr.bf16.mxu0 %v6194_v43  ;;  %v6220_v49 = vcombine.high %v1879_v35, %v1883_v40  ;;  %v1886_v43 = vld [vmem:[#allocation8 + $0x290] sm:$0xff]  ;;  %v1907_v32 = vld [vmem:[#allocation8 + $0x338] sm:$0xff]  ;;  %v6235_v40 = vcombine.low %v1895_v52, %v1899_v47 }
 0x373   : > { %3598 = vmatprep.subr.bf16.mxu1 %v6196_v38  ;;  %v1890_v38 = vld [vmem:[#allocation8 + $0x2b0] sm:$0xff] }
 0x374   : > { %v6225_v56 = vcombine.low %v1886_v43, %v1890_v38 }
 0x375   : > { %3517 = vmatpush1.bf16.msra.mxu0 %v6193_v50  ;;  %v6226_v50 = vcombine.high %v1886_v43, %v1890_v38  ;;  %v1911_v43 = vld [vmem:[#allocation8 + $0x358] sm:$0xff] }
 0x376   : > { %3599 = vmatpush1.bf16.msra.mxu1 %v6195_v53  ;;  %3518 = vmatprep.subr.bf16.mxu0 %v6202_v45  ;;  %v6228_v53 = vcombine.high %v1887_v37, %v1891_v25  ;;  %v1894_v45 = vld [vmem:[#allocation8 + $0x2d0] sm:$0xff]  ;;  %v1915_v38 = vld [vmem:[#allocation8 + $0x378] sm:$0xff]  ;;  %v6243_v25 = vcombine.low %v1903_v27, %v1907_v32 }
 0x377   : > { %3600 = vmatprep.subr.bf16.mxu1 %v6204_v46  ;;  %v1898_v46 = vld [vmem:[#allocation8 + $0x2f0] sm:$0xff] }
 0x378   : > { %v6233_v35 = vcombine.low %v1894_v45, %v1898_v46 }
 0x379   : > { %3519 = vmatpush1.bf16.msra.mxu0 %v6201_v48  ;;  %v6234_v48 = vcombine.high %v1894_v45, %v1898_v46  ;;  %v1919_v45 = vld [vmem:[#allocation8 + $0x398] sm:$0xff] }
 0x37a   : > { %3601 = vmatpush1.bf16.msra.mxu1 %v6203_v33  ;;  %3520 = vmatprep.subr.bf16.mxu0 %v6210_v55  ;;  %v6236_v33 = vcombine.high %v1895_v52, %v1899_v47  ;;  %v1902_v55 = vld [vmem:[#allocation8 + $0x310] sm:$0xff]  ;;  %v1923_v46 = vld [vmem:[#allocation8 + $0x3b8] sm:$0xff]  ;;  %v6251_v47 = vcombine.low %v1911_v43, %v1915_v38 }
 0x37b   : > { %3602 = vmatprep.subr.bf16.mxu1 %v6212_v29  ;;  %v1906_v29 = vld [vmem:[#allocation8 + $0x330] sm:$0xff] }
 0x37c   : > { %v6241_v37 = vcombine.low %v1902_v55, %v1906_v29 }
 0x37d   : > { %3521 = vmatpush1.bf16.msra.mxu0 %v6209_v34  ;;  %v6242_v34 = vcombine.high %v1902_v55, %v1906_v29  ;;  %v1927_v55 = vld [vmem:[#allocation8 + $0x3d8] sm:$0xff] }
 0x37e   : > { %3603 = vmatpush1.bf16.msra.mxu1 %v6211_v36  ;;  %3522 = vmatprep.subr.bf16.mxu0 %v6218_v42  ;;  %v6244_v36 = vcombine.high %v1903_v27, %v1907_v32  ;;  %v1910_v42 = vld [vmem:[#allocation8 + $0x350] sm:$0xff]  ;;  %v1931_v29 = vld [vmem:[#allocation8 + $0x3f8] sm:$0xff]  ;;  %v6259_v32 = vcombine.low %v1919_v45, %v1923_v46 }
 0x37f   : > { %3604 = vmatprep.subr.bf16.mxu1 %v6220_v49  ;;  %v1914_v49 = vld [vmem:[#allocation8 + $0x370] sm:$0xff] }
 0x380   : > { %v6249_v52 = vcombine.low %v1910_v42, %v1914_v49 }
 0x381   : > { %3523 = vmatpush1.bf16.msra.mxu0 %v6217_v44  ;;  %v6250_v44 = vcombine.high %v1910_v42, %v1914_v49  ;;  %v1935_v42 = vld [vmem:[#allocation8 + $0x418] sm:$0xff] }
 0x382   : > { %3605 = vmatpush1.bf16.msra.mxu1 %v6219_v39  ;;  %3524 = vmatprep.subr.bf16.mxu0 %v6226_v50  ;;  %v6252_v39 = vcombine.high %v1911_v43, %v1915_v38  ;;  %v1918_v50 = vld [vmem:[#allocation8 + $0x390] sm:$0xff]  ;;  %v1939_v49 = vld [vmem:[#allocation8 + $0x438] sm:$0xff]  ;;  %v6267_v38 = vcombine.low %v1927_v55, %v1931_v29 }
 0x383   : > { %3606 = vmatprep.subr.bf16.mxu1 %v6228_v53  ;;  %v1922_v53 = vld [vmem:[#allocation8 + $0x3b0] sm:$0xff] }
 0x384   : > { %v6257_v27 = vcombine.low %v1918_v50, %v1922_v53 }
 0x385   : > { %3525 = vmatpush1.bf16.msra.mxu0 %v6225_v56  ;;  %v6258_v56 = vcombine.high %v1918_v50, %v1922_v53  ;;  %v1943_v50 = vld [vmem:[#allocation8 + $0x458] sm:$0xff] }
 0x386   : > { %3607 = vmatpush1.bf16.msra.mxu1 %v6227_v24  ;;  %3526 = vmatprep.subr.bf16.mxu0 %v6234_v48  ;;  %v6260_v24 = vcombine.high %v1919_v45, %v1923_v46  ;;  %v1926_v48 = vld [vmem:[#allocation8 + $0x3d0] sm:$0xff]  ;;  %v1947_v53 = vld [vmem:[#allocation8 + $0x478] sm:$0xff]  ;;  %v6275_v46 = vcombine.low %v1935_v42, %v1939_v49 }
 0x387   : > { %3608 = vmatprep.subr.bf16.mxu1 %v6236_v33  ;;  %v1930_v33 = vld [vmem:[#allocation8 + $0x3f0] sm:$0xff] }
 0x388   : > { %v6265_v43 = vcombine.low %v1926_v48, %v1930_v33 }
 0x389   : > { %3527 = vmatpush1.bf16.msra.mxu0 %v6233_v35  ;;  %v6266_v35 = vcombine.high %v1926_v48, %v1930_v33  ;;  %v1951_v48 = vld [vmem:[#allocation8 + $0x498] sm:$0xff] }
 0x38a   : > { %3609 = vmatpush1.bf16.msra.mxu1 %v6235_v40  ;;  %3528 = vmatprep.subr.bf16.mxu0 %v6242_v34  ;;  %v6268_v40 = vcombine.high %v1927_v55, %v1931_v29  ;;  %v1934_v34 = vld [vmem:[#allocation8 + $0x410] sm:$0xff]  ;;  %v1955_v33 = vld [vmem:[#allocation8 + $0x4b8] sm:$0xff]  ;;  %v6283_v29 = vcombine.low %v1943_v50, %v1947_v53 }
 0x38b   : > { %3610 = vmatprep.subr.bf16.mxu1 %v6244_v36  ;;  %v1938_v36 = vld [vmem:[#allocation8 + $0x430] sm:$0xff] }
 0x38c   : > { %v6273_v45 = vcombine.low %v1934_v34, %v1938_v36 }
 0x38d   : > { %3529 = vmatpush1.bf16.msra.mxu0 %v6241_v37  ;;  %v6274_v37 = vcombine.high %v1934_v34, %v1938_v36  ;;  %v1959_v34 = vld [vmem:[#allocation8 + $0x4d8] sm:$0xff] }
 0x38e   : > { %3611 = vmatpush1.bf16.msra.mxu1 %v6243_v25  ;;  %3530 = vmatprep.subr.bf16.mxu0 %v6250_v44  ;;  %v6276_v25 = vcombine.high %v1935_v42, %v1939_v49  ;;  %v1942_v44 = vld [vmem:[#allocation8 + $0x450] sm:$0xff]  ;;  %v1963_v36 = vld [vmem:[#allocation8 + $0x4f8] sm:$0xff] }
 0x38f   : > { %3612 = vmatprep.subr.bf16.mxu1 %v6252_v39  ;;  %v1946_v39 = vld [vmem:[#allocation8 + $0x470] sm:$0xff] }
 0x390   : > { %v6281_v55 = vcombine.low %v1942_v44, %v1946_v39 }
 0x391   : > { %3531 = vmatpush1.bf16.msra.mxu0 %v6249_v52  ;;  %v6282_v52 = vcombine.high %v1942_v44, %v1946_v39  ;;  %v1971_v44 = vld [vmem:[#allocation8 + $0x538] sm:$0xff] }
 0x392   : > { %3613 = vmatpush1.bf16.msra.mxu1 %v6251_v47  ;;  %3532 = vmatprep.subr.bf16.mxu0 %v6258_v56  ;;  %v6284_v47 = vcombine.high %v1943_v50, %v1947_v53  ;;  %v1950_v56 = vld [vmem:[#allocation8 + $0x490] sm:$0xff]  ;;  %v6299_v50 = vcombine.low %v1959_v34, %v1963_v36 }
 0x393   : > { %3614 = vmatprep.subr.bf16.mxu1 %v6260_v24  ;;  %v1954_v24 = vld [vmem:[#allocation8 + $0x4b0] sm:$0xff] }
 0x394   : > { %v6289_v42 = vcombine.low %v1950_v56, %v1954_v24 }
 0x395   : > { %3533 = vmatpush1.bf16.msra.mxu0 %v6257_v27  ;;  %v6290_v27 = vcombine.high %v1950_v56, %v1954_v24 }
 0x396   : > { %3615 = vmatpush1.bf16.msra.mxu1 %v6259_v32  ;;  %3534 = vmatprep.subr.bf16.mxu0 %v6266_v35  ;;  %v6292_v32 = vcombine.high %v1951_v48, %v1955_v33  ;;  %v1958_v35 = vld [vmem:[#allocation8 + $0x4d0] sm:$0xff] }
 0x397   : > { %3616 = vmatprep.subr.bf16.mxu1 %v6268_v40  ;;  %v1962_v40 = vld [vmem:[#allocation8 + $0x4f0] sm:$0xff] }
 0x398   : > { %v6298_v49 = vcombine.high %v1958_v35, %v1962_v40  ;;  %v6297_v39 = vcombine.low %v1958_v35, %v1962_v40 }
 0x399   : > { %3535 = vmatpush1.bf16.msra.mxu0 %v6265_v43  ;;  %v6300_v43 = vcombine.high %v1959_v34, %v1963_v36 }
 0x39a   : > { %3617 = vmatpush1.bf16.msra.mxu1 %v6267_v38  ;;  %3545 = vmatprep.subr.bf16.mxu0 %v6274_v37  ;;  %v1966_v38 = vld [vmem:[#allocation8 + $0x510] sm:$0xff] }
 0x39b   : > { %3627 = vmatprep.subr.bf16.mxu1 %v6276_v25  ;;  %v1970_v37 = vld [vmem:[#allocation8 + $0x530] sm:$0xff]  ;;  %v1967_v25 = vld [vmem:[#allocation8 + $0x518] sm:$0xff] }
 0x39c   : > { %3537 = vmatmul.mubr.bf16.vlgmr.msra.gmra.mrb[12].mxu0 %v7870_v51  ;;  %v6306_v53 = vcombine.high %v1966_v38, %v1970_v37  ;;  %v6305_v56 = vcombine.low %v1966_v38, %v1970_v37  ;;  %v6307_v24 = vcombine.low %v1967_v25, %v1971_v44 }
 0x39d   : > { %3619 = vmatmul.mubr.bf16.vlgmr.msra.gmra.mrb[12].mxu1 %v7870_v51  ;;  %3546 = vmatpush1.bf16.msra.mxu0 %v6273_v45  ;;  %v6291_v51 = vcombine.low %v1951_v48, %v1955_v33  ;;  %v1974_v45 = vld [vmem:[#allocation8 + $0x550] sm:$0xff] }
 0x39e   : > { %3628 = vmatpush1.bf16.msra.mxu1 %v6275_v46  ;;  %3547 = vmatprep.subr.bf16.mxu0 %v6282_v52  ;;  %v1978_v46 = vld [vmem:[#allocation8 + $0x570] sm:$0xff]  ;;  %v1975_v52 = vld [vmem:[#allocation8 + $0x558] sm:$0xff] }
 0x39f   : > { %3629 = vmatprep.subr.bf16.mxu1 %v6284_v47  ;;  %3577 = vmatprep.mubr.bf16.mxu0 %v7876_v54  ;;  %v1979_v47 = vld [vmem:[#allocation8 + $0x578] sm:$0xff]  ;;  %v6314_v48 = vcombine.high %v1974_v45, %v1978_v46  ;;  %v6313_v35 = vcombine.low %v1974_v45, %v1978_v46 }
 0x3a0   : > { %3659 = vmatprep.mubr.bf16.mxu1 %v7876_v54  ;;  %v6308_v54 = vcombine.high %v1967_v25, %v1971_v44  ;;  %v6316_v33 = vcombine.high %v1975_v52, %v1979_v47  ;;  %v6315_v40 = vcombine.low %v1975_v52, %v1979_v47 }
 0x3a1   : > { %3548 = vmatpush1.bf16.msra.mxu0 %v6281_v55  ;;  %v1982_v55 = vld [vmem:[#allocation8 + $0x590] sm:$0xff] }
 0x3a2   : > { %3630 = vmatpush1.bf16.msra.mxu1 %v6283_v29  ;;  %3549 = vmatprep.subr.bf16.mxu0 %v6290_v27  ;;  %v1986_v29 = vld [vmem:[#allocation8 + $0x5b0] sm:$0xff]  ;;  %v1983_v27 = vld [vmem:[#allocation8 + $0x598] sm:$0xff] }
 0x3a3   : > { %3631 = vmatprep.subr.bf16.mxu1 %v6292_v32  ;;  %v1987_v32 = vld [vmem:[#allocation8 + $0x5b8] sm:$0xff]  ;;  %v6322_v34 = vcombine.high %v1982_v55, %v1986_v29  ;;  %v6321_v38 = vcombine.low %v1982_v55, %v1986_v29 }
 0x3a4   : > { %v6324_v36 = vcombine.high %v1983_v27, %v1987_v32  ;;  %v6323_v37 = vcombine.low %v1983_v27, %v1987_v32 }
 0x3a5   : > { %3550 = vmatpush1.bf16.msra.mxu0 %v6289_v42  ;;  %v1990_v42 = vld [vmem:[#allocation8 + $0x5d0] sm:$0xff] }
 0x3a6   : > { %3632 = vmatpush1.bf16.msra.mxu1 %v6291_v51  ;;  %3551 = vmatprep.subr.bf16.mxu0 %v6298_v49  ;;  %v1994_v51 = vld [vmem:[#allocation8 + $0x5f0] sm:$0xff]  ;;  %v1991_v49 = vld [vmem:[#allocation8 + $0x5d8] sm:$0xff] }
 0x3a7   : > { %3633 = vmatprep.subr.bf16.mxu1 %v6300_v43  ;;  %v1995_v43 = vld [vmem:[#allocation8 + $0x5f8] sm:$0xff]  ;;  %v6330_v25 = vcombine.high %v1990_v42, %v1994_v51  ;;  %v6329_v45 = vcombine.low %v1990_v42, %v1994_v51 }
 0x3a8   : > { %v6332_v44 = vcombine.high %v1991_v49, %v1995_v43  ;;  %v6331_v46 = vcombine.low %v1991_v49, %v1995_v43 }
 0x3a9   : > { %3552 = vmatpush1.bf16.msra.mxu0 %v6297_v39  ;;  %v1998_v39 = vld [vmem:[#allocation8 + $0x610] sm:$0xff] }
 0x3aa   : > { %3634 = vmatpush1.bf16.msra.mxu1 %v6299_v50  ;;  %3553 = vmatprep.subr.bf16.mxu0 %v6306_v53  ;;  %v2002_v50 = vld [vmem:[#allocation8 + $0x630] sm:$0xff]  ;;  %v1999_v53 = vld [vmem:[#allocation8 + $0x618] sm:$0xff] }
 0x3ab   : > { %3635 = vmatprep.subr.bf16.mxu1 %v6308_v54  ;;  %v2003_v54 = vld [vmem:[#allocation8 + $0x638] sm:$0xff]  ;;  %v6338_v52 = vcombine.high %v1998_v39, %v2002_v50  ;;  %v6337_v55 = vcombine.low %v1998_v39, %v2002_v50 }
 0x3ac   : > { %v6340_v47 = vcombine.high %v1999_v53, %v2003_v54  ;;  %v6339_v29 = vcombine.low %v1999_v53, %v2003_v54 }
 0x3ad   : > { %3554 = vmatpush1.bf16.msra.mxu0 %v6305_v56  ;;  %v2006_v56 = vld [vmem:[#allocation8 + $0x650] sm:$0xff] }
 0x3ae   : > { %3636 = vmatpush1.bf16.msra.mxu1 %v6307_v24  ;;  %3555 = vmatprep.subr.bf16.mxu0 %v6314_v48  ;;  %v2010_v24 = vld [vmem:[#allocation8 + $0x670] sm:$0xff]  ;;  %v2007_v48 = vld [vmem:[#allocation8 + $0x658] sm:$0xff] }
 0x3af   : > { %3637 = vmatprep.subr.bf16.mxu1 %v6316_v33  ;;  %v2011_v33 = vld [vmem:[#allocation8 + $0x678] sm:$0xff]  ;;  %v6346_v27 = vcombine.high %v2006_v56, %v2010_v24  ;;  %v6345_v42 = vcombine.low %v2006_v56, %v2010_v24 }
 0x3b0   : > { %v6348_v32 = vcombine.high %v2007_v48, %v2011_v33  ;;  %v6347_v51 = vcombine.low %v2007_v48, %v2011_v33 }
 0x3b1   : > { %3556 = vmatpush1.bf16.msra.mxu0 %v6313_v35  ;;  %v2014_v35 = vld [vmem:[#allocation8 + $0x690] sm:$0xff] }
 0x3b2   : > { %3638 = vmatpush1.bf16.msra.mxu1 %v6315_v40  ;;  %3557 = vmatprep.subr.bf16.mxu0 %v6322_v34  ;;  %v2018_v40 = vld [vmem:[#allocation8 + $0x6b0] sm:$0xff]  ;;  %v2015_v34 = vld [vmem:[#allocation8 + $0x698] sm:$0xff] }
 0x3b3   : > { %3639 = vmatprep.subr.bf16.mxu1 %v6324_v36  ;;  %v2019_v36 = vld [vmem:[#allocation8 + $0x6b8] sm:$0xff]  ;;  %v6354_v49 = vcombine.high %v2014_v35, %v2018_v40  ;;  %v6353_v39 = vcombine.low %v2014_v35, %v2018_v40 }
 0x3b4   : > { %v6356_v43 = vcombine.high %v2015_v34, %v2019_v36  ;;  %v6355_v50 = vcombine.low %v2015_v34, %v2019_v36 }
 0x3b5   : > { %3558 = vmatpush1.bf16.msra.mxu0 %v6321_v38  ;;  %v2022_v38 = vld [vmem:[#allocation8 + $0x6d0] sm:$0xff] }
 0x3b6   : > { %3640 = vmatpush1.bf16.msra.mxu1 %v6323_v37  ;;  %3559 = vmatprep.subr.bf16.mxu0 %v6330_v25  ;;  %v2026_v37 = vld [vmem:[#allocation8 + $0x6f0] sm:$0xff]  ;;  %v2023_v25 = vld [vmem:[#allocation8 + $0x6d8] sm:$0xff] }
 0x3b7   : > { %3641 = vmatprep.subr.bf16.mxu1 %v6332_v44  ;;  %v2027_v44 = vld [vmem:[#allocation8 + $0x6f8] sm:$0xff]  ;;  %v6362_v53 = vcombine.high %v2022_v38, %v2026_v37  ;;  %v6361_v56 = vcombine.low %v2022_v38, %v2026_v37 }
 0x3b8   : > { %v6364_v54 = vcombine.high %v2023_v25, %v2027_v44  ;;  %v6363_v24 = vcombine.low %v2023_v25, %v2027_v44 }
 0x3b9   : > { %3560 = vmatpush1.bf16.msra.mxu0 %v6329_v45  ;;  %v2030_v45 = vld [vmem:[#allocation8 + $0x710] sm:$0xff] }
 0x3ba   : > { %3642 = vmatpush1.bf16.msra.mxu1 %v6331_v46  ;;  %3561 = vmatprep.subr.bf16.mxu0 %v6338_v52  ;;  %v2034_v46 = vld [vmem:[#allocation8 + $0x730] sm:$0xff]  ;;  %v2031_v52 = vld [vmem:[#allocation8 + $0x718] sm:$0xff] }
 0x3bb   : > { %3643 = vmatprep.subr.bf16.mxu1 %v6340_v47  ;;  %v2035_v47 = vld [vmem:[#allocation8 + $0x738] sm:$0xff]  ;;  %v6370_v48 = vcombine.high %v2030_v45, %v2034_v46  ;;  %v6369_v35 = vcombine.low %v2030_v45, %v2034_v46 }
 0x3bc   : > { %v6372_v33 = vcombine.high %v2031_v52, %v2035_v47  ;;  %v6371_v40 = vcombine.low %v2031_v52, %v2035_v47 }
 0x3bd   : > { %3562 = vmatpush1.bf16.msra.mxu0 %v6337_v55  ;;  %v2038_v55 = vld [vmem:[#allocation8 + $0x750] sm:$0xff] }
 0x3be   : > { %3644 = vmatpush1.bf16.msra.mxu1 %v6339_v29  ;;  %3563 = vmatprep.subr.bf16.mxu0 %v6346_v27  ;;  %v2042_v29 = vld [vmem:[#allocation8 + $0x770] sm:$0xff]  ;;  %v2039_v27 = vld [vmem:[#allocation8 + $0x758] sm:$0xff] }
 0x3bf   : > { %3645 = vmatprep.subr.bf16.mxu1 %v6348_v32  ;;  %v2043_v32 = vld [vmem:[#allocation8 + $0x778] sm:$0xff]  ;;  %v6378_v34 = vcombine.high %v2038_v55, %v2042_v29  ;;  %v6377_v38 = vcombine.low %v2038_v55, %v2042_v29 }
 0x3c0   : > { %v6380_v36 = vcombine.high %v2039_v27, %v2043_v32  ;;  %v6379_v37 = vcombine.low %v2039_v27, %v2043_v32 }
 0x3c1   : > { %3564 = vmatpush1.bf16.msra.mxu0 %v6345_v42  ;;  %v2046_v42 = vld [vmem:[#allocation8 + $0x790] sm:$0xff] }
 0x3c2   : > { %3646 = vmatpush1.bf16.msra.mxu1 %v6347_v51  ;;  %3565 = vmatprep.subr.bf16.mxu0 %v6354_v49  ;;  %v2050_v51 = vld [vmem:[#allocation8 + $0x7b0] sm:$0xff]  ;;  %v2047_v49 = vld [vmem:[#allocation8 + $0x798] sm:$0xff] }
 0x3c3   : > { %3647 = vmatprep.subr.bf16.mxu1 %v6356_v43  ;;  %v2051_v43 = vld [vmem:[#allocation8 + $0x7b8] sm:$0xff]  ;;  %v6386_v25 = vcombine.high %v2046_v42, %v2050_v51  ;;  %v6385_v45 = vcombine.low %v2046_v42, %v2050_v51 }
 0x3c4   : > { %v6388_v44 = vcombine.high %v2047_v49, %v2051_v43  ;;  %v6387_v46 = vcombine.low %v2047_v49, %v2051_v43 }
 0x3c5   : > { %3566 = vmatpush1.bf16.msra.mxu0 %v6353_v39  ;;  %v2054_v39 = vld [vmem:[#allocation8 + $0x7d0] sm:$0xff] }
 0x3c6   : > { %3648 = vmatpush1.bf16.msra.mxu1 %v6355_v50  ;;  %3567 = vmatprep.subr.bf16.mxu0 %v6362_v53  ;;  %v2058_v50 = vld [vmem:[#allocation8 + $0x7f0] sm:$0xff]  ;;  %v2055_v53 = vld [vmem:[#allocation8 + $0x7d8] sm:$0xff] }
 0x3c7   : > { %3649 = vmatprep.subr.bf16.mxu1 %v6364_v54  ;;  %v2059_v54 = vld [vmem:[#allocation8 + $0x7f8] sm:$0xff]  ;;  %v6394_v52 = vcombine.high %v2054_v39, %v2058_v50  ;;  %v6393_v55 = vcombine.low %v2054_v39, %v2058_v50 }
 0x3c8   : > { %v6396_v47 = vcombine.high %v2055_v53, %v2059_v54  ;;  %v6395_v29 = vcombine.low %v2055_v53, %v2059_v54 }
 0x3c9   : > { %3568 = vmatpush1.bf16.msra.mxu0 %v6361_v56  ;;  %v3720_v56 = vld [vmem:[#allocation11] sm:$0xff] }
 0x3ca   : > { %3650 = vmatpush1.bf16.msra.mxu1 %v6363_v24  ;;  %3569 = vmatprep.subr.bf16.mxu0 %v6370_v48  ;;  %v3724_v24 = vld [vmem:[#allocation11 + $0x20] sm:$0xff]  ;;  %v3721_v48 = vld [vmem:[#allocation11 + $0x8] sm:$0xff] }
 0x3cb   : > { %3651 = vmatprep.subr.bf16.mxu1 %v6372_v33  ;;  %v3725_v33 = vld [vmem:[#allocation11 + $0x28] sm:$0xff]  ;;  %v6404_v27 = vcombine.high %v3720_v56, %v3724_v24  ;;  %v6403_v42 = vcombine.low %v3720_v56, %v3724_v24 }
 0x3cc   : > { %v6406_v32 = vcombine.high %v3721_v48, %v3725_v33  ;;  %v6405_v51 = vcombine.low %v3721_v48, %v3725_v33  ;;  %v3752_v33 = vld [vmem:[#allocation11 + $0x100] sm:$0xff] }
 0x3cd   : > { %3570 = vmatpush1.bf16.msra.mxu0 %v6369_v35  ;;  %v3728_v35 = vld [vmem:[#allocation11 + $0x40] sm:$0xff] }
 0x3ce   : > { %3652 = vmatpush1.bf16.msra.mxu1 %v6371_v40  ;;  %3571 = vmatprep.subr.bf16.mxu0 %v6378_v34  ;;  %v3732_v40 = vld [vmem:[#allocation11 + $0x60] sm:$0xff]  ;;  %v3729_v34 = vld [vmem:[#allocation11 + $0x48] sm:$0xff] }
 0x3cf   : > { %3653 = vmatprep.subr.bf16.mxu1 %v6380_v36  ;;  %v3733_v36 = vld [vmem:[#allocation11 + $0x68] sm:$0xff]  ;;  %v6412_v49 = vcombine.high %v3728_v35, %v3732_v40  ;;  %v6411_v39 = vcombine.low %v3728_v35, %v3732_v40 }
 0x3d0   : > { %v6414_v43 = vcombine.high %v3729_v34, %v3733_v36  ;;  %v6413_v50 = vcombine.low %v3729_v34, %v3733_v36  ;;  %v3760_v36 = vld [vmem:[#allocation11 + $0x140] sm:$0xff] }
 0x3d1   : > { %3572 = vmatpush1.bf16.msra.mxu0 %v6377_v38  ;;  %v3736_v38 = vld [vmem:[#allocation11 + $0x80] sm:$0xff] }
 0x3d2   : > { %3654 = vmatpush1.bf16.msra.mxu1 %v6379_v37  ;;  %3573 = vmatprep.subr.bf16.mxu0 %v6386_v25  ;;  %v3740_v37 = vld [vmem:[#allocation11 + $0xa0] sm:$0xff]  ;;  %v3737_v25 = vld [vmem:[#allocation11 + $0x88] sm:$0xff] }
 0x3d3   : > { %3655 = vmatprep.subr.bf16.mxu1 %v6388_v44  ;;  %v3741_v44 = vld [vmem:[#allocation11 + $0xa8] sm:$0xff]  ;;  %v6420_v53 = vcombine.high %v3736_v38, %v3740_v37  ;;  %v6419_v56 = vcombine.low %v3736_v38, %v3740_v37 }
 0x3d4   : > { %v6422_v54 = vcombine.high %v3737_v25, %v3741_v44  ;;  %v6421_v24 = vcombine.low %v3737_v25, %v3741_v44  ;;  %v3768_v44 = vld [vmem:[#allocation11 + $0x180] sm:$0xff] }
 0x3d5   : > { %3574 = vmatpush1.bf16.msra.mxu0 %v6385_v45  ;;  %v3744_v45 = vld [vmem:[#allocation11 + $0xc0] sm:$0xff] }
 0x3d6   : > { %3656 = vmatpush1.bf16.msra.mxu1 %v6387_v46  ;;  %3575 = vmatprep.subr.bf16.mxu0 %v6394_v52  ;;  %v3748_v46 = vld [vmem:[#allocation11 + $0xe0] sm:$0xff]  ;;  %v3745_v52 = vld [vmem:[#allocation11 + $0xc8] sm:$0xff] }
 0x3d7   : > { %3657 = vmatprep.subr.bf16.mxu1 %v6396_v47  ;;  %v3749_v47 = vld [vmem:[#allocation11 + $0xe8] sm:$0xff]  ;;  %v6428_v48 = vcombine.high %v3744_v45, %v3748_v46 }
 0x3d8   : > { %v6429_v35 = vcombine.low %v3745_v52, %v3749_v47 }
 0x3d9   : > { %3576 = vmatpush1.bf16.msra.mxu0 %v6393_v55  ;;  %v3756_v55 = vld [vmem:[#allocation11 + $0x120] sm:$0xff] }
 0x3da   : > { %3658 = vmatpush1.bf16.msra.mxu1 %v6395_v29  ;;  %5256 = vmatprep.subr.bf16.mxu0 %v6404_v27  ;;  %v3753_v29 = vld [vmem:[#allocation11 + $0x108] sm:$0xff]  ;;  %v6436_v40 = vcombine.high %v3752_v33, %v3756_v55 }
 0x3db   : > { %5338 = vmatprep.subr.bf16.mxu1 %v6406_v32  ;;  %v3757_v27 = vld [vmem:[#allocation11 + $0x128] sm:$0xff]  ;;  %v6427_v32 = vcombine.low %v3744_v45, %v3748_v46 }
 0x3dc   : > { %3578 = vmatmul.mubr.bf16.vlgmr.msra.gmra.mrb[12].mxu0 %v7890_v41  ;;  %v6438_v34 = vcombine.high %v3753_v29, %v3757_v27  ;;  %v6437_v38 = vcombine.low %v3753_v29, %v3757_v27 }
 0x3dd   : > { %3660 = vmatmul.mubr.bf16.vlgmr.msra.gmra.mrb[12].mxu1 %v7890_v41  ;;  %5257 = vmatpush1.bf16.msra.mxu0 %v6403_v42  ;;  %v6430_v41 = vcombine.high %v3745_v52, %v3749_v47  ;;  %v3764_v42 = vld [vmem:[#allocation11 + $0x160] sm:$0xff] }
 0x3de   : > { %5339 = vmatpush1.bf16.msra.mxu1 %v6405_v51  ;;  %5258 = vmatprep.subr.bf16.mxu0 %v6412_v49  ;;  %v3761_v51 = vld [vmem:[#allocation11 + $0x148] sm:$0xff]  ;;  %v6444_v37 = vcombine.high %v3760_v36, %v3764_v42  ;;  %v3776_v47 = vld [vmem:[#allocation11 + $0x1c0] sm:$0xff] }
 0x3df   : > { %5340 = vmatprep.subr.bf16.mxu1 %v6414_v43  ;;  %v3765_v49 = vld [vmem:[#allocation11 + $0x168] sm:$0xff]  ;;  %v6435_v43 = vcombine.low %v3752_v33, %v3756_v55 }
 0x3e0   : > { %v6446_v25 = vcombine.high %v3761_v51, %v3765_v49  ;;  %v6445_v45 = vcombine.low %v3761_v51, %v3765_v49  ;;  %v3784_v49 = vld [vmem:[#allocation11 + $0x200] sm:$0xff] }
 0x3e1   : > { %5259 = vmatpush1.bf16.msra.mxu0 %v6411_v39  ;;  %v3772_v39 = vld [vmem:[#allocation11 + $0x1a0] sm:$0xff] }
 0x3e2   : > { %5341 = vmatpush1.bf16.msra.mxu1 %v6413_v50  ;;  %5260 = vmatprep.subr.bf16.mxu0 %v6420_v53  ;;  %v3769_v50 = vld [vmem:[#allocation11 + $0x188] sm:$0xff]  ;;  %v6452_v46 = vcombine.high %v3768_v44, %v3772_v39 }
 0x3e3   : > { %5342 = vmatprep.subr.bf16.mxu1 %v6422_v54  ;;  %v3773_v53 = vld [vmem:[#allocation11 + $0x1a8] sm:$0xff]  ;;  %v6443_v54 = vcombine.low %v3760_v36, %v3764_v42 }
 0x3e4   : > { %v6454_v52 = vcombine.high %v3769_v50, %v3773_v53  ;;  %v6453_v33 = vcombine.low %v3769_v50, %v3773_v53  ;;  %v3789_v50 = vld [vmem:[#allocation11 + $0x228] sm:$0xff] }
 0x3e5   : > { %5261 = vmatpush1.bf16.msra.mxu0 %v6419_v56  ;;  %v3780_v56 = vld [vmem:[#allocation11 + $0x1e0] sm:$0xff] }
 0x3e6   : > { %5343 = vmatpush1.bf16.msra.mxu1 %v6421_v24  ;;  %5262 = vmatprep.subr.bf16.mxu0 %v6428_v48  ;;  %v3777_v24 = vld [vmem:[#allocation11 + $0x1c8] sm:$0xff]  ;;  %v6460_v55 = vcombine.high %v3776_v47, %v3780_v56  ;;  %v6459_v27 = vcombine.low %v3776_v47, %v3780_v56 }
 0x3e7   : > { %5344 = vmatprep.subr.bf16.mxu1 %v6430_v41  ;;  %v3781_v48 = vld [vmem:[#allocation11 + $0x1e8] sm:$0xff]  ;;  %v6451_v41 = vcombine.low %v3768_v44, %v3772_v39 }
 0x3e8   : > { %v6462_v29 = vcombine.high %v3777_v24, %v3781_v48  ;;  %v3797_v56 = vld [vmem:[#allocation11 + $0x268] sm:$0xff] }
 0x3e9   : > { %5263 = vmatpush1.bf16.msra.mxu0 %v6427_v32  ;;  %v6461_v32 = vcombine.low %v3777_v24, %v3781_v48 }
 0x3ea   : > { %5345 = vmatpush1.bf16.msra.mxu1 %v6429_v35  ;;  %5264 = vmatprep.subr.bf16.mxu0 %v6436_v40 }
 0x3eb   : > { %5346 = vmatprep.subr.bf16.mxu1 %v6438_v34 }
 0x3ed   : > { %5265 = vmatpush1.bf16.msra.mxu0 %v6435_v43  ;;  %v3788_v43 = vld [vmem:[#allocation11 + $0x220] sm:$0xff] }
 0x3ee   : > { %5347 = vmatpush1.bf16.msra.mxu1 %v6437_v38  ;;  %5266 = vmatprep.subr.bf16.mxu0 %v6444_v37  ;;  %v3785_v38 = vld [vmem:[#allocation11 + $0x208] sm:$0xff]  ;;  %v6468_v44 = vcombine.high %v3784_v49, %v3788_v43  ;;  %v6467_v39 = vcombine.low %v3784_v49, %v3788_v43  ;;  %v3808_v43 = vld [vmem:[#allocation11 + $0x2c0] sm:$0xff] }
 0x3ef   : > { %5348 = vmatprep.subr.bf16.mxu1 %v6446_v25  ;;  %v6469_v53 = vcombine.low %v3785_v38, %v3789_v50 }
 0x3f1   : > { %5267 = vmatpush1.bf16.msra.mxu0 %v6443_v54  ;;  %v6470_v54 = vcombine.high %v3785_v38, %v3789_v50  ;;  %v3812_v38 = vld [vmem:[#allocation11 + $0x2e0] sm:$0xff] }
 0x3f2   : > { %5349 = vmatpush1.bf16.msra.mxu1 %v6445_v45  ;;  %5268 = vmatprep.subr.bf16.mxu0 %v6452_v46  ;;  %v3792_v45 = vld [vmem:[#allocation11 + $0x240] sm:$0xff] }
 0x3f3   : > { %5350 = vmatprep.subr.bf16.mxu1 %v6454_v52  ;;  %v3796_v46 = vld [vmem:[#allocation11 + $0x260] sm:$0xff]  ;;  %v3793_v52 = vld [vmem:[#allocation11 + $0x248] sm:$0xff] }
 0x3f4   : > { %v6476_v47 = vcombine.high %v3792_v45, %v3796_v46  ;;  %v6475_v24 = vcombine.low %v3792_v45, %v3796_v46  ;;  %v6477_v48 = vcombine.low %v3793_v52, %v3797_v56  ;;  %v3820_v45 = vld [vmem:[#allocation11 + $0x320] sm:$0xff]  ;;  %v3817_v46 = vld [vmem:[#allocation11 + $0x308] sm:$0xff] }
 0x3f5   : > { %5269 = vmatpush1.bf16.msra.mxu0 %v6451_v41  ;;  %v6478_v41 = vcombine.high %v3793_v52, %v3797_v56 }
 0x3f6   : > { %5351 = vmatpush1.bf16.msra.mxu1 %v6453_v33  ;;  %5270 = vmatprep.subr.bf16.mxu0 %v6460_v55  ;;  %v3800_v33 = vld [vmem:[#allocation11 + $0x280] sm:$0xff] }
 0x3f7   : > { %5352 = vmatprep.subr.bf16.mxu1 %v6462_v29  ;;  %v3804_v55 = vld [vmem:[#allocation11 + $0x2a0] sm:$0xff]  ;;  %v3801_v29 = vld [vmem:[#allocation11 + $0x288] sm:$0xff] }
 0x3f9   : > { %5271 = vmatpush1.bf16.msra.mxu0 %v6459_v27  ;;  %v6484_v27 = vcombine.high %v3800_v33, %v3804_v55 }
 0x3fa   : > { %5353 = vmatpush1.bf16.msra.mxu1 %v6461_v32  ;;  %5272 = vmatprep.subr.bf16.mxu0 %v6468_v44  ;;  %v3805_v32 = vld [vmem:[#allocation11 + $0x2a8] sm:$0xff] }
 0x3fb   : > { %5354 = vmatprep.subr.bf16.mxu1 %v6470_v54  ;;  %v6486_v49 = vcombine.high %v3801_v29, %v3805_v32  ;;  %v3813_v44 = vld [vmem:[#allocation11 + $0x2e8] sm:$0xff]  ;;  %v3816_v54 = vld [vmem:[#allocation11 + $0x300] sm:$0xff] }
 0x3fc   : > { %v6500_v52 = vcombine.high %v3816_v54, %v3820_v45  ;;  %v6499_v56 = vcombine.low %v3816_v54, %v3820_v45  ;;  %v3841_v54 = vld [vmem:[#allocation11 + $0x3c8] sm:$0xff] }
 0x3fd   : > { %5273 = vmatpush1.bf16.msra.mxu0 %v6467_v39  ;;  %v6491_v39 = vcombine.low %v3808_v43, %v3812_v38  ;;  %v3845_v45 = vld [vmem:[#allocation11 + $0x3e8] sm:$0xff] }
 0x3fe   : > { %5355 = vmatpush1.bf16.msra.mxu1 %v6469_v53  ;;  %5274 = vmatprep.subr.bf16.mxu0 %v6476_v47  ;;  %v3821_v47 = vld [vmem:[#allocation11 + $0x328] sm:$0xff] }
 0x3ff   : > { %5356 = vmatprep.subr.bf16.mxu1 %v6478_v41  ;;  %v3824_v41 = vld [vmem:[#allocation11 + $0x340] sm:$0xff] }
 0x401   : > { %5275 = vmatpush1.bf16.msra.mxu0 %v6475_v24  ;;  %v6501_v24 = vcombine.low %v3817_v46, %v3821_v47 }
 0x402   : > { %5357 = vmatpush1.bf16.msra.mxu1 %v6477_v48  ;;  %5276 = vmatprep.subr.bf16.mxu0 %v6484_v27  ;;  %v6502_v48 = vcombine.high %v3817_v46, %v3821_v47  ;;  %v6526_v47 = vcombine.high %v3841_v54, %v3845_v45 }
 0x403   : > { %5358 = vmatprep.subr.bf16.mxu1 %v6486_v49 }
 0x42f   : > { %v7902_v35 = vpop.f32.mrb[8].mxu0  ;;  %v7904_v40 = vpop.f32.mrb[8].mxu1 }
 0x430   : > { %v7906_v34 = vpop.f32.mrb[9].mxu0  ;;  %v7908_v36 = vpop.f32.mrb[9].mxu1 }
 0x431   : > { %v3419_v42 = vpop.f32.mrb[10].mxu0  ;;  %v3501_v51 = vpop.f32.mrb[10].mxu1 }
 0x432   : > { %v3420_v37 = vpop.f32.mrb[11].mxu0  ;;  %v3502_v25 = vpop.f32.mrb[11].mxu1  ;;  %v6483_v42 = vcombine.low %v3800_v33, %v3804_v55  ;;  %v6485_v51 = vcombine.low %v3801_v29, %v3805_v32  ;;  %v3828_v33 = vld [vmem:[#allocation11 + $0x360] sm:$0xff]  ;;  %v3825_v55 = vld [vmem:[#allocation11 + $0x348] sm:$0xff] }
 0x433   : > { %v3809_v37 = vld [vmem:[#allocation11 + $0x2c8] sm:$0xff]  ;;  %v6492_v25 = vcombine.high %v3808_v43, %v3812_v38  ;;  %v6507_v29 = vcombine.low %v3824_v41, %v3828_v33  ;;  %v6508_v27 = vcombine.high %v3824_v41, %v3828_v33  ;;  %v7912_v41 = vld [vmem:[#allocation11 + $0x420] sm:$0xff] }
 0x434   : > { %5277 = vmatpush1.bf16.msra.mxu0 %v6483_v42  ;;  %5359 = vmatpush1.bf16.msra.mxu1 %v6485_v51  ;;  %v6493_v50 = vcombine.low %v3809_v37, %v3813_v44  ;;  %v6494_v53 = vcombine.high %v3809_v37, %v3813_v44  ;;  %v3829_v32 = vld [vmem:[#allocation11 + $0x368] sm:$0xff]  ;;  %v3832_v42 = vld [vmem:[#allocation11 + $0x380] sm:$0xff] }
 0x435   : > { %5278 = vmatprep.subr.bf16.mxu0 %v6492_v25  ;;  %v3836_v51 = vld [vmem:[#allocation11 + $0x3a0] sm:$0xff]  ;;  %v6509_v49 = vcombine.low %v3825_v55, %v3829_v32  ;;  %v6510_v43 = vcombine.high %v3825_v55, %v3829_v32  ;;  %v3833_v37 = vld [vmem:[#allocation11 + $0x388] sm:$0xff] }
 0x436   : > { %5360 = vmatprep.subr.bf16.mxu1 %v6494_v53  ;;  %v6516_v38 = vcombine.high %v3832_v42, %v3836_v51  ;;  %v3837_v25 = vld [vmem:[#allocation11 + $0x3a8] sm:$0xff]  ;;  %v3840_v44 = vld [vmem:[#allocation11 + $0x3c0] sm:$0xff]  ;;  %v6515_v53 = vcombine.low %v3832_v42, %v3836_v51  ;;  %v6698_v51 = vadd.f32 %v7902_v35, %v699_v0 }
 0x437   : > { %v7914_v33 = vld [vmem:[#allocation11 + $0x408] sm:$0xff]  ;;  %v6988_v0 = vld [vmem:[#allocation14 + $0x74] ss:$8 sps:$4 sm:$0xff] (%p8033_p0)  }
 0x438   : > { %5279 = vmatpush1.bf16.msra.mxu0 %v6491_v39  ;;  %5361 = vmatpush1.bf16.msra.mxu1 %v6493_v50  ;;  %v6518_v39 = vcombine.high %v3833_v37, %v3837_v25  ;;  %v3844_v50 = vld [vmem:[#allocation11 + $0x3e0] sm:$0xff] }
 0x439   : > { %5280 = vmatprep.subr.bf16.mxu0 %v6500_v52  ;;  %5362 = vmatprep.subr.bf16.mxu1 %v6502_v48  ;;  %v6524_v46 = vcombine.high %v3840_v44, %v3844_v50  ;;  %v6517_v52 = vcombine.low %v3833_v37, %v3837_v25  ;;  %v7910_v48 = vld [vmem:[#allocation11 + $0x400] sm:$0xff]  ;;  %v6397_v37 = vmul.f32 -1.442695, %v6698_v51 }
 0x43a   : > { %v6532_v55 = vcombine.high %v7910_v48, %v7912_v41 }
 0x43b   : > { %6903 = vpow2.f32 %v6397_v37 }
 0x43c   : > { %5281 = vmatpush1.bf16.msra.mxu0 %v6499_v56  ;;  %5363 = vmatpush1.bf16.msra.mxu1 %v6501_v24  ;;  %v6523_v56 = vcombine.low %v3840_v44, %v3844_v50  ;;  %v6525_v24 = vcombine.low %v3841_v54, %v3845_v45 }
 0x43d   : > { %5282 = vmatprep.subr.bf16.mxu0 %v6508_v27  ;;  %5364 = vmatprep.subr.bf16.mxu1 %v6510_v43  ;;  %v6531_v27 = vcombine.low %v7910_v48, %v7912_v41  ;;  %v6699_v43 = vadd.f32 %v7906_v34, %v703_v9  ;;  %v6994_v9 = vld [vmem:[#allocation14 + $0x94] ss:$8 sps:$4 sm:$0xff] (%p8033_p0)  }
 0x43f   : > { %v6398_v44 = vmul.f32 -1.442695, %v6699_v43 }
 0x440   : > { %5283 = vmatpush1.bf16.msra.mxu0 %v6507_v29  ;;  %5365 = vmatpush1.bf16.msra.mxu1 %v6509_v49  ;;  %v7918_v29 = vld [vmem:[#allocation11 + $0x428] sm:$0xff]  ;;  %v6700_v49 = vadd.f32 %v7904_v40, %v707_v7 }
 0x441   : > { %5284 = vmatprep.subr.bf16.mxu0 %v6516_v38  ;;  %5366 = vmatprep.subr.bf16.mxu1 %v6518_v39  ;;  %v6533_v32 = vcombine.low %v7914_v33, %v7918_v29  ;;  %v6534_v42 = vcombine.high %v7914_v33, %v7918_v29  ;;  %v6701_v38 = vadd.f32 %v7908_v36, %v711_v11  ;;  %v6991_v7 = vld [vmem:[#allocation14 + $0x84] ss:$8 sps:$4 sm:$0xff] (%p8033_p0)  }
 0x442   : > { %v6399_v25 = vmul.f32 -1.442695, %v6700_v49  ;;  %v6997_v11 = vld [vmem:[#allocation14 + $0xa4] ss:$8 sps:$4 sm:$0xff] (%p8033_p0)  }
 0x443   : > { %v6400_v39 = vmul.f32 -1.442695, %v6701_v38 }
 0x444   : > { %5285 = vmatpush1.bf16.msra.mxu0 %v6515_v53  ;;  %5367 = vmatpush1.bf16.msra.mxu1 %v6517_v52  ;;  %6905 = vpow2.f32 %v6399_v25 }
 0x445   : > { %5286 = vmatprep.subr.bf16.mxu0 %v6524_v46  ;;  %5368 = vmatprep.subr.bf16.mxu1 %v6526_v47  ;;  %6907 = vpow2.f32 %v6398_v44  ;;  %v6904_v35 = vpop.eup %6903 }
 0x446   : > { %6909 = vpow2.f32 %v6400_v39  ;;  %v3686_v54 = vadd.f32 1.0, %v6904_v35 }
 0x448   : > { %5287 = vmatpush1.bf16.msra.mxu0 %v6523_v56  ;;  %5369 = vmatpush1.bf16.msra.mxu1 %v6525_v24  ;;  %6911 = vrcp.f32 %v3686_v54 }
 0x449   : > { %5297 = vmatprep.subr.bf16.mxu0 %v6532_v55  ;;  %5379 = vmatprep.subr.bf16.mxu1 %v6534_v42 }
 0x44e   : > { %v6906_v40 = vpop.eup %6905 }
 0x44f   : > { %v6908_v50 = vpop.eup %6907  ;;  %v3688_v45 = vadd.f32 1.0, %v6906_v40 }
 0x450   : > { %v6910_v53 = vpop.eup %6909  ;;  %v3687_v34 = vadd.f32 1.0, %v6908_v50 }
 0x451   : > { %v3689_v46 = vadd.f32 1.0, %v6910_v53  ;;  %6913 = vrcp.f32 %v3688_v45 }
 0x452   : > { %6915 = vrcp.f32 %v3687_v34  ;;  %v6912_v39 = vpop.eup %6911 }
 0x453   : > { %6917 = vrcp.f32 %v3689_v46 }
 0x45b   : > { %v6914_v35 = vpop.eup %6913 }
 0x45c   : > { %v6916_v40 = vpop.eup %6915  ;;  %v3706_v45 = vmul.f32 %v7279_v26, %v6914_v35 }
 0x45d   : > { %v6918_v50 = vpop.eup %6917 }
 0x4af   : > { %v3579_v52 = vpop.f32.mrb[12].mxu0 }
 0x4b0   : > { %v6702_v36 = vadd.f32 %v3579_v52, %v715_v16  ;;  %v3661_v47 = vpop.f32.mrb[12].mxu1  ;;  %v3581_v56 = vpop.f32.mrb[13].mxu0  ;;  %v7005_v16 = vld [vmem:[#allocation14 + $0xc0] ss:$8 sps:$4 sm:$0xff] (%p8033_p0)  }
 0x4b1   : > { %v6704_v24 = vadd.f32 %v3661_v47, %v723_v19  ;;  %v6703_v55 = vadd.f32 %v3581_v56, %v719_v21  ;;  %v3663_v42 = vpop.f32.mrb[13].mxu1  ;;  %v3583_v51 = vpop.f32.mrb[14].mxu0  ;;  %v3707_v56 = vmul.f32 %v7275_v60, %v6918_v50  ;;  %v7009_v19 = vld [vmem:[#allocation14 + $0xe4] ss:$8 sps:$4 sm:$0xff] (%p8033_p0)   ;;  %v7012_v21 = vld [vmem:[#allocation14 + $0xf4] ss:$8 sps:$4 sm:$0xff] (%p8033_p0)  }
 0x4b2   : > { %v6401_v49 = vmul.f32 -1.442695, %v6702_v36  ;;  %v6705_v43 = vadd.f32 %v3663_v42, %v727_v23  ;;  %v3665_v38 = vpop.f32.mrb[14].mxu1  ;;  %v3584_v37 = vpop.f32.mrb[15].mxu0 }
 0x4b3   : > { %6919 = vtanh.f32 %v6704_v24  ;;  %v6402_v25 = vmul.f32 -1.442695, %v6703_v55  ;;  %v3666_v44 = vpop.f32.mrb[15].mxu1  ;;  %v3856_v38 = vld [vmem:[#allocation11 + $0x440] sm:$0xff] }
 0x4b4   : > { %6921 = vpow2.f32 %v6401_v49  ;;  %v3857_v44 = vld [vmem:[#allocation11 + $0x448] sm:$0xff] }
 0x4b5   : > { %6923 = vpow2.f32 %v6402_v25  ;;  %v3860_v25 = vld [vmem:[#allocation11 + $0x460] sm:$0xff] }
 0x4b6   : > { %6925 = vtanh.f32 %v6705_v43  ;;  %v6540_v50 = vcombine.high %v3856_v38, %v3860_v25 }
 0x4bd   : > { %v6920_v53 = vpop.eup %6919 }
 0x4be   : > { %v6922_v54 = vpop.eup %6921  ;;  %v3708_v34 = vmul.f32 %v6920_v53, %v6912_v39  ;;  %v3861_v39 = vld [vmem:[#allocation11 + $0x468] sm:$0xff] }
 0x4bf   : > { %v6924_v46 = vpop.eup %6923  ;;  %v3690_v52 = vadd.f32 1.0, %v6922_v54  ;;  %v6542_v53 = vcombine.high %v3857_v44, %v3861_v39  ;;  %v3864_v54 = vld [vmem:[#allocation11 + $0x480] sm:$0xff] }
 0x4c0   : > { %v6926_v36 = vpop.eup %6925  ;;  %v7955_v26 = vadd.f32 %v3708_v34, %v3706_v45   ;;  %v3691_v47 = vadd.f32 1.0, %v6924_v46  ;;  %v3868_v45 = vld [vmem:[#allocation11 + $0x4a0] sm:$0xff]  ;;  %v3865_v34 = vld [vmem:[#allocation11 + $0x488] sm:$0xff] }
 0x4c1   : > { %6927 = vrcp.f32 %v3690_v52  ;;  %v3709_v24 = vmul.f32 %v6926_v36, %v6916_v40  ;;  %v3869_v46 = vld [vmem:[#allocation11 + $0x4a8] sm:$0xff]  ;;  %v7978_v52 = vpack.c.bf16 %v7267_v61, %v7267_v61  ;;  %v6539_v36 = vcombine.low %v3856_v38, %v3860_v25  ;;  %v3872_v61 = vld [vmem:[#allocation11 + $0x4c0] sm:$0xff] }
 0x4c2   : > { %6929 = vtanh.f32 %v7955_v26  ;;  %v6547_v48 = vcombine.low %v3864_v54, %v3868_v45  ;;  %v6549_v41 = vcombine.low %v3865_v34, %v3869_v46  ;;  %v3885_v38 = vld [vmem:[#allocation11 + $0x528] sm:$0xff] }
 0x4c3   : > { %6931 = vrcp.f32 %v3691_v47  ;;  %v7959_v60 = vadd.f32 %v3709_v24, %v3707_v56   ;;  %v6541_v47 = vcombine.low %v3857_v44, %v3861_v39  ;;  %v6548_v56 = vcombine.high %v3864_v54, %v3868_v45  ;;  %v3889_v54 = vld [vmem:[#allocation11 + $0x548] sm:$0xff] }
 0x4c4   : > { %v6550_v24 = vcombine.high %v3865_v34, %v3869_v46  ;;  %v3893_v45 = vld [vmem:[#allocation11 + $0x568] sm:$0xff] }
 0x4c5   : > { %6933 = vtanh.f32 %v7959_v60 }
 0x4cb   : > { %v6928_v55 = vpop.eup %6927 }
 0x4cc   : > { %v6930_v42 = vpop.eup %6929 }
 0x4cd   : > { %v6932_v51 = vpop.eup %6931  ;;  %v7962_v49 = vmul.f32 %v6930_v42, %v6928_v55   ;;  %v3876_v55 = vld [vmem:[#allocation11 + $0x4e0] sm:$0xff]  ;;  %v3873_v42 = vld [vmem:[#allocation11 + $0x4c8] sm:$0xff] }
 0x4ce   : > { %v6556_v33 = vcombine.high %v3872_v61, %v3876_v55  ;;  %v6555_v25 = vcombine.low %v3872_v61, %v3876_v55  ;;  %v3897_v61 = vld [vmem:[#allocation11 + $0x588] sm:$0xff] }
 0x4cf   : > { %v6934_v43 = vpop.eup %6933  ;;  %v7972_v40 = vpack.c.bf16 %v7962_v49, %v7962_v49  ;;  %v3901_v55 = vld [vmem:[#allocation11 + $0x5a8] sm:$0xff] }
 0x4d0   : > { %v7964_v37 = vmul.f32 %v6934_v43, %v6932_v51   ;;  %v3877_v51 = vld [vmem:[#allocation11 + $0x4e8] sm:$0xff] }
 0x4d1   : > { %v6558_v29 = vcombine.high %v3873_v42, %v3877_v51  ;;  %v3881_v43 = vld [vmem:[#allocation11 + $0x508] sm:$0xff]  ;;  %v6557_v44 = vcombine.low %v3873_v42, %v3877_v51  ;;  %v6573_v51 = vcombine.low %v3889_v54, %v3893_v45 }
 0x4d2   : > { %v7968_v35 = vpack.c.bf16 %v7964_v37, %v7964_v37  ;;  %v6565_v46 = vcombine.low %v3881_v43, %v3885_v38 }
 0x4d4   : > { %5288 = vmatprep.mubr.bf16.mxu0 %v7968_v35  ;;  %5370 = vmatprep.mubr.bf16.mxu1 %v7968_v35 }
 0x4d5   : > { %5289 = vmatmul.mubr.bf16.vlgmr.msra.gmra.mrb[16].mxu0 %v7972_v40  ;;  %5371 = vmatmul.mubr.bf16.vlgmr.msra.gmra.mrb[16].mxu1 %v7972_v40 }
 0x4d6   : > { %5298 = vmatpush1.bf16.msra.mxu0 %v6531_v27  ;;  %5380 = vmatpush1.bf16.msra.mxu1 %v6533_v32  ;;  %v3880_v27 = vld [vmem:[#allocation11 + $0x500] sm:$0xff] }
 0x4d7   : > { %5299 = vmatprep.subr.bf16.mxu0 %v6540_v50  ;;  %5381 = vmatprep.subr.bf16.mxu1 %v6542_v53  ;;  %v3884_v32 = vld [vmem:[#allocation11 + $0x520] sm:$0xff]  ;;  %v6566_v50 = vcombine.high %v3881_v43, %v3885_v38  ;;  %v6581_v38 = vcombine.low %v3897_v61, %v3901_v55 }
 0x4d8   : > { %5329 = vmatprep.mubr.bf16.mxu0 %v7978_v52  ;;  %5411 = vmatprep.mubr.bf16.mxu1 %v7978_v52  ;;  %v6564_v39 = vcombine.high %v3880_v27, %v3884_v32  ;;  %v3888_v53 = vld [vmem:[#allocation11 + $0x540] sm:$0xff]  ;;  %v6563_v34 = vcombine.low %v3880_v27, %v3884_v32  ;;  %v3905_v27 = vld [vmem:[#allocation11 + $0x5c8] sm:$0xff] }
 0x4d9   : > { %v3909_v32 = vld [vmem:[#allocation11 + $0x5e8] sm:$0xff] }
 0x4da   : > { %5300 = vmatpush1.bf16.msra.mxu0 %v6539_v36  ;;  %5382 = vmatpush1.bf16.msra.mxu1 %v6541_v47  ;;  %v3892_v36 = vld [vmem:[#allocation11 + $0x560] sm:$0xff] }
 0x4db   : > { %5301 = vmatprep.subr.bf16.mxu0 %v6548_v56  ;;  %5383 = vmatprep.subr.bf16.mxu1 %v6550_v24  ;;  %v6572_v47 = vcombine.high %v3888_v53, %v3892_v36  ;;  %v6574_v56 = vcombine.high %v3889_v54, %v3893_v45  ;;  %v3896_v24 = vld [vmem:[#allocation11 + $0x580] sm:$0xff]  ;;  %v6571_v42 = vcombine.low %v3888_v53, %v3892_v36  ;;  %v3913_v53 = vld [vmem:[#allocation11 + $0x608] sm:$0xff] }
 0x4dc   : > { %v3917_v36 = vld [vmem:[#allocation11 + $0x628] sm:$0xff]  ;;  %v6589_v45 = vcombine.low %v3905_v27, %v3909_v32 }
 0x4de   : > { %5302 = vmatpush1.bf16.msra.mxu0 %v6547_v48  ;;  %5384 = vmatpush1.bf16.msra.mxu1 %v6549_v41  ;;  %v3900_v48 = vld [vmem:[#allocation11 + $0x5a0] sm:$0xff] }
 0x4df   : > { %5303 = vmatprep.subr.bf16.mxu0 %v6556_v33  ;;  %5385 = vmatprep.subr.bf16.mxu1 %v6558_v29  ;;  %v6580_v41 = vcombine.high %v3896_v24, %v3900_v48  ;;  %v6582_v33 = vcombine.high %v3897_v61, %v3901_v55  ;;  %v3904_v29 = vld [vmem:[#allocation11 + $0x5c0] sm:$0xff]  ;;  %v6579_v43 = vcombine.low %v3896_v24, %v3900_v48  ;;  %v3921_v24 = vld [vmem:[#allocation11 + $0x648] sm:$0xff] }
 0x4e0   : > { %v3925_v48 = vld [vmem:[#allocation11 + $0x668] sm:$0xff]  ;;  %v6597_v55 = vcombine.low %v3913_v53, %v3917_v36 }
 0x4e2   : > { %5304 = vmatpush1.bf16.msra.mxu0 %v6555_v25  ;;  %5386 = vmatpush1.bf16.msra.mxu1 %v6557_v44  ;;  %v3908_v25 = vld [vmem:[#allocation11 + $0x5e0] sm:$0xff] }
 0x4e3   : > { %5305 = vmatprep.subr.bf16.mxu0 %v6564_v39  ;;  %5387 = vmatprep.subr.bf16.mxu1 %v6566_v50  ;;  %v6588_v44 = vcombine.high %v3904_v29, %v3908_v25  ;;  %v6590_v39 = vcombine.high %v3905_v27, %v3909_v32  ;;  %v3912_v50 = vld [vmem:[#allocation11 + $0x600] sm:$0xff]  ;;  %v6587_v54 = vcombine.low %v3904_v29, %v3908_v25  ;;  %v3929_v29 = vld [vmem:[#allocation11 + $0x688] sm:$0xff] }
 0x4e4   : > { %v3933_v25 = vld [vmem:[#allocation11 + $0x6a8] sm:$0xff]  ;;  %v6605_v32 = vcombine.low %v3921_v24, %v3925_v48 }
 0x4e6   : > { %5306 = vmatpush1.bf16.msra.mxu0 %v6563_v34  ;;  %5388 = vmatpush1.bf16.msra.mxu1 %v6565_v46  ;;  %v3916_v34 = vld [vmem:[#allocation11 + $0x620] sm:$0xff] }
 0x4e7   : > { %5307 = vmatprep.subr.bf16.mxu0 %v6572_v47  ;;  %5389 = vmatprep.subr.bf16.mxu1 %v6574_v56  ;;  %v6596_v46 = vcombine.high %v3912_v50, %v3916_v34  ;;  %v6598_v47 = vcombine.high %v3913_v53, %v3917_v36  ;;  %v3920_v56 = vld [vmem:[#allocation11 + $0x640] sm:$0xff]  ;;  %v6595_v61 = vcombine.low %v3912_v50, %v3916_v34  ;;  %v3937_v50 = vld [vmem:[#allocation11 + $0x6c8] sm:$0xff] }
 0x4e8   : > { %v3941_v34 = vld [vmem:[#allocation11 + $0x6e8] sm:$0xff]  ;;  %v6613_v36 = vcombine.low %v3929_v29, %v3933_v25 }
 0x4ea   : > { %5308 = vmatpush1.bf16.msra.mxu0 %v6571_v42  ;;  %5390 = vmatpush1.bf16.msra.mxu1 %v6573_v51  ;;  %v3924_v42 = vld [vmem:[#allocation11 + $0x660] sm:$0xff] }
 0x4eb   : > { %5309 = vmatprep.subr.bf16.mxu0 %v6580_v41  ;;  %5391 = vmatprep.subr.bf16.mxu1 %v6582_v33  ;;  %v6604_v51 = vcombine.high %v3920_v56, %v3924_v42  ;;  %v6606_v41 = vcombine.high %v3921_v24, %v3925_v48  ;;  %v3928_v33 = vld [vmem:[#allocation11 + $0x680] sm:$0xff]  ;;  %v6603_v27 = vcombine.low %v3920_v56, %v3924_v42  ;;  %v3945_v56 = vld [vmem:[#allocation11 + $0x708] sm:$0xff] }
 0x4ec   : > { %v3949_v42 = vld [vmem:[#allocation11 + $0x728] sm:$0xff]  ;;  %v6621_v48 = vcombine.low %v3937_v50, %v3941_v34 }
 0x4ee   : > { %5310 = vmatpush1.bf16.msra.mxu0 %v6579_v43  ;;  %5392 = vmatpush1.bf16.msra.mxu1 %v6581_v38  ;;  %v3932_v43 = vld [vmem:[#allocation11 + $0x6a0] sm:$0xff] }
 0x4ef   : > { %5311 = vmatprep.subr.bf16.mxu0 %v6588_v44  ;;  %5393 = vmatprep.subr.bf16.mxu1 %v6590_v39  ;;  %v6612_v38 = vcombine.high %v3928_v33, %v3932_v43  ;;  %v6614_v44 = vcombine.high %v3929_v29, %v3933_v25  ;;  %v3936_v39 = vld [vmem:[#allocation11 + $0x6c0] sm:$0xff]  ;;  %v6611_v53 = vcombine.low %v3928_v33, %v3932_v43  ;;  %v3953_v33 = vld [vmem:[#allocation11 + $0x748] sm:$0xff] }
 0x4f0   : > { %v3957_v43 = vld [vmem:[#allocation11 + $0x768] sm:$0xff]  ;;  %v6629_v25 = vcombine.low %v3945_v56, %v3949_v42 }
 0x4f2   : > { %5312 = vmatpush1.bf16.msra.mxu0 %v6587_v54  ;;  %5394 = vmatpush1.bf16.msra.mxu1 %v6589_v45  ;;  %v3940_v54 = vld [vmem:[#allocation11 + $0x6e0] sm:$0xff] }
 0x4f3   : > { %5313 = vmatprep.subr.bf16.mxu0 %v6596_v46  ;;  %5395 = vmatprep.subr.bf16.mxu1 %v6598_v47  ;;  %v6620_v45 = vcombine.high %v3936_v39, %v3940_v54  ;;  %v6622_v46 = vcombine.high %v3937_v50, %v3941_v34  ;;  %v3944_v47 = vld [vmem:[#allocation11 + $0x700] sm:$0xff]  ;;  %v6619_v24 = vcombine.low %v3936_v39, %v3940_v54  ;;  %v3961_v39 = vld [vmem:[#allocation11 + $0x788] sm:$0xff] }
 0x4f4   : > { %v3965_v54 = vld [vmem:[#allocation11 + $0x7a8] sm:$0xff]  ;;  %v6637_v34 = vcombine.low %v3953_v33, %v3957_v43 }
 0x4f6   : > { %5314 = vmatpush1.bf16.msra.mxu0 %v6595_v61  ;;  %5396 = vmatpush1.bf16.msra.mxu1 %v6597_v55  ;;  %v3948_v61 = vld [vmem:[#allocation11 + $0x720] sm:$0xff] }
 0x4f7   : > { %5315 = vmatprep.subr.bf16.mxu0 %v6604_v51  ;;  %5397 = vmatprep.subr.bf16.mxu1 %v6606_v41  ;;  %v6628_v55 = vcombine.high %v3944_v47, %v3948_v61  ;;  %v6630_v51 = vcombine.high %v3945_v56, %v3949_v42  ;;  %v3952_v41 = vld [vmem:[#allocation11 + $0x740] sm:$0xff]  ;;  %v6627_v29 = vcombine.low %v3944_v47, %v3948_v61  ;;  %v3969_v47 = vld [vmem:[#allocation11 + $0x7c8] sm:$0xff] }
 0x4f8   : > { %v3973_v61 = vld [vmem:[#allocation11 + $0x7e8] sm:$0xff]  ;;  %v6645_v42 = vcombine.low %v3961_v39, %v3965_v54 }
 0x4fa   : > { %5316 = vmatpush1.bf16.msra.mxu0 %v6603_v27  ;;  %5398 = vmatpush1.bf16.msra.mxu1 %v6605_v32  ;;  %v3956_v27 = vld [vmem:[#allocation11 + $0x760] sm:$0xff] }
 0x4fb   : > { %5317 = vmatprep.subr.bf16.mxu0 %v6612_v38  ;;  %5399 = vmatprep.subr.bf16.mxu1 %v6614_v44  ;;  %v6636_v32 = vcombine.high %v3952_v41, %v3956_v27  ;;  %v6638_v38 = vcombine.high %v3953_v33, %v3957_v43  ;;  %v3960_v44 = vld [vmem:[#allocation11 + $0x780] sm:$0xff]  ;;  %v6635_v50 = vcombine.low %v3952_v41, %v3956_v27  ;;  %v3723_v41 = vld [vmem:[#allocation11 + $0x18] sm:$0xff] }
 0x4fc   : > { %v3727_v27 = vld [vmem:[#allocation11 + $0x38] sm:$0xff]  ;;  %v6653_v43 = vcombine.low %v3969_v47, %v3973_v61 }
 0x4fe   : > { %5318 = vmatpush1.bf16.msra.mxu0 %v6611_v53  ;;  %5400 = vmatpush1.bf16.msra.mxu1 %v6613_v36  ;;  %v3964_v53 = vld [vmem:[#allocation11 + $0x7a0] sm:$0xff] }
 0x4ff   : > { %5319 = vmatprep.subr.bf16.mxu0 %v6620_v45  ;;  %5401 = vmatprep.subr.bf16.mxu1 %v6622_v46  ;;  %v6644_v36 = vcombine.high %v3960_v44, %v3964_v53  ;;  %v6646_v45 = vcombine.high %v3961_v39, %v3965_v54  ;;  %v3968_v46 = vld [vmem:[#allocation11 + $0x7c0] sm:$0xff]  ;;  %v6643_v56 = vcombine.low %v3960_v44, %v3964_v53  ;;  %v3734_v53 = vld [vmem:[#allocation11 + $0x70] sm:$0xff]  ;;  %v3731_v39 = vld [vmem:[#allocation11 + $0x58] sm:$0xff] }
 0x500   : > { %v7992_v44 = vpack.c.bf16 %v7271_v59, %v7271_v59  ;;  %v3735_v54 = vld [vmem:[#allocation11 + $0x78] sm:$0xff] }
 0x501   : > { %v3743_v59 = vld [vmem:[#allocation11 + $0xb8] sm:$0xff] }
 0x502   : > { %5320 = vmatpush1.bf16.msra.mxu0 %v6619_v24  ;;  %5402 = vmatpush1.bf16.msra.mxu1 %v6621_v48  ;;  %v3972_v24 = vld [vmem:[#allocation11 + $0x7e0] sm:$0xff] }
 0x503   : > { %5321 = vmatprep.subr.bf16.mxu0 %v6628_v55  ;;  %5403 = vmatprep.subr.bf16.mxu1 %v6630_v51  ;;  %v6652_v48 = vcombine.high %v3968_v46, %v3972_v24  ;;  %v6654_v55 = vcombine.high %v3969_v47, %v3973_v61  ;;  %v3722_v51 = vld [vmem:[#allocation11 + $0x10] sm:$0xff]  ;;  %v6651_v33 = vcombine.low %v3968_v46, %v3972_v24  ;;  %v3739_v47 = vld [vmem:[#allocation11 + $0x98] sm:$0xff] }
 0x504   : > { %v3738_v46 = vld [vmem:[#allocation11 + $0x90] sm:$0xff] }
 0x505   : > { %v3742_v24 = vld [vmem:[#allocation11 + $0xb0] sm:$0xff] }
 0x506   : > { %5322 = vmatpush1.bf16.msra.mxu0 %v6627_v29  ;;  %5404 = vmatpush1.bf16.msra.mxu1 %v6629_v25  ;;  %v3726_v29 = vld [vmem:[#allocation11 + $0x30] sm:$0xff] }
 0x507   : > { %5323 = vmatprep.subr.bf16.mxu0 %v6636_v32  ;;  %5405 = vmatprep.subr.bf16.mxu1 %v6638_v38  ;;  %v6408_v25 = vcombine.high %v3722_v51, %v3726_v29  ;;  %v6410_v32 = vcombine.high %v3723_v41, %v3727_v27  ;;  %v3730_v38 = vld [vmem:[#allocation11 + $0x50] sm:$0xff] }
 0x508   : > { %v6415_v61 = vcombine.low %v3730_v38, %v3734_v53 }
 0x50a   : > { %5324 = vmatpush1.bf16.msra.mxu0 %v6635_v50  ;;  %5406 = vmatpush1.bf16.msra.mxu1 %v6637_v34  ;;  %v6407_v50 = vcombine.low %v3722_v51, %v3726_v29  ;;  %v6409_v34 = vcombine.low %v3723_v41, %v3727_v27  ;;  %v3750_v51 = vld [vmem:[#allocation11 + $0xf0] sm:$0xff]  ;;  %v3747_v29 = vld [vmem:[#allocation11 + $0xd8] sm:$0xff]  ;;  %v6423_v27 = vcombine.low %v3738_v46, %v3742_v24 }
 0x50b   : > { %5325 = vmatprep.subr.bf16.mxu0 %v6644_v36  ;;  %5407 = vmatprep.subr.bf16.mxu1 %v6646_v45  ;;  %v6416_v36 = vcombine.high %v3730_v38, %v3734_v53  ;;  %v6418_v45 = vcombine.high %v3731_v39, %v3735_v54  ;;  %v3751_v41 = vld [vmem:[#allocation11 + $0xf8] sm:$0xff]  ;;  %v3758_v38 = vld [vmem:[#allocation11 + $0x130] sm:$0xff] }
 0x50c   : > { %v3759_v53 = vld [vmem:[#allocation11 + $0x138] sm:$0xff] }
 0x50e   : > { %5326 = vmatpush1.bf16.msra.mxu0 %v6643_v56  ;;  %5408 = vmatpush1.bf16.msra.mxu1 %v6645_v42  ;;  %v6417_v56 = vcombine.low %v3731_v39, %v3735_v54  ;;  %v6424_v42 = vcombine.high %v3738_v46, %v3742_v24  ;;  %v6433_v54 = vcombine.low %v3747_v29, %v3751_v41  ;;  %v3763_v46 = vld [vmem:[#allocation11 + $0x158] sm:$0xff] }
 0x50f   : > { %5327 = vmatprep.subr.bf16.mxu0 %v6652_v48  ;;  %5409 = vmatprep.subr.bf16.mxu1 %v6654_v55  ;;  %v6426_v48 = vcombine.high %v3739_v47, %v3743_v59  ;;  %v3746_v55 = vld [vmem:[#allocation11 + $0xd0] sm:$0xff]  ;;  %v3767_v24 = vld [vmem:[#allocation11 + $0x178] sm:$0xff] }
 0x510   : > { %v6431_v39 = vcombine.low %v3746_v55, %v3750_v51 }
 0x512   : > { %5328 = vmatpush1.bf16.msra.mxu0 %v6651_v33  ;;  %5410 = vmatpush1.bf16.msra.mxu1 %v6653_v43  ;;  %v6425_v33 = vcombine.low %v3739_v47, %v3743_v59  ;;  %v6432_v43 = vcombine.high %v3746_v55, %v3750_v51  ;;  %v3771_v55 = vld [vmem:[#allocation11 + $0x198] sm:$0xff] }
 0x513   : > { %5420 = vmatprep.subr.bf16.mxu0 %v6408_v25  ;;  %5502 = vmatprep.subr.bf16.mxu1 %v6410_v32  ;;  %v6434_v25 = vcombine.high %v3747_v29, %v3751_v41  ;;  %v3754_v32 = vld [vmem:[#allocation11 + $0x110] sm:$0xff]  ;;  %v3775_v51 = vld [vmem:[#allocation11 + $0x1b8] sm:$0xff]  ;;  %v6449_v41 = vcombine.low %v3763_v46, %v3767_v24 }
 0x514   : > { %v6439_v47 = vcombine.low %v3754_v32, %v3758_v38 }
 0x515   : > { %5330 = vmatmul.mubr.bf16.vlgmr.msra.gmra.mrb[16].mxu0 %v7992_v44  ;;  %5412 = vmatmul.mubr.bf16.vlgmr.msra.gmra.mrb[16].mxu1 %v7992_v44 }
 0x516   : > { %5421 = vmatpush1.bf16.msra.mxu0 %v6407_v50  ;;  %5452 = vmatprep.mubr.bf16.mxu0 %v7968_v35  ;;  %v6440_v50 = vcombine.high %v3754_v32, %v3758_v38  ;;  %v3779_v32 = vld [vmem:[#allocation11 + $0x1d8] sm:$0xff] }
 0x517   : > { %5503 = vmatpush1.bf16.msra.mxu1 %v6409_v34  ;;  %5534 = vmatprep.mubr.bf16.mxu1 %v7968_v35  ;;  %v3755_v35 = vld [vmem:[#allocation11 + $0x118] sm:$0xff] }
 0x518   : > { %5422 = vmatprep.subr.bf16.mxu0 %v6416_v36  ;;  %5504 = vmatprep.subr.bf16.mxu1 %v6418_v45  ;;  %v6442_v34 = vcombine.high %v3755_v35, %v3759_v53  ;;  %v3762_v36 = vld [vmem:[#allocation11 + $0x150] sm:$0xff]  ;;  %v6441_v59 = vcombine.low %v3755_v35, %v3759_v53  ;;  %v3783_v38 = vld [vmem:[#allocation11 + $0x1f8] sm:$0xff]  ;;  %v6457_v53 = vcombine.low %v3771_v55, %v3775_v51 }
 0x519   : > { %v3766_v45 = vld [vmem:[#allocation11 + $0x170] sm:$0xff] }
 0x51a   : > { %5423 = vmatpush1.bf16.msra.mxu0 %v6415_v61  ;;  %v6448_v61 = vcombine.high %v3762_v36, %v3766_v45  ;;  %v6447_v29 = vcombine.low %v3762_v36, %v3766_v45  ;;  %v3787_v36 = vld [vmem:[#allocation11 + $0x218] sm:$0xff] }
 0x51b   : > { %5505 = vmatpush1.bf16.msra.mxu1 %v6417_v56  ;;  %5424 = vmatprep.subr.bf16.mxu0 %v6424_v42  ;;  %v6450_v56 = vcombine.high %v3763_v46, %v3767_v24  ;;  %v3770_v42 = vld [vmem:[#allocation11 + $0x190] sm:$0xff]  ;;  %v3791_v45 = vld [vmem:[#allocation11 + $0x238] sm:$0xff]  ;;  %v6465_v24 = vcombine.low %v3779_v32, %v3783_v38 }
 0x51c   : > { %5506 = vmatprep.subr.bf16.mxu1 %v6426_v48  ;;  %v3774_v48 = vld [vmem:[#allocation11 + $0x1b0] sm:$0xff] }
 0x51d   : > { %v6455_v35 = vcombine.low %v3770_v42, %v3774_v48 }
 0x51e   : > { %5425 = vmatpush1.bf16.msra.mxu0 %v6423_v27  ;;  %v6456_v27 = vcombine.high %v3770_v42, %v3774_v48  ;;  %v3795_v42 = vld [vmem:[#allocation11 + $0x258] sm:$0xff] }
 0x51f   : > { %5507 = vmatpush1.bf16.msra.mxu1 %v6425_v33  ;;  %5426 = vmatprep.subr.bf16.mxu0 %v6432_v43  ;;  %v6458_v33 = vcombine.high %v3771_v55, %v3775_v51  ;;  %v3778_v43 = vld [vmem:[#allocation11 + $0x1d0] sm:$0xff]  ;;  %v3799_v48 = vld [vmem:[#allocation11 + $0x278] sm:$0xff]  ;;  %v6473_v51 = vcombine.low %v3787_v36, %v3791_v45 }
 0x520   : > { %5508 = vmatprep.subr.bf16.mxu1 %v6434_v25  ;;  %v3782_v25 = vld [vmem:[#allocation11 + $0x1f0] sm:$0xff] }
 0x521   : > { %v6463_v46 = vcombine.low %v3778_v43, %v3782_v25 }
 0x522   : > { %5427 = vmatpush1.bf16.msra.mxu0 %v6431_v39  ;;  %v6464_v39 = vcombine.high %v3778_v43, %v3782_v25  ;;  %v3803_v43 = vld [vmem:[#allocation11 + $0x298] sm:$0xff] }
 0x523   : > { %5509 = vmatpush1.bf16.msra.mxu1 %v6433_v54  ;;  %5428 = vmatprep.subr.bf16.mxu0 %v6440_v50  ;;  %v6466_v54 = vcombine.high %v3779_v32, %v3783_v38  ;;  %v3786_v50 = vld [vmem:[#allocation11 + $0x210] sm:$0xff]  ;;  %v3807_v25 = vld [vmem:[#allocation11 + $0x2b8] sm:$0xff]  ;;  %v6481_v38 = vcombine.low %v3795_v42, %v3799_v48 }
 0x524   : > { %5510 = vmatprep.subr.bf16.mxu1 %v6442_v34  ;;  %v3790_v34 = vld [vmem:[#allocation11 + $0x230] sm:$0xff] }
 0x525   : > { %v6471_v55 = vcombine.low %v3786_v50, %v3790_v34 }
 0x526   : > { %5429 = vmatpush1.bf16.msra.mxu0 %v6439_v47  ;;  %v6472_v47 = vcombine.high %v3786_v50, %v3790_v34  ;;  %v3811_v50 = vld [vmem:[#allocation11 + $0x2d8] sm:$0xff] }
 0x527   : > { %5511 = vmatpush1.bf16.msra.mxu1 %v6441_v59  ;;  %5430 = vmatprep.subr.bf16.mxu0 %v6448_v61  ;;  %v6474_v59 = vcombine.high %v3787_v36, %v3791_v45  ;;  %v3794_v61 = vld [vmem:[#allocation11 + $0x250] sm:$0xff]  ;;  %v3815_v34 = vld [vmem:[#allocation11 + $0x2f8] sm:$0xff]  ;;  %v6489_v45 = vcombine.low %v3803_v43, %v3807_v25 }
 0x528   : > { %5512 = vmatprep.subr.bf16.mxu1 %v6450_v56  ;;  %v3798_v56 = vld [vmem:[#allocation11 + $0x270] sm:$0xff] }
 0x529   : > { %v6479_v32 = vcombine.low %v3794_v61, %v3798_v56 }
 0x52a   : > { %5431 = vmatpush1.bf16.msra.mxu0 %v6447_v29  ;;  %v6480_v29 = vcombine.high %v3794_v61, %v3798_v56  ;;  %v3819_v61 = vld [vmem:[#allocation11 + $0x318] sm:$0xff] }
 0x52b   : > { %5513 = vmatpush1.bf16.msra.mxu1 %v6449_v41  ;;  %5432 = vmatprep.subr.bf16.mxu0 %v6456_v27  ;;  %v6482_v41 = vcombine.high %v3795_v42, %v3799_v48  ;;  %v3802_v27 = vld [vmem:[#allocation11 + $0x290] sm:$0xff]  ;;  %v3823_v56 = vld [vmem:[#allocation11 + $0x338] sm:$0xff]  ;;  %v6497_v48 = vcombine.low %v3811_v50, %v3815_v34 }
 0x52c   : > { %5514 = vmatprep.subr.bf16.mxu1 %v6458_v33  ;;  %v3806_v33 = vld [vmem:[#allocation11 + $0x2b0] sm:$0xff] }
 0x52d   : > { %v6487_v36 = vcombine.low %v3802_v27, %v3806_v33 }
 0x52e   : > { %5433 = vmatpush1.bf16.msra.mxu0 %v6455_v35  ;;  %v6488_v35 = vcombine.high %v3802_v27, %v3806_v33  ;;  %v3827_v27 = vld [vmem:[#allocation11 + $0x358] sm:$0xff] }
 0x52f   : > { %5515 = vmatpush1.bf16.msra.mxu1 %v6457_v53  ;;  %5434 = vmatprep.subr.bf16.mxu0 %v6464_v39  ;;  %v6490_v53 = vcombine.high %v3803_v43, %v3807_v25  ;;  %v3810_v39 = vld [vmem:[#allocation11 + $0x2d0] sm:$0xff]  ;;  %v3831_v33 = vld [vmem:[#allocation11 + $0x378] sm:$0xff]  ;;  %v6505_v25 = vcombine.low %v3819_v61, %v3823_v56 }
 0x530   : > { %5516 = vmatprep.subr.bf16.mxu1 %v6466_v54  ;;  %v3814_v54 = vld [vmem:[#allocation11 + $0x2f0] sm:$0xff] }
 0x531   : > { %v6495_v42 = vcombine.low %v3810_v39, %v3814_v54 }
 0x532   : > { %5435 = vmatpush1.bf16.msra.mxu0 %v6463_v46  ;;  %v6496_v46 = vcombine.high %v3810_v39, %v3814_v54  ;;  %v3835_v39 = vld [vmem:[#allocation11 + $0x398] sm:$0xff] }
 0x533   : > { %5517 = vmatpush1.bf16.msra.mxu1 %v6465_v24  ;;  %5436 = vmatprep.subr.bf16.mxu0 %v6472_v47  ;;  %v6498_v24 = vcombine.high %v3811_v50, %v3815_v34  ;;  %v3818_v47 = vld [vmem:[#allocation11 + $0x310] sm:$0xff]  ;;  %v3839_v54 = vld [vmem:[#allocation11 + $0x3b8] sm:$0xff]  ;;  %v6513_v34 = vcombine.low %v3827_v27, %v3831_v33 }
 0x534   : > { %5518 = vmatprep.subr.bf16.mxu1 %v6474_v59  ;;  %v3822_v59 = vld [vmem:[#allocation11 + $0x330] sm:$0xff] }
 0x535   : > { %v6503_v43 = vcombine.low %v3818_v47, %v3822_v59 }
 0x536   : > { %5437 = vmatpush1.bf16.msra.mxu0 %v6471_v55  ;;  %v6504_v55 = vcombine.high %v3818_v47, %v3822_v59  ;;  %v3843_v47 = vld [vmem:[#allocation11 + $0x3d8] sm:$0xff] }
 0x537   : > { %5519 = vmatpush1.bf16.msra.mxu1 %v6473_v51  ;;  %5438 = vmatprep.subr.bf16.mxu0 %v6480_v29  ;;  %v6506_v51 = vcombine.high %v3819_v61, %v3823_v56  ;;  %v3826_v29 = vld [vmem:[#allocation11 + $0x350] sm:$0xff]  ;;  %v3847_v59 = vld [vmem:[#allocation11 + $0x3f8] sm:$0xff]  ;;  %v6521_v56 = vcombine.low %v3835_v39, %v3839_v54 }
 0x538   : > { %5520 = vmatprep.subr.bf16.mxu1 %v6482_v41  ;;  %v3830_v41 = vld [vmem:[#allocation11 + $0x370] sm:$0xff] }
 0x539   : > { %v6511_v50 = vcombine.low %v3826_v29, %v3830_v41 }
 0x53a   : > { %5439 = vmatpush1.bf16.msra.mxu0 %v6479_v32  ;;  %v6512_v32 = vcombine.high %v3826_v29, %v3830_v41  ;;  %v3851_v29 = vld [vmem:[#allocation11 + $0x418] sm:$0xff] }
 0x53b   : > { %5521 = vmatpush1.bf16.msra.mxu1 %v6481_v38  ;;  %5440 = vmatprep.subr.bf16.mxu0 %v6488_v35  ;;  %v6514_v38 = vcombine.high %v3827_v27, %v3831_v33  ;;  %v3834_v35 = vld [vmem:[#allocation11 + $0x390] sm:$0xff]  ;;  %v3855_v41 = vld [vmem:[#allocation11 + $0x438] sm:$0xff]  ;;  %v6529_v33 = vcombine.low %v3843_v47, %v3847_v59 }
 0x53c   : > { %5522 = vmatprep.subr.bf16.mxu1 %v6490_v53  ;;  %v3838_v53 = vld [vmem:[#allocation11 + $0x3b0] sm:$0xff] }
 0x53d   : > { %v6519_v61 = vcombine.low %v3834_v35, %v3838_v53 }
 0x53e   : > { %5441 = vmatpush1.bf16.msra.mxu0 %v6487_v36  ;;  %v6520_v36 = vcombine.high %v3834_v35, %v3838_v53  ;;  %v3859_v35 = vld [vmem:[#allocation11 + $0x458] sm:$0xff] }
 0x53f   : > { %5523 = vmatpush1.bf16.msra.mxu1 %v6489_v45  ;;  %5442 = vmatprep.subr.bf16.mxu0 %v6496_v46  ;;  %v6522_v45 = vcombine.high %v3835_v39, %v3839_v54  ;;  %v3842_v46 = vld [vmem:[#allocation11 + $0x3d0] sm:$0xff]  ;;  %v3863_v53 = vld [vmem:[#allocation11 + $0x478] sm:$0xff]  ;;  %v6537_v54 = vcombine.low %v3851_v29, %v3855_v41 }
 0x540   : > { %5524 = vmatprep.subr.bf16.mxu1 %v6498_v24  ;;  %v3846_v24 = vld [vmem:[#allocation11 + $0x3f0] sm:$0xff] }
 0x541   : > { %v6527_v27 = vcombine.low %v3842_v46, %v3846_v24 }
 0x542   : > { %5443 = vmatpush1.bf16.msra.mxu0 %v6495_v42  ;;  %v6528_v42 = vcombine.high %v3842_v46, %v3846_v24  ;;  %v3867_v46 = vld [vmem:[#allocation11 + $0x498] sm:$0xff] }
 0x543   : > { %5525 = vmatpush1.bf16.msra.mxu1 %v6497_v48  ;;  %5444 = vmatprep.subr.bf16.mxu0 %v6504_v55  ;;  %v6530_v48 = vcombine.high %v3843_v47, %v3847_v59  ;;  %v3850_v55 = vld [vmem:[#allocation11 + $0x410] sm:$0xff]  ;;  %v3871_v24 = vld [vmem:[#allocation11 + $0x4b8] sm:$0xff]  ;;  %v6545_v59 = vcombine.low %v3859_v35, %v3863_v53 }
 0x544   : > { %5526 = vmatprep.subr.bf16.mxu1 %v6506_v51  ;;  %v3854_v51 = vld [vmem:[#allocation11 + $0x430] sm:$0xff] }
 0x545   : > { %v6535_v39 = vcombine.low %v3850_v55, %v3854_v51 }
 0x546   : > { %5445 = vmatpush1.bf16.msra.mxu0 %v6503_v43  ;;  %v6536_v43 = vcombine.high %v3850_v55, %v3854_v51  ;;  %v3875_v55 = vld [vmem:[#allocation11 + $0x4d8] sm:$0xff] }
 0x547   : > { %5527 = vmatpush1.bf16.msra.mxu1 %v6505_v25  ;;  %5446 = vmatprep.subr.bf16.mxu0 %v6512_v32  ;;  %v6538_v25 = vcombine.high %v3851_v29, %v3855_v41  ;;  %v3858_v32 = vld [vmem:[#allocation11 + $0x450] sm:$0xff]  ;;  %v3879_v51 = vld [vmem:[#allocation11 + $0x4f8] sm:$0xff] }
 0x548   : > { %5528 = vmatprep.subr.bf16.mxu1 %v6514_v38  ;;  %v3862_v38 = vld [vmem:[#allocation11 + $0x470] sm:$0xff] }
 0x549   : > { %v6543_v47 = vcombine.low %v3858_v32, %v3862_v38 }
 0x54a   : > { %5447 = vmatpush1.bf16.msra.mxu0 %v6511_v50  ;;  %v6544_v50 = vcombine.high %v3858_v32, %v3862_v38  ;;  %v3887_v32 = vld [vmem:[#allocation11 + $0x538] sm:$0xff] }
 0x54b   : > { %5529 = vmatpush1.bf16.msra.mxu1 %v6513_v34  ;;  %5448 = vmatprep.subr.bf16.mxu0 %v6520_v36  ;;  %v6546_v34 = vcombine.high %v3859_v35, %v3863_v53  ;;  %v3866_v36 = vld [vmem:[#allocation11 + $0x490] sm:$0xff]  ;;  %v6561_v35 = vcombine.low %v3875_v55, %v3879_v51 }
 0x54c   : > { %5530 = vmatprep.subr.bf16.mxu1 %v6522_v45  ;;  %v3870_v45 = vld [vmem:[#allocation11 + $0x4b0] sm:$0xff] }
 0x54d   : > { %v6551_v29 = vcombine.low %v3866_v36, %v3870_v45 }
 0x54e   : > { %5449 = vmatpush1.bf16.msra.mxu0 %v6519_v61  ;;  %v6552_v61 = vcombine.high %v3866_v36, %v3870_v45 }
 0x54f   : > { %5531 = vmatpush1.bf16.msra.mxu1 %v6521_v56  ;;  %5450 = vmatprep.subr.bf16.mxu0 %v6528_v42  ;;  %v6554_v56 = vcombine.high %v3867_v46, %v3871_v24  ;;  %v3874_v42 = vld [vmem:[#allocation11 + $0x4d0] sm:$0xff] }
 0x550   : > { %5532 = vmatprep.subr.bf16.mxu1 %v6530_v48  ;;  %v3878_v48 = vld [vmem:[#allocation11 + $0x4f0] sm:$0xff] }
 0x551   : > { %v6560_v41 = vcombine.high %v3874_v42, %v3878_v48  ;;  %v6559_v38 = vcombine.low %v3874_v42, %v3878_v48 }
 0x552   : > { %5451 = vmatpush1.bf16.msra.mxu0 %v6527_v27  ;;  %v6562_v27 = vcombine.high %v3875_v55, %v3879_v51 }
 0x553   : > { %5533 = vmatpush1.bf16.msra.mxu1 %v6529_v33  ;;  %5461 = vmatprep.subr.bf16.mxu0 %v6536_v43  ;;  %v3882_v33 = vld [vmem:[#allocation11 + $0x510] sm:$0xff] }
 0x554   : > { %5543 = vmatprep.subr.bf16.mxu1 %v6538_v25  ;;  %v3886_v43 = vld [vmem:[#allocation11 + $0x530] sm:$0xff]  ;;  %v3883_v25 = vld [vmem:[#allocation11 + $0x518] sm:$0xff] }
 0x555   : > { %5453 = vmatmul.mubr.bf16.vlgmr.msra.gmra.mrb[20].mxu0 %v7972_v40  ;;  %v6568_v53 = vcombine.high %v3882_v33, %v3886_v43  ;;  %v6567_v36 = vcombine.low %v3882_v33, %v3886_v43  ;;  %v6569_v45 = vcombine.low %v3883_v25, %v3887_v32 }
 0x556   : > { %5535 = vmatmul.mubr.bf16.vlgmr.msra.gmra.mrb[20].mxu1 %v7972_v40  ;;  %5462 = vmatpush1.bf16.msra.mxu0 %v6535_v39  ;;  %v6553_v40 = vcombine.low %v3867_v46, %v3871_v24  ;;  %v3890_v39 = vld [vmem:[#allocation11 + $0x550] sm:$0xff] }
 0x557   : > { %5544 = vmatpush1.bf16.msra.mxu1 %v6537_v54  ;;  %5463 = vmatprep.subr.bf16.mxu0 %v6544_v50  ;;  %v3894_v54 = vld [vmem:[#allocation11 + $0x570] sm:$0xff]  ;;  %v3891_v50 = vld [vmem:[#allocation11 + $0x558] sm:$0xff] }
 0x558   : > { %5545 = vmatprep.subr.bf16.mxu1 %v6546_v34  ;;  %5493 = vmatprep.mubr.bf16.mxu0 %v7978_v52  ;;  %v3895_v34 = vld [vmem:[#allocation11 + $0x578] sm:$0xff]  ;;  %v6576_v46 = vcombine.high %v3890_v39, %v3894_v54  ;;  %v6575_v42 = vcombine.low %v3890_v39, %v3894_v54 }
 0x559   : > { %5575 = vmatprep.mubr.bf16.mxu1 %v7978_v52  ;;  %v6570_v52 = vcombine.high %v3883_v25, %v3887_v32  ;;  %v6578_v24 = vcombine.high %v3891_v50, %v3895_v34  ;;  %v6577_v48 = vcombine.low %v3891_v50, %v3895_v34 }
 0x55a   : > { %5464 = vmatpush1.bf16.msra.mxu0 %v6543_v47  ;;  %v3898_v47 = vld [vmem:[#allocation11 + $0x590] sm:$0xff] }
 0x55b   : > { %5546 = vmatpush1.bf16.msra.mxu1 %v6545_v59  ;;  %5465 = vmatprep.subr.bf16.mxu0 %v6552_v61  ;;  %v3902_v59 = vld [vmem:[#allocation11 + $0x5b0] sm:$0xff]  ;;  %v3899_v61 = vld [vmem:[#allocation11 + $0x598] sm:$0xff] }
 0x55c   : > { %5547 = vmatprep.subr.bf16.mxu1 %v6554_v56  ;;  %v3903_v56 = vld [vmem:[#allocation11 + $0x5b8] sm:$0xff]  ;;  %v6584_v55 = vcombine.high %v3898_v47, %v3902_v59  ;;  %v6583_v33 = vcombine.low %v3898_v47, %v3902_v59 }
 0x55d   : > { %v6586_v51 = vcombine.high %v3899_v61, %v3903_v56  ;;  %v6585_v43 = vcombine.low %v3899_v61, %v3903_v56 }
 0x55e   : > { %5466 = vmatpush1.bf16.msra.mxu0 %v6551_v29  ;;  %v3906_v29 = vld [vmem:[#allocation11 + $0x5d0] sm:$0xff] }
 0x55f   : > { %5548 = vmatpush1.bf16.msra.mxu1 %v6553_v40  ;;  %5467 = vmatprep.subr.bf16.mxu0 %v6560_v41  ;;  %v3910_v40 = vld [vmem:[#allocation11 + $0x5f0] sm:$0xff]  ;;  %v3907_v41 = vld [vmem:[#allocation11 + $0x5d8] sm:$0xff] }
 0x560   : > { %5549 = vmatprep.subr.bf16.mxu1 %v6562_v27  ;;  %v3911_v27 = vld [vmem:[#allocation11 + $0x5f8] sm:$0xff]  ;;  %v6592_v25 = vcombine.high %v3906_v29, %v3910_v40  ;;  %v6591_v39 = vcombine.low %v3906_v29, %v3910_v40 }
 0x561   : > { %v6594_v32 = vcombine.high %v3907_v41, %v3911_v27  ;;  %v6593_v54 = vcombine.low %v3907_v41, %v3911_v27 }
 0x562   : > { %5468 = vmatpush1.bf16.msra.mxu0 %v6559_v38  ;;  %v3914_v38 = vld [vmem:[#allocation11 + $0x610] sm:$0xff] }
 0x563   : > { %5550 = vmatpush1.bf16.msra.mxu1 %v6561_v35  ;;  %5469 = vmatprep.subr.bf16.mxu0 %v6568_v53  ;;  %v3918_v35 = vld [vmem:[#allocation11 + $0x630] sm:$0xff]  ;;  %v3915_v53 = vld [vmem:[#allocation11 + $0x618] sm:$0xff] }
 0x564   : > { %5551 = vmatprep.subr.bf16.mxu1 %v6570_v52  ;;  %v3919_v52 = vld [vmem:[#allocation11 + $0x638] sm:$0xff]  ;;  %v6600_v50 = vcombine.high %v3914_v38, %v3918_v35  ;;  %v6599_v47 = vcombine.low %v3914_v38, %v3918_v35 }
 0x565   : > { %v6602_v34 = vcombine.high %v3915_v53, %v3919_v52  ;;  %v6601_v59 = vcombine.low %v3915_v53, %v3919_v52 }
 0x566   : > { %5470 = vmatpush1.bf16.msra.mxu0 %v6567_v36  ;;  %v3922_v36 = vld [vmem:[#allocation11 + $0x650] sm:$0xff] }
 0x567   : > { %5552 = vmatpush1.bf16.msra.mxu1 %v6569_v45  ;;  %5471 = vmatprep.subr.bf16.mxu0 %v6576_v46  ;;  %v3926_v45 = vld [vmem:[#allocation11 + $0x670] sm:$0xff]  ;;  %v3923_v46 = vld [vmem:[#allocation11 + $0x658] sm:$0xff] }
 0x568   : > { %5553 = vmatprep.subr.bf16.mxu1 %v6578_v24  ;;  %v3927_v24 = vld [vmem:[#allocation11 + $0x678] sm:$0xff]  ;;  %v6608_v61 = vcombine.high %v3922_v36, %v3926_v45  ;;  %v6607_v29 = vcombine.low %v3922_v36, %v3926_v45 }
 0x569   : > { %v6610_v56 = vcombine.high %v3923_v46, %v3927_v24  ;;  %v6609_v40 = vcombine.low %v3923_v46, %v3927_v24 }
 0x56a   : > { %5472 = vmatpush1.bf16.msra.mxu0 %v6575_v42  ;;  %v3930_v42 = vld [vmem:[#allocation11 + $0x690] sm:$0xff] }
 0x56b   : > { %5554 = vmatpush1.bf16.msra.mxu1 %v6577_v48  ;;  %5473 = vmatprep.subr.bf16.mxu0 %v6584_v55  ;;  %v3934_v48 = vld [vmem:[#allocation11 + $0x6b0] sm:$0xff]  ;;  %v3931_v55 = vld [vmem:[#allocation11 + $0x698] sm:$0xff] }
 0x56c   : > { %5555 = vmatprep.subr.bf16.mxu1 %v6586_v51  ;;  %v3935_v51 = vld [vmem:[#allocation11 + $0x6b8] sm:$0xff]  ;;  %v6616_v41 = vcombine.high %v3930_v42, %v3934_v48  ;;  %v6615_v38 = vcombine.low %v3930_v42, %v3934_v48 }
 0x56d   : > { %v6618_v27 = vcombine.high %v3931_v55, %v3935_v51  ;;  %v6617_v35 = vcombine.low %v3931_v55, %v3935_v51 }
 0x56e   : > { %5474 = vmatpush1.bf16.msra.mxu0 %v6583_v33  ;;  %v3938_v33 = vld [vmem:[#allocation11 + $0x6d0] sm:$0xff] }
 0x56f   : > { %5556 = vmatpush1.bf16.msra.mxu1 %v6585_v43  ;;  %5475 = vmatprep.subr.bf16.mxu0 %v6592_v25  ;;  %v3942_v43 = vld [vmem:[#allocation11 + $0x6f0] sm:$0xff]  ;;  %v3939_v25 = vld [vmem:[#allocation11 + $0x6d8] sm:$0xff] }
 0x570   : > { %5557 = vmatprep.subr.bf16.mxu1 %v6594_v32  ;;  %v3943_v32 = vld [vmem:[#allocation11 + $0x6f8] sm:$0xff]  ;;  %v6624_v53 = vcombine.high %v3938_v33, %v3942_v43  ;;  %v6623_v36 = vcombine.low %v3938_v33, %v3942_v43 }
 0x571   : > { %v6626_v52 = vcombine.high %v3939_v25, %v3943_v32  ;;  %v6625_v45 = vcombine.low %v3939_v25, %v3943_v32 }
 0x572   : > { %5476 = vmatpush1.bf16.msra.mxu0 %v6591_v39  ;;  %v3946_v39 = vld [vmem:[#allocation11 + $0x710] sm:$0xff] }
 0x573   : > { %5558 = vmatpush1.bf16.msra.mxu1 %v6593_v54  ;;  %5477 = vmatprep.subr.bf16.mxu0 %v6600_v50  ;;  %v3950_v54 = vld [vmem:[#allocation11 + $0x730] sm:$0xff]  ;;  %v3947_v50 = vld [vmem:[#allocation11 + $0x718] sm:$0xff] }
 0x574   : > { %5559 = vmatprep.subr.bf16.mxu1 %v6602_v34  ;;  %v3951_v34 = vld [vmem:[#allocation11 + $0x738] sm:$0xff]  ;;  %v6632_v46 = vcombine.high %v3946_v39, %v3950_v54  ;;  %v6631_v42 = vcombine.low %v3946_v39, %v3950_v54 }
 0x575   : > { %v6634_v24 = vcombine.high %v3947_v50, %v3951_v34  ;;  %v6633_v48 = vcombine.low %v3947_v50, %v3951_v34 }
 0x576   : > { %5478 = vmatpush1.bf16.msra.mxu0 %v6599_v47  ;;  %v3954_v47 = vld [vmem:[#allocation11 + $0x750] sm:$0xff] }
 0x577   : > { %5560 = vmatpush1.bf16.msra.mxu1 %v6601_v59  ;;  %5479 = vmatprep.subr.bf16.mxu0 %v6608_v61  ;;  %v3958_v59 = vld [vmem:[#allocation11 + $0x770] sm:$0xff]  ;;  %v3955_v61 = vld [vmem:[#allocation11 + $0x758] sm:$0xff] }
 0x578   : > { %5561 = vmatprep.subr.bf16.mxu1 %v6610_v56  ;;  %v3959_v56 = vld [vmem:[#allocation11 + $0x778] sm:$0xff]  ;;  %v6640_v55 = vcombine.high %v3954_v47, %v3958_v59  ;;  %v6639_v33 = vcombine.low %v3954_v47, %v3958_v59 }
 0x579   : > { %v6642_v51 = vcombine.high %v3955_v61, %v3959_v56  ;;  %v6641_v43 = vcombine.low %v3955_v61, %v3959_v56 }
 0x57a   : > { %5480 = vmatpush1.bf16.msra.mxu0 %v6607_v29  ;;  %v3962_v29 = vld [vmem:[#allocation11 + $0x790] sm:$0xff] }
 0x57b   : > { %5562 = vmatpush1.bf16.msra.mxu1 %v6609_v40  ;;  %5481 = vmatprep.subr.bf16.mxu0 %v6616_v41  ;;  %v3966_v40 = vld [vmem:[#allocation11 + $0x7b0] sm:$0xff]  ;;  %v3963_v41 = vld [vmem:[#allocation11 + $0x798] sm:$0xff] }
 0x57c   : > { %5563 = vmatprep.subr.bf16.mxu1 %v6618_v27  ;;  %v3967_v27 = vld [vmem:[#allocation11 + $0x7b8] sm:$0xff]  ;;  %v6648_v25 = vcombine.high %v3962_v29, %v3966_v40  ;;  %v6647_v39 = vcombine.low %v3962_v29, %v3966_v40 }
 0x57d   : > { %v6650_v32 = vcombine.high %v3963_v41, %v3967_v27  ;;  %v6649_v54 = vcombine.low %v3963_v41, %v3967_v27 }
 0x57e   : > { %5482 = vmatpush1.bf16.msra.mxu0 %v6615_v38  ;;  %v3970_v38 = vld [vmem:[#allocation11 + $0x7d0] sm:$0xff] }
 0x57f   : > { %5564 = vmatpush1.bf16.msra.mxu1 %v6617_v35  ;;  %5483 = vmatprep.subr.bf16.mxu0 %v6624_v53  ;;  %v3974_v35 = vld [vmem:[#allocation11 + $0x7f0] sm:$0xff]  ;;  %v3971_v53 = vld [vmem:[#allocation11 + $0x7d8] sm:$0xff] }
 0x580   : > { %5565 = vmatprep.subr.bf16.mxu1 %v6626_v52  ;;  %v3975_v52 = vld [vmem:[#allocation11 + $0x7f8] sm:$0xff]  ;;  %v6656_v50 = vcombine.high %v3970_v38, %v3974_v35 }
 0x581   : > { %v6658_v34 = vcombine.high %v3971_v53, %v3975_v52 }
 0x582   : > { %5484 = vmatpush1.bf16.msra.mxu0 %v6623_v36  ;;  %v6655_v36 = vcombine.low %v3970_v38, %v3974_v35 }
 0x583   : > { %5566 = vmatpush1.bf16.msra.mxu1 %v6625_v45  ;;  %5485 = vmatprep.subr.bf16.mxu0 %v6632_v46  ;;  %v6657_v45 = vcombine.low %v3971_v53, %v3975_v52 }
 0x584   : > { %5567 = vmatprep.subr.bf16.mxu1 %v6634_v24 }
 0x586   : > { %5486 = vmatpush1.bf16.msra.mxu0 %v6631_v42 }
 0x587   : > { %5568 = vmatpush1.bf16.msra.mxu1 %v6633_v48  ;;  %5487 = vmatprep.subr.bf16.mxu0 %v6640_v55 }
 0x588   : > { %5569 = vmatprep.subr.bf16.mxu1 %v6642_v51 }
 0x58a   : > { %5488 = vmatpush1.bf16.msra.mxu0 %v6639_v33 }
 0x58b   : > { %5570 = vmatpush1.bf16.msra.mxu1 %v6641_v43  ;;  %5489 = vmatprep.subr.bf16.mxu0 %v6648_v25 }
 0x58c   : > { %5571 = vmatprep.subr.bf16.mxu1 %v6650_v32 }
 0x58e   : > { %5490 = vmatpush1.bf16.msra.mxu0 %v6647_v39 }
 0x58f   : > { %5572 = vmatpush1.bf16.msra.mxu1 %v6649_v54  ;;  %5491 = vmatprep.subr.bf16.mxu0 %v6656_v50 }
 0x590   : > { %5573 = vmatprep.subr.bf16.mxu1 %v6658_v34 }
 0x592   : > { %5492 = vmatpush1.bf16.msra.mxu0 %v6655_v36 }
 0x593   : > { %5574 = vmatpush1.bf16.msra.mxu1 %v6657_v45 }
 0x595   : > { %5494 = vmatmul.mubr.bf16.vlgmr.msra.gmra.mrb[20].mxu0 %v7992_v44 }
 0x596   : > { %5576 = vmatmul.mubr.bf16.vlgmr.msra.gmra.mrb[20].mxu1 %v7992_v44 }
 0x5e8   : > { %v5331_v46 = vpop.f32.mrb[16].mxu0  ;;  %v5413_v24 = vpop.f32.mrb[16].mxu1 }
 0x5e9   : > { %v5333_v47 = vpop.f32.mrb[17].mxu0  ;;  %v5415_v59 = vpop.f32.mrb[17].mxu1  ;;  %v6706_v55 = vadd.f32 %v5331_v46, %v741_v6  ;;  %v6708_v51 = vadd.f32 %v5413_v24, %v749_v8  ;;  %v6990_v6 = vld [vmem:[#allocation14 + $0x70] ss:$8 sps:$4 sm:$0xff] (%p8033_p0)   ;;  %v6993_v8 = vld [vmem:[#allocation14 + $0x80] ss:$8 sps:$4 sm:$0xff] (%p8033_p0)  }
 0x5ea   : > { %v5335_v61 = vpop.f32.mrb[18].mxu0  ;;  %v5417_v56 = vpop.f32.mrb[18].mxu1  ;;  %v6707_v44 = vadd.f32 %v5333_v47, %v745_v10  ;;  %v6709_v29 = vadd.f32 %v5415_v59, %v753_v12  ;;  %v6996_v10 = vld [vmem:[#allocation14 + $0x90] ss:$8 sps:$4 sm:$0xff] (%p8033_p0)   ;;  %v6999_v12 = vld [vmem:[#allocation14 + $0xa0] ss:$8 sps:$4 sm:$0xff] (%p8033_p0)  }
 0x5eb   : > { %v5336_v42 = vpop.f32.mrb[19].mxu0  ;;  %v5418_v48 = vpop.f32.mrb[19].mxu1  ;;  %v6659_v40 = vmul.f32 -1.442695, %v6706_v55  ;;  %v6661_v41 = vmul.f32 -1.442695, %v6708_v51  ;;  %v8104_v61 = vrot.slane %v7614_v3, %v7646_v18 }
 0x5ec   : > { %v6660_v27 = vmul.f32 -1.442695, %v6707_v44  ;;  %v6662_v33 = vmul.f32 -1.442695, %v6709_v29  ;;  %v6985_v3 = vld [vmem:[#allocation14 + $0x64] ss:$8 sps:$4 sm:$0xff] (%p8033_p0)  }
 0x5ed   : > { %6935 = vpow2.f32 %v6659_v40  ;;  %v7008_v18 = vld [vmem:[#allocation14 + $0xd0] ss:$8 sps:$4 sm:$0xff] (%p8033_p0)  }
 0x5ee   : > { %6937 = vpow2.f32 %v6661_v41 }
 0x5ef   : > { %6939 = vpow2.f32 %v6660_v27 }
 0x5f0   : > { %6941 = vpow2.f32 %v6662_v33 }
 0x5f7   : > { %v6936_v43 = vpop.eup %6935 }
 0x5f8   : > { %v6938_v25 = vpop.eup %6937  ;;  %v5602_v35 = vadd.f32 1.0, %v6936_v43 }
 0x5f9   : > { %v6940_v32 = vpop.eup %6939  ;;  %v5604_v53 = vadd.f32 1.0, %v6938_v25 }
 0x5fa   : > { %v6942_v38 = vpop.eup %6941  ;;  %v5603_v52 = vadd.f32 1.0, %v6940_v32  ;;  %6943 = vrcp.f32 %v5602_v35 }
 0x5fb   : > { %v5605_v39 = vadd.f32 1.0, %v6942_v38  ;;  %6945 = vrcp.f32 %v5604_v53 }
 0x5fc   : > { %6947 = vrcp.f32 %v5603_v52 }
 0x5fd   : > { %6949 = vrcp.f32 %v5605_v39 }
 0x604   : > { %v6944_v44 = vpop.eup %6943 }
 0x605   : > { %v6946_v29 = vpop.eup %6945 }
 0x606   : > { %v6948_v40 = vpop.eup %6947  ;;  %v5622_v43 = vmul.f32 %v7263_v58, %v6946_v29  ;;  %v8110_v29 = vmov %v7962_v49  ;;  %v6970_v49 = vld [vmem:[#allocation14 + $0x14] ss:$8 sps:$4 sm:$0xff] (%p8033_p0)  }
 0x607   : > { %v6950_v41 = vpop.eup %6949 }
 0x608   : > { %v5623_v52 = vmul.f32 %v7259_v57, %v6950_v41 }
 0x668   : > { %v5495_v54 = vpop.f32.mrb[20].mxu0 }
 0x669   : > { %v6710_v50 = vadd.f32 %v5495_v54, %v757_v17  ;;  %v5577_v34 = vpop.f32.mrb[20].mxu1  ;;  %v5497_v36 = vpop.f32.mrb[21].mxu0  ;;  %v7006_v17 = vld [vmem:[#allocation14 + $0xd4] ss:$8 sps:$4 sm:$0xff] (%p8033_p0)  }
 0x66a   : > { %v6712_v45 = vadd.f32 %v5577_v34, %v765_v20  ;;  %v6711_v46 = vadd.f32 %v5497_v36, %v761_v22  ;;  %v5579_v24 = vpop.f32.mrb[21].mxu1  ;;  %v5499_v47 = vpop.f32.mrb[22].mxu0  ;;  %v7011_v20 = vld [vmem:[#allocation14 + $0xe0] ss:$8 sps:$4 sm:$0xff] (%p8033_p0)   ;;  %v7014_v22 = vld [vmem:[#allocation14 + $0xf0] ss:$8 sps:$4 sm:$0xff] (%p8033_p0)  }
 0x66b   : > { %v6663_v59 = vmul.f32 -1.442695, %v6710_v50  ;;  %v6713_v56 = vadd.f32 %v5579_v24, %v8104_v61  ;;  %v5581_v42 = vpop.f32.mrb[22].mxu1  ;;  %v5500_v48 = vpop.f32.mrb[23].mxu0  ;;  %v6969_v47 = vld [vmem:[#allocation14] ss:$8 sps:$4 sm:$0xff] (%p8033_p0)  }
 0x66c   : > { %6951 = vtanh.f32 %v6712_v45  ;;  %v6664_v55 = vmul.f32 -1.442695, %v6711_v46  ;;  %v5582_v51 = vpop.f32.mrb[23].mxu1  ;;  %v6973_v42 = vld [vmem:[#allocation14 + $0x24] ss:$8 sps:$4 sm:$0xff] (%p8033_p0)  }
 0x66d   : > { %6953 = vpow2.f32 %v6663_v59  ;;  %v6975_v48 = vld [vmem:[#allocation14 + $0x20] ss:$8 sps:$4 sm:$0xff] (%p8033_p0)   ;;  %v6979_v51 = vld [vmem:[#allocation14 + $0x44] ss:$8 sps:$4 sm:$0xff] (%p8033_p0)  }
 0x66e   : > { %6955 = vpow2.f32 %v6664_v55  ;;  %v6976_v55 = vld [vmem:[#allocation14 + $0x34] ss:$8 sps:$4 sm:$0xff] (%p8033_p0)  }
 0x66f   : > { %6957 = vtanh.f32 %v6713_v56  ;;  %v6972_v56 = vld [vmem:[#allocation14 + $0x10] ss:$8 sps:$4 sm:$0xff] (%p8033_p0)  }
 0x676   : > { %v6952_v27 = vpop.eup %6951 }
 0x677   : > { %v6954_v33 = vpop.eup %6953  ;;  %v5624_v25 = vmul.f32 %v6952_v27, %v6944_v44  ;;  %v8109_v27 = vmov %v7964_v37  ;;  %v6967_v37 = vld [vmem:[#allocation14 + $0x4] ss:$8 sps:$4 sm:$0xff] (%p8033_p0)   ;;  %v6981_v44 = vld [vmem:[#allocation14 + $0x40] ss:$8 sps:$4 sm:$0xff] (%p8033_p0)  }
 0x678   : > { %v6956_v32 = vpop.eup %6955  ;;  %v5606_v38 = vadd.f32 1.0, %v6954_v33  ;;  %5838 = vmatprep.subr.bf16.mxu0 (%p8033_p0), %v6967_v37 }
 0x679   : > { %v6958_v35 = vpop.eup %6957  ;;  %v5626_v58 = vadd.f32 %v5624_v25, %v5622_v43   ;;  %v5607_v53 = vadd.f32 1.0, %v6956_v32  ;;  %5839 = vmatpush1.bf16.msra.mxu0 (%p8033_p0), %v6969_v47 }
 0x67a   : > { %6959 = vrcp.f32 %v5606_v38  ;;  %v5625_v39 = vmul.f32 %v6958_v35, %v6948_v40  ;;  %5840 = vmatprep.subr.bf16.mxu0 (%p8033_p0), %v6970_v49 }
 0x67b   : > { %6961 = vtanh.f32 %v5626_v58 }
 0x67c   : > { %6963 = vrcp.f32 %v5607_v53  ;;  %v5627_v57 = vadd.f32 %v5625_v39, %v5623_v52  }
 0x67d   :  { %5841 = vmatpush1.bf16.msra.mxu0 (%p8033_p0), %v6972_v56 }
 0x67e   : > { %6965 = vtanh.f32 %v5627_v57  ;;  %5842 = vmatprep.subr.bf16.mxu0 (%p8033_p0), %v6973_v42  ;;  %v5666_v57 = vld [vmem:[%s8102_s9] sm:$0x3] (%p8033_p0)  ;;  %s7321_s9 = smov (%p8033_p0), [#allocation15]  }
 0x67f   :  { %v5671_v58 = vrot.slane (%p8033_p0), %v5666_v57, %v7608_v63  ;;  %v5675_v60 = vrot.slane (%p8033_p0), %v5666_v57, %v7616_v4  ;;  %s5905_s14 = sshll.u32 (%p8033_p0), %s7321_s9, 4  ;;  %s5906_s14 = int_to_ptr.vmem [resolvable:$true] %s5905_s14 }
 0x680   :  { %s7173_s18 = scalar_lea.vmem (%p8033_p0), %s5906_s14, 256  ;;  %p7178_p2 = scmp.lt.s32.totalorder (%p8033_p0), %s5906_s14, %s5906_s14 }
 0x681   :  { %5843 = vmatpush1.bf16.msra.mxu0 (%p8033_p0), %v6975_v48  ;;  %p7174_p1 = scmp.ne.s32.totalorder (%p8033_p0), %s5906_s14, %s7173_s18  ;;  %p7179_p3 = scmp.lt.s32.totalorder (%p8033_p0), %s7173_s18, %s7173_s18 }
 0x682   :  { %5844 = vmatprep.subr.bf16.mxu0 (%p8033_p0), %v6976_v55 }
 0x683   :  { %p7180_p4 = por (%p8033_p0), %p7179_p3, %p7178_p2 }
 0x684   : > { %v6960_v54 = vpop.eup %6959 }
 0x685   : > { %v6962_v50 = vpop.eup %6961  ;;  %782 = sbr.rel (!%p8033_p0) target bundleno = 415 (0x19f), region = 96  ;;  %5845 = vmatpush1.bf16.msra.mxu0 (%p8033_p0), %v6978_v31  ;;  %p7181_p5 = pnand (%p8033_p0), %p7180_p4, %p7174_p1 }
 0x686   : > { %v6964_v34 = vpop.eup %6963  ;;  %v8030_v59 = vmul.f32 %v6962_v50, %v6960_v54   ;;  %5846 = vmatprep.subr.bf16.mxu0 (%p8033_p0), %v6979_v51 }
 0x688   : > { %v8105_v36 = vmov %v8030_v59  ;;  %v6966_v45 = vpop.eup %6965 }
 0x689   : > { %v5631_v46 = vmul.f32 %v6966_v45, %v6964_v34   ;;  %v8108_v59 = vmov %v8105_v36  ;;  %5847 = vmatpush1.bf16.msra.mxu0 (%p8033_p0), %v6981_v44  ;;  %v5632_v23 = vpack.c.bf16 (%p8033_p0), %v8105_v36, %v8105_v36 }
 0x68a   :  { %5848 = vmatprep.subr.bf16.mxu0 (%p8033_p0), %v6982_v1 }
 0x68b   : > { %v8107_v61 = vmov %v5631_v46  ;;  %v5633_v24 = vpack.c.bf16 (%p8033_p0), %v5631_v46, %v5631_v46 }
 0x68d   :  { %5870 = vmatprep.mubr.bf16.mxu0 %v5633_v24  ;;  %5849 = vmatpush1.bf16.msra.mxu0 %v6984_v2 }
 0x68e   :  { %5850 = vmatprep.subr.bf16.mxu0 %v6985_v3 }
 0x691   :  { %5851 = vmatpush1.bf16.msra.mxu0 %v6987_v5 }
 0x692   :  { %5852 = vmatprep.subr.bf16.mxu0 %v6988_v0 }
 0x695   :  { %5853 = vmatpush1.bf16.msra.mxu0 %v6990_v6 }
 0x696   :  { %5854 = vmatprep.subr.bf16.mxu0 %v6991_v7 }
 0x699   :  { %5855 = vmatpush1.bf16.msra.mxu0 %v6993_v8 }
 0x69a   :  { %5856 = vmatprep.subr.bf16.mxu0 %v6994_v9 }
 0x69d   :  { %5857 = vmatpush1.bf16.msra.mxu0 %v6996_v10 }
 0x69e   :  { %5858 = vmatprep.subr.bf16.mxu0 %v6997_v11 }
 0x6a1   :  { %5859 = vmatpush1.bf16.msra.mxu0 %v6999_v12 }
 0x6a2   :  { %5860 = vmatprep.subr.bf16.mxu0 %v7000_v13 }
 0x6a5   :  { %5861 = vmatpush1.bf16.msra.mxu0 %v7002_v14 }
 0x6a6   :  { %5862 = vmatprep.subr.bf16.mxu0 %v7003_v15 }
 0x6a9   :  { %5863 = vmatpush1.bf16.msra.mxu0 %v7005_v16 }
 0x6aa   :  { %5864 = vmatprep.subr.bf16.mxu0 %v7006_v17 }
 0x6ad   :  { %5865 = vmatpush1.bf16.msra.mxu0 %v7008_v18 }
 0x6ae   :  { %5866 = vmatprep.subr.bf16.mxu0 %v7009_v19 }
 0x6b1   :  { %5867 = vmatpush1.bf16.msra.mxu0 %v7011_v20 }
 0x6b2   :  { %5868 = vmatprep.subr.bf16.mxu0 %v7012_v21 }
 0x6b5   :  { %5869 = vmatpush1.bf16.msra.mxu0 %v7014_v22 }
 0x6b8   :  { %5871 = vmatmul.mubr.bf16.vlgmr.msra.gmra.mrb[0].mxu0 %v5632_v23 }
 0x78b   :  { %v5872_v26 = vpop.f32.mrb[0].mxu0 }
 0x78c   :  { %v5873_v28 = vadd.f32 %v5872_v26, %v5671_v58  ;;  %v5874_v62 = vpop.f32.mrb[1].mxu0 }
 0x78d   :  { %v5875_v30 = vadd.f32 %v5874_v62, %v5675_v60  ;;  %v5876_v59 = vpop.f32.mrb[2].mxu0 }
 0x78e   :  { %v5879_v61 = vmax.f32 %v5873_v28, 0.0  ;;  %v5877_v29 = vpop.f32.mrb[3].mxu0 }
 0x78f   :  { %v5880_v40 = vmax.f32 %v5875_v30, 0.0 }
 0x790   :  { %v5881_v41 = vmul.f32 %v5879_v61, %v5879_v61 }
 0x791   :  { %v5882_v27 = vmul.f32 %v5880_v40, %v5880_v40 }
 0x793   :  { %v5883_v33 = vadd.f32 %v5882_v27, %v5881_v41 }
 0x795   :  { %5884 = vadd.xlane.f32.xlu0 %v5883_v33 }
 0x822   :  { %v5885_v43 = vpop.xlane.xlu0 %5884 }
 0x823   :  { %7015 = vrsqrt.f32 %v5885_v43  ;;  %vm5888_vm2 = vcmp.eq.f32.partialorder %v5885_v43, inf  ;;  %v5891_v63 = vand.u32 2147483648, %v5885_v43  ;;  %vm5890_vm3 = vcmp.eq.f32.partialorder %v5885_v43, 0.0 }
 0x82d   :  { %v7016_v25 = vpop.eup %7015 }
 0x82e   :  { %v5887_v32 = vmul.f32 %v7016_v25, %v5885_v43 }
 0x830   :  { %v5889_v38 = vsel %vm5888_vm2, %v5885_v43, %v5887_v32 }
 0x831   :  { %v5892_v4 = vsel %vm5890_vm3, %v5891_v63, %v5889_v38 }
 0x832   :  { %v5893_v35 = vadd.f32 1e-05, %v5892_v4 }
 0x834   :  { %7017 = vrcp.f32 %v5893_v35 }
 0x83e   :  { %v7018_v53 = vpop.eup %7017 }
 0x83f   :  { %v5895_v52 = vmul.f32 %v7018_v53, %v5879_v61  ;;  %v5896_v39 = vmul.f32 %v7018_v53, %v5880_v40 }
 0x841   :  { %5897 = vst [vmem:[#allocation15] sm:$0xff] %v5895_v52  ;;  %5898 = vst [vmem:[#allocation15 + $0x8] sm:$0xff] %v5896_v39 }
 0x842   :  { %7184 = shalt.err (!%p7181_p5)
}
 0x843   :  { %s7185_s21 = scalar_lea.hbm %s8103_s10, 256 }
 0x844   :  { %p7186_p6 = scmp.ne.s32.totalorder %s8103_s10, %s7185_s21  ;;  %p7189_p7 = scmp.lt.u32.totalorder %s7185_s21, %s8103_s10 }
 0x846   :  { %p7191_p8 = pnand %p7189_p7, %p7186_p6 }
 0x848   :  { %7194 = shalt.err (!%p7191_p8)
}
 0x849   :  { %5908 = dma.vmem_to_hbm [thread:$0]  %s5906_s14, 256, %s8103_s10, [#allocation5]  }
 0x84a   :  { %7255 = dma.done.wait [#allocation5], 256  }
 0x84b   :  { %7256 = vsyncadd [#allocation5], 4294967040 }
 0x84c   :  { %5912 = vsyncpa [#allocation4], 1 }
 0x84d   :  { %5913 = vsyncpa [#allocation7], 1 }
 0x84e   :  { %5914 = vsyncpa [#allocation10], 1 }
 0x84f   :  { %5915 = vsyncpa [#allocation13], 1 }
 0x850   :  { %5916 = vsyncpa [#allocation5], 1 }

</bundles_post_ra>
